<compile_context>
chip_gen: v7x
topology: tpu7x:2x2x1
jax: 0.10.0
libtpu: 0.0.40
codegen_flags: <defaults>
</compile_context>

<pallas_src>
import functools

import jax
import jax.numpy as jnp
from jax.experimental import pallas as pl
from jax.experimental.pallas import tpu as pltpu


def _round_up(a, b):
    return (a + b - 1) // b * b


def _cdiv(a, b):
    return -(-a // b)


def _tpu_generation():
    try:
        kind = jax.devices()[0].device_kind.lower()
    except Exception:
        kind = ""
    if "v5 lite" in kind or "v5e" in kind or "v5lite" in kind:
        return "v5e"
    if "v6" in kind:
        return "v6e"
    if "v7" in kind:
        return "v7x"
    return "other"


def _conv_bn_relu6_kernel(band_ref, w_ref, scale_ref, bias_ref, o_ref, *,
                          kh, kw, toh, ow):
    """One (batch, row-block, oup-block) tile.

    band_ref : (1, 1, toh+kh-1, Wp, Cpad)  bf16 input band
    w_ref    : (kh*kw, Cpad, tn)           bf16 per-tap weight slabs
    scale_ref: (1, tn) f32 folded BN scale
    bias_ref : (1, tn) f32 folded BN bias
    o_ref    : (1, 1, toh*ow, tn)
    """
    m_tile = toh * ow
    acc = None
    for ki in range(kh):            # unrolled at trace time (kh*kw <= 9)
        for kj in range(kw):
            # Shifted window of the VMEM band (free view -> VMEM load).
            win = band_ref[0, 0, ki:ki + toh, kj:kj + ow, :]   # (toh, ow, C)
            lhs = win.reshape(m_tile, win.shape[-1])
            part = jnp.dot(lhs, w_ref[ki * kw + kj],
                           preferred_element_type=jnp.float32)
            acc = part if acc is None else acc + part
    # f32 epilogue (v5e-safe VPU): BN affine + ReLU6 clamp.
    y = acc * scale_ref[...] + bias_ref[...]
    o_ref[0, 0] = jnp.minimum(jnp.maximum(y, 0.0), 6.0).astype(o_ref.dtype)


def conv_bn_relu6(x, weight, gamma, beta, running_mean, running_var,
                  stride, padding, eps=1e-5, compute_dtype=jnp.bfloat16,
                  out_dtype=None):
    """x: (N, C, H, W) f32; weight: (OUP, INP, KH, KW) f32. Returns NCHW."""
    n, c, h, w = x.shape
    oup, inp, kh, kw = weight.shape
    assert c == inp
    if out_dtype is None:
        out_dtype = x.dtype
    oh = (h + 2 * padding - kh) // stride + 1
    ow = (w + 2 * padding - kw) // stride + 1

    gen = _tpu_generation()
    pref_tn = 128 if gen in ("v5e", "other") else 256
    target_m = 512 if gen in ("v7x", "other") else 1024
    vmem_cap = (48 << 20) if gen == "v7x" else (96 << 20)

    cd_isz = jnp.dtype(compute_dtype).itemsize
    out_isz = jnp.dtype(out_dtype).itemsize

    # --- eval-mode BN as per-channel scale/bias, applied in f32 in-kernel ---
    scale = (gamma * jax.lax.rsqrt(running_var + eps)).astype(jnp.float32)
    bias = (beta - running_mean * scale).astype(jnp.float32)

    x_nhwc = jnp.transpose(x, (0, 2, 3, 1))

    # --- per-path geometry: band (implicit GEMM) for stride 1, im2col fallback
    #     for stride > 1 presented in the same band format (kh_k = kw_k = 1) ---
    if stride == 1:
        kh_k, kw_k = kh, kw
        cpad = _round_up(inp, 16)                      # aligned tap slabs
        wp_k = w + 2 * padding
        ow_k = ow
    else:
        kh_k, kw_k = 1, 1
        cpad = _round_up(kh * kw * inp, 16)
        wp_k = ow
        ow_k = ow
    ktaps = kh_k * kw_k
    oup_pad = _round_up(oup, 128)

    # --- tile selection -----------------------------------------------------
    toh = max(1, min(oh, _cdiv(target_m, ow_k)))
    weight_total_bytes = ktaps * cpad * oup_pad * cd_isz
    if (weight_total_bytes <= (8 << 20)
            and toh * ow_k * oup_pad * 4 <= (6 << 20)):
        tn = oup_pad                       # whole folded weight VMEM-resident
    elif oup_pad % pref_tn == 0:
        tn = pref_tn
    else:
        tn = 128

    def _vmem_need(t):
        bh = t + (kh_k - 1)
        band_b = bh * wp_k * cpad * cd_isz
        w_b = ktaps * cpad * tn * cd_isz
        out_b = t * ow_k * tn * out_isz
        acc_b = t * ow_k * tn * 4
        return 2 * band_b + 2 * w_b + 2 * out_b + acc_b + 8 * tn * 4

    while toh > 1 and _vmem_need(toh) > int(vmem_cap * 0.6):
        toh = max(1, toh // 2)
    n_r = _cdiv(oh, toh)
    toh = _cdiv(oh, n_r)                    # rebalance -> minimal M padding
    oh_pad = n_r * toh
    m_tile = toh * ow_k
    band_h = toh + kh_k - 1
    n_j = oup_pad // tn

    # --- build the band-formatted input and per-tap weight slabs -------------
    if stride == 1:
        hp_needed = oh_pad + kh - 1
        xp = jnp.pad(
            x_nhwc,
            ((0, 0),
             (padding, padding + (hp_needed - (h + 2 * padding))),
             (padding, padding),
             (0, cpad - inp)))                         # (N, hp_needed, Wp, Cp)
        if n_r == 1:
            bands = xp[:, None]                        # (N, 1, band_h, Wp, Cp)
        else:
            bands = jnp.stack(
                [xp[:, r * toh: r * toh + band_h] for r in range(n_r)], axis=1)
        bands = bands.astype(compute_dtype)
        w3 = jnp.transpose(weight, (2, 3, 1, 0)).reshape(kh * kw, inp, oup)
        w3 = jnp.pad(w3, ((0, 0), (0, cpad - inp), (0, oup_pad - oup)))
        w3 = w3.astype(compute_dtype)                  # (ktaps, Cp, OUPp)
    else:
        xp = jnp.pad(x_nhwc, ((0, 0), (padding, padding),
                              (padding, padding), (0, 0)))
        wins = []
        for i in range(kh):
            for j in range(kw):
                wins.append(
                    xp[:, i:i + stride * oh:stride, j:j + stride * ow:stride, :])
        patches = jnp.concatenate(wins, axis=-1)       # (N, OH, OW, kh*kw*C)
        patches = jnp.pad(patches, ((0, 0), (0, oh_pad - oh), (0, 0),
                                    (0, cpad - kh * kw * inp)))
        bands = patches.reshape(n, n_r, toh, ow_k, cpad).astype(compute_dtype)
        w2 = jnp.transpose(weight, (2, 3, 1, 0)).reshape(kh * kw * inp, oup)
        w2 = jnp.pad(w2, ((0, cpad - kh * kw * inp), (0, oup_pad - oup)))
        w3 = w2.reshape(1, cpad, oup_pad).astype(compute_dtype)

    scale2d = jnp.pad(scale, (0, oup_pad - oup)).reshape(1, oup_pad)
    scale2d = scale2d.astype(jnp.float32)
    bias2d = jnp.pad(bias, (0, oup_pad - oup)).reshape(1, oup_pad)
    bias2d = bias2d.astype(jnp.float32)

    grid = (n, n_r, n_j)
    w_streams = 1 if n_j == 1 else n * n_r
    cost = pl.CostEstimate(
        flops=2 * n * n_r * m_tile * (ktaps * cpad) * oup_pad,
        transcendentals=0,
        bytes_accessed=(bands.size * cd_isz
                        + ktaps * cpad * oup_pad * cd_isz * w_streams
                        + 2 * oup_pad * 4
                        + n * n_r * m_tile * oup_pad * out_isz),
    )
    vmem_limit = int(min(vmem_cap, max(32 << 20, 2 * _vmem_need(toh))))

    kernel = functools.partial(_conv_bn_relu6_kernel,
                               kh=kh_k, kw=kw_k, toh=toh, ow=ow_k)

    out5 = pl.pallas_call(
        kernel,
        out_shape=jax.ShapeDtypeStruct((n, n_r, m_tile, oup_pad), out_dtype),
        grid=grid,
        in_specs=[
            # input band: constant across the inner OUP axis -> DMA'd once
            pl.BlockSpec((1, 1, band_h, wp_k, cpad),
                         lambda nb, r, j: (nb, r, 0, 0, 0)),
            pl.BlockSpec((ktaps, cpad, tn), lambda nb, r, j: (0, 0, j)),
            pl.BlockSpec((1, tn), lambda nb, r, j: (0, j)),
            pl.BlockSpec((1, tn), lambda nb, r, j: (0, j)),
        ],
        out_specs=pl.BlockSpec((1, 1, m_tile, tn),
                               lambda nb, r, j: (nb, r, 0, j)),
        compiler_params=pltpu.CompilerParams(
            dimension_semantics=("parallel", "parallel", "parallel"),
            vmem_limit_bytes=vmem_limit,
        ),
        cost_estimate=cost,
    )(bands, w3, scale2d, bias2d)

    out = out5.reshape(n, oh_pad, ow_k, oup_pad)[:, :oh, :, :oup]
    # Back to NCHW only to match the PyTorch module's interface.
    return jnp.transpose(out, (0, 3, 1, 2))


def _reference(x, weight, gamma, beta, running_mean, running_var,
               stride, padding, eps=1e-5):
    y = jax.lax.conv_general_dilated(
        x, weight, window_strides=(stride, stride),
        padding=[(padding, padding), (padding, padding)],
        dimension_numbers=("NCHW", "OIHW", "NCHW"))
    scale = (gamma / jnp.sqrt(running_var + eps)).reshape(1, -1, 1, 1)
    bias = (beta - running_mean * gamma / jnp.sqrt(running_var + eps)
            ).reshape(1, -1, 1, 1)
    return jnp.clip(y * scale + bias, 0.0, 6.0)


if __name__ == "__main__":
    # ConvBNRelu(inp=4, oup=8, kernel=3, stride=1, padding=1)
    INP, OUP, KERNEL, STRIDE, PADDING = 4, 8, 3, 1, 1
    N, H, W = 2, 16, 16

    key = jax.random.PRNGKey(0)
    kx, kw_, kg, kb, km, kv = jax.random.split(key, 6)
    x = jax.random.normal(kx, (N, INP, H, W), dtype=jnp.float32)
    weight = jax.random.normal(kw_, (OUP, INP, KERNEL, KERNEL),
                               dtype=jnp.float32) * 0.1
    gamma = 1.0 + 0.1 * jax.random.normal(kg, (OUP,), dtype=jnp.float32)
    beta = 0.1 * jax.random.normal(kb, (OUP,), dtype=jnp.float32)
    running_mean = 0.1 * jax.random.normal(km, (OUP,), dtype=jnp.float32)
    running_var = jnp.abs(jax.random.normal(kv, (OUP,), dtype=jnp.float32)) + 0.5

    out = conv_bn_relu6(x, weight, gamma, beta, running_mean, running_var,
                        STRIDE, PADDING)
    out = jax.block_until_ready(out)

    ref = _reference(x, weight, gamma, beta, running_mean, running_var,
                     STRIDE, PADDING)
    assert out.shape == (N, OUP, H, W)
    # bf16 MXU operands with f32 accumulation -> loosened tolerance vs f32 ref.
    assert jnp.allclose(out, ref, atol=5e-2, rtol=5e-2), (
        float(jnp.max(jnp.abs(out - ref))))
    print("KERNEL_OK")
</pallas_src>

<mosaic_0001>
module attributes {stable_mosaic.version = 11 : i64} {
  func.func @_conv_bn_relu6_kernel(%arg0: i32, %arg1: i32, %arg2: i32, %arg3: memref<1x1x18x18x16xbf16, #tpu.memory_space<vmem>>, %arg4: memref<9x16x128xbf16, #tpu.memory_space<vmem>>, %arg5: memref<1x128xf32, #tpu.memory_space<vmem>>, %arg6: memref<1x128xf32, #tpu.memory_space<vmem>>, %arg7: memref<1x1x256x128xf32, #tpu.memory_space<vmem>>) attributes {dimension_semantics = [#tpu.dimension_semantics<parallel>, #tpu.dimension_semantics<parallel>, #tpu.dimension_semantics<parallel>], iteration_bounds = array<i64: 2, 1, 1>, scalar_prefetch = 0 : i64, scratch_operands = 0 : i64, tpu.core_type = #tpu.core_type<tc>, window_params = [{transform_indices = @transform_0, window_bounds = array<i64: 1, 1, 18, 18, 16>}, {transform_indices = @transform_1, window_bounds = array<i64: 9, 16, 128>}, {transform_indices = @transform_2, window_bounds = array<i64: 1, 128>}, {transform_indices = @transform_3, window_bounds = array<i64: 1, 128>}, {transform_indices = @transform_4, window_bounds = array<i64: 1, 1, 256, 128>}]} {
    %c0 = arith.constant 0 : index
    %c0_0 = arith.constant 0 : index
    %c0_1 = arith.constant 0 : index
    %c0_2 = arith.constant 0 : index
    %c0_3 = arith.constant 0 : index
    %0 = vector.load %arg3[%c0, %c0_0, %c0_1, %c0_2, %c0_3] : memref<1x1x18x18x16xbf16, #tpu.memory_space<vmem>>, vector<1x1x16x16x16xbf16>
    %1 = vector.shape_cast %0 : vector<1x1x16x16x16xbf16> to vector<16x16x16xbf16>
    %2 = vector.shape_cast %1 : vector<16x16x16xbf16> to vector<256x16xbf16>
    %c0_4 = arith.constant 0 : index
    %c0_5 = arith.constant 0 : index
    %c0_6 = arith.constant 0 : index
    %3 = vector.load %arg4[%c0_4, %c0_5, %c0_6] : memref<9x16x128xbf16, #tpu.memory_space<vmem>>, vector<1x16x128xbf16>
    %4 = vector.shape_cast %3 : vector<1x16x128xbf16> to vector<16x128xbf16>
    %cst = arith.constant dense<0.000000e+00> : vector<256x128xf32>
    %5 = tpu.matmul %2, %4, %cst {dimension_numbers = #tpu.dot_dimension_numbers<[1], [0], [0], [1], [0, 0, 1, 1], [], []>} : vector<256x16xbf16>, vector<16x128xbf16>, vector<256x128xf32> -> vector<256x128xf32>
    %c0_7 = arith.constant 0 : index
    %c0_8 = arith.constant 0 : index
    %c0_9 = arith.constant 0 : index
    %c1 = arith.constant 1 : index
    %c0_10 = arith.constant 0 : index
    %6 = vector.load %arg3[%c0_7, %c0_8, %c0_9, %c1, %c0_10] : memref<1x1x18x18x16xbf16, #tpu.memory_space<vmem>>, vector<1x1x16x16x16xbf16>
    %7 = vector.shape_cast %6 : vector<1x1x16x16x16xbf16> to vector<16x16x16xbf16>
    %8 = vector.shape_cast %7 : vector<16x16x16xbf16> to vector<256x16xbf16>
    %c1_11 = arith.constant 1 : index
    %c0_12 = arith.constant 0 : index
    %c0_13 = arith.constant 0 : index
    %9 = vector.load %arg4[%c1_11, %c0_12, %c0_13] : memref<9x16x128xbf16, #tpu.memory_space<vmem>>, vector<1x16x128xbf16>
    %10 = vector.shape_cast %9 : vector<1x16x128xbf16> to vector<16x128xbf16>
    %cst_14 = arith.constant dense<0.000000e+00> : vector<256x128xf32>
    %11 = tpu.matmul %8, %10, %cst_14 {dimension_numbers = #tpu.dot_dimension_numbers<[1], [0], [0], [1], [0, 0, 1, 1], [], []>} : vector<256x16xbf16>, vector<16x128xbf16>, vector<256x128xf32> -> vector<256x128xf32>
    %12 = arith.addf %5, %11 : vector<256x128xf32>
    %c0_15 = arith.constant 0 : index
    %c0_16 = arith.constant 0 : index
    %c0_17 = arith.constant 0 : index
    %c2 = arith.constant 2 : index
    %c0_18 = arith.constant 0 : index
    %13 = vector.load %arg3[%c0_15, %c0_16, %c0_17, %c2, %c0_18] : memref<1x1x18x18x16xbf16, #tpu.memory_space<vmem>>, vector<1x1x16x16x16xbf16>
    %14 = vector.shape_cast %13 : vector<1x1x16x16x16xbf16> to vector<16x16x16xbf16>
    %15 = vector.shape_cast %14 : vector<16x16x16xbf16> to vector<256x16xbf16>
    %c2_19 = arith.constant 2 : index
    %c0_20 = arith.constant 0 : index
    %c0_21 = arith.constant 0 : index
    %16 = vector.load %arg4[%c2_19, %c0_20, %c0_21] : memref<9x16x128xbf16, #tpu.memory_space<vmem>>, vector<1x16x128xbf16>
    %17 = vector.shape_cast %16 : vector<1x16x128xbf16> to vector<16x128xbf16>
    %cst_22 = arith.constant dense<0.000000e+00> : vector<256x128xf32>
    %18 = tpu.matmul %15, %17, %cst_22 {dimension_numbers = #tpu.dot_dimension_numbers<[1], [0], [0], [1], [0, 0, 1, 1], [], []>} : vector<256x16xbf16>, vector<16x128xbf16>, vector<256x128xf32> -> vector<256x128xf32>
    %19 = arith.addf %12, %18 : vector<256x128xf32>
    %c0_23 = arith.constant 0 : index
    %c0_24 = arith.constant 0 : index
    %c1_25 = arith.constant 1 : index
    %c0_26 = arith.constant 0 : index
    %c0_27 = arith.constant 0 : index
    %20 = vector.load %arg3[%c0_23, %c0_24, %c1_25, %c0_26, %c0_27] : memref<1x1x18x18x16xbf16, #tpu.memory_space<vmem>>, vector<1x1x16x16x16xbf16>
    %21 = vector.shape_cast %20 : vector<1x1x16x16x16xbf16> to vector<16x16x16xbf16>
    %22 = vector.shape_cast %21 : vector<16x16x16xbf16> to vector<256x16xbf16>
    %c3 = arith.constant 3 : index
    %c0_28 = arith.constant 0 : index
    %c0_29 = arith.constant 0 : index
    %23 = vector.load %arg4[%c3, %c0_28, %c0_29] : memref<9x16x128xbf16, #tpu.memory_space<vmem>>, vector<1x16x128xbf16>
    %24 = vector.shape_cast %23 : vector<1x16x128xbf16> to vector<16x128xbf16>
    %cst_30 = arith.constant dense<0.000000e+00> : vector<256x128xf32>
    %25 = tpu.matmul %22, %24, %cst_30 {dimension_numbers = #tpu.dot_dimension_numbers<[1], [0], [0], [1], [0, 0, 1, 1], [], []>} : vector<256x16xbf16>, vector<16x128xbf16>, vector<256x128xf32> -> vector<256x128xf32>
    %26 = arith.addf %19, %25 : vector<256x128xf32>
    %c0_31 = arith.constant 0 : index
    %c0_32 = arith.constant 0 : index
    %c1_33 = arith.constant 1 : index
    %c1_34 = arith.constant 1 : index
    %c0_35 = arith.constant 0 : index
    %27 = vector.load %arg3[%c0_31, %c0_32, %c1_33, %c1_34, %c0_35] : memref<1x1x18x18x16xbf16, #tpu.memory_space<vmem>>, vector<1x1x16x16x16xbf16>
    %28 = vector.shape_cast %27 : vector<1x1x16x16x16xbf16> to vector<16x16x16xbf16>
    %29 = vector.shape_cast %28 : vector<16x16x16xbf16> to vector<256x16xbf16>
    %c4 = arith.constant 4 : index
    %c0_36 = arith.constant 0 : index
    %c0_37 = arith.constant 0 : index
    %30 = vector.load %arg4[%c4, %c0_36, %c0_37] : memref<9x16x128xbf16, #tpu.memory_space<vmem>>, vector<1x16x128xbf16>
    %31 = vector.shape_cast %30 : vector<1x16x128xbf16> to vector<16x128xbf16>
    %cst_38 = arith.constant dense<0.000000e+00> : vector<256x128xf32>
    %32 = tpu.matmul %29, %31, %cst_38 {dimension_numbers = #tpu.dot_dimension_numbers<[1], [0], [0], [1], [0, 0, 1, 1], [], []>} : vector<256x16xbf16>, vector<16x128xbf16>, vector<256x128xf32> -> vector<256x128xf32>
    %33 = arith.addf %26, %32 : vector<256x128xf32>
    %c0_39 = arith.constant 0 : index
    %c0_40 = arith.constant 0 : index
    %c1_41 = arith.constant 1 : index
    %c2_42 = arith.constant 2 : index
    %c0_43 = arith.constant 0 : index
    %34 = vector.load %arg3[%c0_39, %c0_40, %c1_41, %c2_42, %c0_43] : memref<1x1x18x18x16xbf16, #tpu.memory_space<vmem>>, vector<1x1x16x16x16xbf16>
    %35 = vector.shape_cast %34 : vector<1x1x16x16x16xbf16> to vector<16x16x16xbf16>
    %36 = vector.shape_cast %35 : vector<16x16x16xbf16> to vector<256x16xbf16>
    %c5 = arith.constant 5 : index
    %c0_44 = arith.constant 0 : index
    %c0_45 = arith.constant 0 : index
    %37 = vector.load %arg4[%c5, %c0_44, %c0_45] : memref<9x16x128xbf16, #tpu.memory_space<vmem>>, vector<1x16x128xbf16>
    %38 = vector.shape_cast %37 : vector<1x16x128xbf16> to vector<16x128xbf16>
    %cst_46 = arith.constant dense<0.000000e+00> : vector<256x128xf32>
    %39 = tpu.matmul %36, %38, %cst_46 {dimension_numbers = #tpu.dot_dimension_numbers<[1], [0], [0], [1], [0, 0, 1, 1], [], []>} : vector<256x16xbf16>, vector<16x128xbf16>, vector<256x128xf32> -> vector<256x128xf32>
    %40 = arith.addf %33, %39 : vector<256x128xf32>
    %c0_47 = arith.constant 0 : index
    %c0_48 = arith.constant 0 : index
    %c2_49 = arith.constant 2 : index
    %c0_50 = arith.constant 0 : index
    %c0_51 = arith.constant 0 : index
    %41 = vector.load %arg3[%c0_47, %c0_48, %c2_49, %c0_50, %c0_51] : memref<1x1x18x18x16xbf16, #tpu.memory_space<vmem>>, vector<1x1x16x16x16xbf16>
    %42 = vector.shape_cast %41 : vector<1x1x16x16x16xbf16> to vector<16x16x16xbf16>
    %43 = vector.shape_cast %42 : vector<16x16x16xbf16> to vector<256x16xbf16>
    %c6 = arith.constant 6 : index
    %c0_52 = arith.constant 0 : index
    %c0_53 = arith.constant 0 : index
    %44 = vector.load %arg4[%c6, %c0_52, %c0_53] : memref<9x16x128xbf16, #tpu.memory_space<vmem>>, vector<1x16x128xbf16>
    %45 = vector.shape_cast %44 : vector<1x16x128xbf16> to vector<16x128xbf16>
    %cst_54 = arith.constant dense<0.000000e+00> : vector<256x128xf32>
    %46 = tpu.matmul %43, %45, %cst_54 {dimension_numbers = #tpu.dot_dimension_numbers<[1], [0], [0], [1], [0, 0, 1, 1], [], []>} : vector<256x16xbf16>, vector<16x128xbf16>, vector<256x128xf32> -> vector<256x128xf32>
    %47 = arith.addf %40, %46 : vector<256x128xf32>
    %c0_55 = arith.constant 0 : index
    %c0_56 = arith.constant 0 : index
    %c2_57 = arith.constant 2 : index
    %c1_58 = arith.constant 1 : index
    %c0_59 = arith.constant 0 : index
    %48 = vector.load %arg3[%c0_55, %c0_56, %c2_57, %c1_58, %c0_59] : memref<1x1x18x18x16xbf16, #tpu.memory_space<vmem>>, vector<1x1x16x16x16xbf16>
    %49 = vector.shape_cast %48 : vector<1x1x16x16x16xbf16> to vector<16x16x16xbf16>
    %50 = vector.shape_cast %49 : vector<16x16x16xbf16> to vector<256x16xbf16>
    %c7 = arith.constant 7 : index
    %c0_60 = arith.constant 0 : index
    %c0_61 = arith.constant 0 : index
    %51 = vector.load %arg4[%c7, %c0_60, %c0_61] : memref<9x16x128xbf16, #tpu.memory_space<vmem>>, vector<1x16x128xbf16>
    %52 = vector.shape_cast %51 : vector<1x16x128xbf16> to vector<16x128xbf16>
    %cst_62 = arith.constant dense<0.000000e+00> : vector<256x128xf32>
    %53 = tpu.matmul %50, %52, %cst_62 {dimension_numbers = #tpu.dot_dimension_numbers<[1], [0], [0], [1], [0, 0, 1, 1], [], []>} : vector<256x16xbf16>, vector<16x128xbf16>, vector<256x128xf32> -> vector<256x128xf32>
    %54 = arith.addf %47, %53 : vector<256x128xf32>
    %c0_63 = arith.constant 0 : index
    %c0_64 = arith.constant 0 : index
    %c2_65 = arith.constant 2 : index
    %c2_66 = arith.constant 2 : index
    %c0_67 = arith.constant 0 : index
    %55 = vector.load %arg3[%c0_63, %c0_64, %c2_65, %c2_66, %c0_67] : memref<1x1x18x18x16xbf16, #tpu.memory_space<vmem>>, vector<1x1x16x16x16xbf16>
    %56 = vector.shape_cast %55 : vector<1x1x16x16x16xbf16> to vector<16x16x16xbf16>
    %57 = vector.shape_cast %56 : vector<16x16x16xbf16> to vector<256x16xbf16>
    %c8 = arith.constant 8 : index
    %c0_68 = arith.constant 0 : index
    %c0_69 = arith.constant 0 : index
    %58 = vector.load %arg4[%c8, %c0_68, %c0_69] : memref<9x16x128xbf16, #tpu.memory_space<vmem>>, vector<1x16x128xbf16>
    %59 = vector.shape_cast %58 : vector<1x16x128xbf16> to vector<16x128xbf16>
    %cst_70 = arith.constant dense<0.000000e+00> : vector<256x128xf32>
    %60 = tpu.matmul %57, %59, %cst_70 {dimension_numbers = #tpu.dot_dimension_numbers<[1], [0], [0], [1], [0, 0, 1, 1], [], []>} : vector<256x16xbf16>, vector<16x128xbf16>, vector<256x128xf32> -> vector<256x128xf32>
    %61 = arith.addf %54, %60 : vector<256x128xf32>
    %c0_71 = arith.constant 0 : index
    %c0_72 = arith.constant 0 : index
    %62 = vector.load %arg5[%c0_71, %c0_72] : memref<1x128xf32, #tpu.memory_space<vmem>>, vector<1x128xf32>
    %63 = vector.broadcast %62 : vector<1x128xf32> to vector<256x128xf32>
    %64 = arith.mulf %61, %63 : vector<256x128xf32>
    %c0_73 = arith.constant 0 : index
    %c0_74 = arith.constant 0 : index
    %65 = vector.load %arg6[%c0_73, %c0_74] : memref<1x128xf32, #tpu.memory_space<vmem>>, vector<1x128xf32>
    %66 = vector.broadcast %65 : vector<1x128xf32> to vector<256x128xf32>
    %67 = arith.addf %64, %66 : vector<256x128xf32>
    %cst_75 = arith.constant 0.000000e+00 : f32
    %68 = vector.broadcast %cst_75 : f32 to vector<256x128xf32>
    %69 = arith.maximumf %67, %68 : vector<256x128xf32>
    %cst_76 = arith.constant 6.000000e+00 : f32
    %70 = vector.broadcast %cst_76 : f32 to vector<256x128xf32>
    %71 = arith.minimumf %69, %70 : vector<256x128xf32>
    %c0_77 = arith.constant 0 : index
    %c0_78 = arith.constant 0 : index
    %c0_79 = arith.constant 0 : index
    %c0_80 = arith.constant 0 : index
    %72 = vector.load %arg7[%c0_77, %c0_78, %c0_79, %c0_80] : memref<1x1x256x128xf32, #tpu.memory_space<vmem>>, vector<1x1x256x128xf32>
    %73 = vector.shape_cast %72 : vector<1x1x256x128xf32> to vector<256x128xf32>
    %74 = vector.shape_cast %71 : vector<256x128xf32> to vector<1x1x256x128xf32>
    tpu.vector_store %arg7[%c0_77, %c0_78, %c0_79, %c0_80], %74 {strides = array<i32>} : memref<1x1x256x128xf32, #tpu.memory_space<vmem>>, vector<1x1x256x128xf32>,
    return
  }
  func.func @transform_0(%arg0: i32, %arg1: i32, %arg2: i32) -> (i32, i32, i32, i32, i32) {
    %c0_i32 = arith.constant 0 : i32
    %c0_i32_0 = arith.constant 0 : i32
    %c0_i32_1 = arith.constant 0 : i32
    %c0_i32_2 = arith.constant 0 : i32
    return %arg0, %arg1, %c0_i32, %c0_i32_0, %c0_i32_1 : i32, i32, i32, i32, i32
  }
  func.func @transform_1(%arg0: i32, %arg1: i32, %arg2: i32) -> (i32, i32, i32) {
    %c0_i32 = arith.constant 0 : i32
    %c0_i32_0 = arith.constant 0 : i32
    %c0_i32_1 = arith.constant 0 : i32
    return %c0_i32, %c0_i32_0, %arg2 : i32, i32, i32
  }
  func.func @transform_2(%arg0: i32, %arg1: i32, %arg2: i32) -> (i32, i32) {
    %c0_i32 = arith.constant 0 : i32
    %c0_i32_0 = arith.constant 0 : i32
    return %c0_i32, %arg2 : i32, i32
  }
  func.func @transform_3(%arg0: i32, %arg1: i32, %arg2: i32) -> (i32, i32) {
    %c0_i32 = arith.constant 0 : i32
    %c0_i32_0 = arith.constant 0 : i32
    return %c0_i32, %arg2 : i32, i32
  }
  func.func @transform_4(%arg0: i32, %arg1: i32, %arg2: i32) -> (i32, i32, i32, i32) {
    %c0_i32 = arith.constant 0 : i32
    %c0_i32_0 = arith.constant 0 : i32
    return %arg0, %arg1, %c0_i32, %arg2 : i32, i32, i32, i32
  }
}

</mosaic_0001>

<bundles_post_ra>
// kernel: tpu_custom_call.1
= control target key start
LH: loop header
LB: loop body
LE: loop exit
PB: predicated region body
PF: predicated region fallthrough
CT: control target
= control target key end

     0   :  { %9 = vsyncpa [#allocation3], 0  ;;  %s8684_s0 = inlined_call_operand.vmem [shape: bf16[2,1,18,18,16], index: 0, kind: input, shape index: {}]   ;;  %s8685_s1 = inlined_call_operand.vmem [shape: bf16[9,16,128], index: 1, kind: input, shape index: {}]   ;;  %s8686_s2 = inlined_call_operand.vmem [shape: f32[1,128], index: 2, kind: input, shape index: {}]   ;;  %s8687_s3 = inlined_call_operand.vmem [shape: f32[1,128], index: 3, kind: input, shape index: {}]   ;;  %s8688_s4 = inlined_call_operand.hbm [shape: f32[2,1,256,128], index: 4, kind: output, shape index: {}]  }
   0x1   :  { %11 = vsyncpa [#allocation3 + $0x1], 0  ;;  %s6759_s15 = smov 0   ;;  %s6761_s16 = smov 0  }
   0x2   :  { %s6763_s17 = smov 0   ;;  %s6765_s18 = smov 0  }
   0x3   :  { %s6767_s19 = smov 0   ;;  %s6769_s20 = smov 0  }
   0x4 LB: > { %s5189_s21 = sadd.s32 4294967295, %s6729_s20   ;;  %s5190_s22 = sadd.s32 4294967294, %s6729_s20   ;;  %s6729_s20 = sphi %s6769_s20, %s17_s20   ;;  %s6725_s19 = sphi %s6767_s19, %s8759_s19   ;;  %s6721_s18 = sphi %s6765_s18, %s8758_s18   ;;  %s6717_s17 = sphi %s6763_s17, %s8757_s17   ;;  %s6713_s16 = sphi %s6761_s16, %s8756_s16   ;;  %s6709_s15 = sphi %s6759_s15, %s8755_s15  }
   0x5   : > { %s36_s23 = sadd.s32 1, %s6725_s19  ;;  %s153_s24 = sadd.s32 1, %s6717_s17 }
   0x6   : > { %p38_p0 = scmp.ge.s32.totalorder %s36_s23, 2  ;;  %p163_p1 = scmp.ne.s32.totalorder %s6717_s17, %s6713_s16 }
   0x7   : > { %p164_p2 = scmp.eq.s32.totalorder %s5189_s21, 1  ;;  %p169_p3 = scmp.ne.s32.totalorder %s6713_s16, %s6709_s15 }
   0x8   : > { %s8761_s23 = smov (%p38_p0, %s36_s23), 0  ;;  %p170_p5 = scmp.eq.s32.totalorder %s5190_s22, 1 }
   0x9   : > { %p6799_p4 = por %p164_p2, %p163_p1  ;;  %s146_s26 = ssub.s32 %s6725_s19, %s8761_s23 }
   0xa   : > { %p5196_p6 = scmp.ge.s32.totalorder %s6729_s20, 1  ;;  %p151_p7 = scmp.eq.s32.totalorder %s146_s26, 0 }
   0xb   : > { %p6806_p8 = por %p170_p5, %p169_p3  ;;  %p219_p9 = scmp.lt.s32.totalorder %s6729_s20, 3 }
   0xc   : > { %s6812_s28 = scalar_select %p151_p7, %s6717_s17, %s153_s24  }
   0xd   : > { %p220_p10 = pnand %p5196_p6, %p219_p9 }
   0xf   : > { %223 = sbr.rel (%p220_p10) target bundleno = 615 (0x267), region = 36 }
  0x16   : > { %v6535_v0 = vld [vmem:[%s8685_s1 + $0x8] sm:$0xff]   ;;  %p259_p11 = scmp.lt.s32.totalorder %s6721_s18, 1  ;;  %v6536_v1 = vld [vmem:[%s8685_s1 + $0x20] sm:$0xff]   ;;  %vm329_vm0 = vsmask.f32 3328  ;;  %vm773_vm3 = vcmask 130048  }
  0x17   : > { %5913 = vmatprep.subr.bf16.mxu1 %v6535_v0  ;;  %v6825_v2 = vld [vmem:[%s8685_s1] sm:$0xff]   ;;  %6049 = vmatprep.subr.bf16.mxu0 %v6536_v1  ;;  %v6831_v3 = vld [vmem:[%s8685_s1 + $0x28] sm:$0xff]   ;;  %vm330_vm1 = vsmask.f32 7440  ;;  %vm1326_vm4 = vcmask 1042432   ;;  %vm1327_vm5 = vcmask 1046532  }
  0x18   : > { %s260_s7 = scalar_select %p259_p11, %s6721_s18, 1  ;;  %5914 = vmatpush3.bf16.msra.mxu1 %v6535_v0  ;;  %6050 = vmatpush3.bf16.msra.mxu0 %v6536_v1  ;;  %vm6855_vm2 = vmor %vm329_vm0, %vm330_vm1 }
  0x19   : > { %5947 = vmatprep.subr.bf16.mxu1 %v6825_v2  ;;  %6083 = vmatprep.subr.bf16.mxu0 %v6831_v3  ;;  %vm7077_vm6 = vmor %vm1326_vm4, %vm1327_vm5  ;;  %s256_s22 = sand.u32 1, %s6713_s16   ;;  %s5759_s5 = sshll.u32 %s6721_s18, 12 }
  0x1a   : > { %s6477_s10 = smul.u32 216, %s260_s7  ;;  %s5197_s29 = sshll.u32 %s256_s22, 8 }
  0x1b   : > { %s8530_s30 = scalar_lea.vmem [#allocation2], %s5197_s29  ;;  %s8629_s9 = scalar_lea.hbm %s8688_s4, %s5759_s5 }
  0x1c   : > { %s6836_s21 = scalar_lea.vmem %s8684_s0, %s6477_s10  ;;  %s5064_s6 = sshll.u32 %s8530_s30, 4  ;;  %s8631_s6 = int_to_ptr.vmem [resolvable:$true] %s5064_s6 }
  0x1d   : > { %v279_v4 = vld [vmem:[%s6836_s21] sm:$0xf]  ;;  %v280_v5 = vld [vmem:[%s6836_s21 + $0x4] sm:$0xf]  ;;  %v313_v6 = vld [vmem:[%s6836_s21 + $0x8] sm:$0x1] }
  0x1e   : > { %v333_v7 = vshrl.u32 %v279_v4, 16  ;;  %v336_v8 = vshll.u32 %v279_v4, 16  ;;  %v342_v9 = vshll.u32 %v280_v5, 16  ;;  %v346_v10 = vshrl.u32 %v280_v5, 16  ;;  %v5385_v11 = vld [vmem:[%s6836_s21 + $0xc] sm:$0xf] }
  0x1f   : > { %v352_v12 = vshll.u32 %v313_v6, 16  ;;  %v6844_v13 = vld [vmem:[%s6836_s21 + $0x10] sm:$0xf]  ;;  %v6847_v14 = vld [vmem:[%s6836_s21 + $0x14] sm:$0x1]  ;;  %v2151_v20 = vshrl.u32 %v5385_v11, 16 }
  0x20   : > { %v335_v15 = vrot.slane %v333_v7, 4  ;;  %v338_v16 = vrot.slane %v336_v8, 5  ;;  %v344_v17 = vrot.slane %v342_v9, 5  ;;  %v348_v18 = vrot.slane %v346_v10, 4  ;;  %v281_v27 = vld [vmem:[%s6836_s21 + $0xc] sm:$0xf] }
  0x21   : > { %v354_v19 = vrot.slane %v352_v12, 5  ;;  %v2154_v21 = vshll.u32 %v5385_v11, 16  ;;  %v2160_v22 = vshll.u32 %v6844_v13, 16  ;;  %v2164_v25 = vshrl.u32 %v6844_v13, 16  ;;  %v282_v32 = vld [vmem:[%s6836_s21 + $0x10] sm:$0xf] }
  0x22   : > { %v339_v23 = vor.u32 %v338_v16, %v335_v15  ;;  %v349_v24 = vor.u32 %v348_v18, %v344_v17  ;;  %v2170_v26 = vshll.u32 %v6847_v14, 16  ;;  %v2153_v29 = vrot.slane %v2151_v20, 4  ;;  %v314_v38 = vld [vmem:[%s6836_s21 + $0x14] sm:$0x1]  ;;  %v5388_v49 = vld [vmem:[%s6836_s21 + $0x18] sm:$0xf] }
  0x23   : > { %v2156_v30 = vrot.slane %v2154_v21, 5  ;;  %v2162_v31 = vrot.slane %v2160_v22, 5  ;;  %v2166_v35 = vrot.slane %v2164_v25, 4  ;;  %v357_v39 = vshrl.u32 %v281_v27, 16  ;;  %v6867_v54 = vld [vmem:[%s6836_s21 + $0x1c] sm:$0xf] }
  0x24   : > { %v340_v33 = vrot.slane %v339_v23, 4  ;;  %v350_v34 = vrot.slane %v349_v24, 4  ;;  %v2172_v37 = vrot.slane %v2170_v26, 5  ;;  %v360_v40 = vshll.u32 %v281_v27, 16  ;;  %v6875_v59 = vld [vmem:[%s6836_s21 + $0x20] sm:$0x1] }
  0x25   : > { %v2157_v36 = vor.u32 %v2156_v30, %v2153_v29  ;;  %v2167_v43 = vor.u32 %v2166_v35, %v2162_v31  ;;  %v366_v44 = vshll.u32 %v282_v32, 16  ;;  %v359_v47 = vrot.slane %v357_v39, 4  ;;  %v283_v10 = vld [vmem:[%s6836_s21 + $0x18] sm:$0xf]  ;;  %v315_v24 = vld [vmem:[%s6836_s21 + $0x20] sm:$0x1] }
  0x26   : > { %v345_v41 = vsel %vm6855_vm2, %v340_v33, %v344_v17  ;;  %v355_v42 = vsel %vm6855_vm2, %v350_v34, %v354_v19  ;;  %v362_v48 = vrot.slane %v360_v40, 5  ;;  %v370_v52 = vshrl.u32 %v282_v32, 16  ;;  %v284_v17 = vld [vmem:[%s6836_s21 + $0x1c] sm:$0xf]  ;;  %v5391_v32 = vld [vmem:[%s6836_s21 + $0x24] sm:$0xf] }
  0x27   : > { %v5201_v45 = vcombine.low %v345_v41, %v355_v42  ;;  %v2158_v46 = vrot.slane %v2157_v36, 4  ;;  %v2168_v50 = vrot.slane %v2167_v43, 4  ;;  %v368_v51 = vrot.slane %v366_v44, 5  ;;  %s8638_s18 = scalar_lea.sflag [#allocation3], %s256_s22  ;;  %s6651_s10 = scalar_lea.vmem %s8631_s6, 4096 }
  0x28   : > { %v376_v53 = vshll.u32 %v314_v38, 16  ;;  %v2898_v56 = vrot.slane %v6844_v13, 5  ;;  %v2901_v57 = vrot.slane %v6847_v14, 5  ;;  %v363_v58 = vor.u32 %v362_v48, %v359_v47  ;;  %v6541_v38 = vld [vmem:[%s8685_s1 + $0x10] sm:$0xff]   ;;  %v7110_v14 = vld [vmem:[%s6836_s21 + $0x7c] sm:$0xf]  ;;  %p6652_p12 = scmp.ne.s32.totalorder %s8631_s6, %s6651_s10 }
  0x29   : > { %5915 = vmatprep.mubr.msk.bf16.mxu1 %vm773_vm3, %v5201_v45  ;;  %v2163_v55 = vsel %vm6855_vm2, %v2158_v46, %v2162_v31  ;;  %v2173_v60 = vsel %vm6855_vm2, %v2168_v50, %v2172_v37  ;;  %v372_v61 = vrot.slane %v370_v52, 4  ;;  %v2175_v63 = vshrl.u32 %v5388_v49, 16  ;;  %v6898_v37 = vld [vmem:[%s6836_s21 + $0x28] sm:$0xf]  ;;  %v6907_v45 = vld [vmem:[%s6836_s21 + $0x2c] sm:$0x1] }
  0x2a   : > { %v378_v62 = vrot.slane %v376_v53, 5  ;;  %v5435_v0 = vcombine.low %v2163_v55, %v2173_v60  ;;  %v364_v1 = vrot.slane %v363_v58, 4  ;;  %v2178_v4 = vshll.u32 %v5388_v49, 16  ;;  %v285_v52 = vld [vmem:[%s6836_s21 + $0x24] sm:$0xf]  ;;  %p6653_p13 = pnand %p6652_p12, %p6799_p4  ;;  %s6731_s11 = smov [#allocation2]  }
  0x2b   : > { %v2184_v5 = vshll.u32 %v6867_v54, 16  ;;  %v373_v6 = vor.u32 %v372_v61, %v368_v51  ;;  %v2177_v7 = vrot.slane %v2175_v63, 4  ;;  %v2188_v8 = vshrl.u32 %v6867_v54, 16  ;;  %v286_v61 = vld [vmem:[%s6836_s21 + $0x28] sm:$0xf]  ;;  %s6655_s12 = sshll.u32 %s6731_s11, 4  ;;  %s6656_s12 = int_to_ptr.vmem [resolvable:$false] %s6655_s12 }
  0x2c   : > { %v2194_v9 = vshll.u32 %v6875_v59, 16  ;;  %6051 = vmatprep.mubr.msk.bf16.mxu0 %vm773_vm3, %v5435_v0  ;;  %v369_v11 = vsel %vm6855_vm2, %v364_v1, %v368_v51  ;;  %v2180_v12 = vrot.slane %v2178_v4, 5  ;;  %v2905_v16 = vrot.slane %v6867_v54, 5  ;;  %p6654_p0 = pneg %p6653_p13  ;;  %s6657_s13 = scalar_lea.vmem %s6656_s12, 8192 }
  0x2d   : > { %v2186_v15 = vrot.slane %v2184_v5, 5  ;;  %v374_v18 = vrot.slane %v373_v6, 4  ;;  %v2190_v19 = vrot.slane %v2188_v8, 4  ;;  %v2908_v21 = vrot.slane %v6875_v59, 5  ;;  %v316_v6 = vld [vmem:[%s6836_s21 + $0x2c] sm:$0x1]  ;;  %p6658_p1 = scmp.lt.s32.totalorder %s8631_s6, %s6656_s12  ;;  %p6659_p2 = scmp.lt.s32.totalorder %s6657_s13, %s6651_s10 }
  0x2e   : > { %v2196_v20 = vrot.slane %v2194_v9, 5  ;;  %v2181_v22 = vor.u32 %v2180_v12, %v2177_v7  ;;  %v6891_v23 = vrot.slane %v2905_v16, 4  ;;  %v381_v25 = vshrl.u32 %v283_v10, 16 }
  0x2f   : > { %v384_v26 = vshll.u32 %v283_v10, 16  ;;  %v379_v27 = vsel %vm6855_vm2, %v374_v18, %v378_v62  ;;  %v2191_v29 = vor.u32 %v2190_v19, %v2186_v15  ;;  %v390_v30 = vshll.u32 %v284_v17, 16  ;;  %v6918_v62 = vld [vmem:[%s8685_s1 + $0x30] sm:$0xff]   ;;  %p6660_p3 = por %p6659_p2, %p6658_p1 }
  0x30   : > { %v394_v31 = vshrl.u32 %v284_v17, 16  ;;  %v5202_v33 = vcombine.low %v369_v11, %v379_v27  ;;  %v2182_v34 = vrot.slane %v2181_v22, 4  ;;  %v383_v35 = vrot.slane %v381_v25, 4  ;;  %v6931_v22 = vld [vmem:[%s6836_s21 + $0x34] sm:$0xf] }
  0x31   : > { %v386_v36 = vrot.slane %v384_v26, 5  ;;  %v2192_v39 = vrot.slane %v2191_v29, 4  ;;  %v392_v40 = vrot.slane %v390_v30, 5  ;;  %v400_v42 = vshll.u32 %v315_v24, 16  ;;  %v6938_v30 = vld [vmem:[%s6836_s21 + $0x38] sm:$0x1]  ;;  %p6661_p5 = pnand %p6660_p3, %p6654_p0 }
  0x32   : > { %v396_v41 = vrot.slane %v394_v31, 4  ;;  %5916 = vmatmul.mubr.msk.bf16.vlgmr.msra.gmra.mrb[0].mxu1 %vm773_vm3, %v5202_v33  ;;  %v2187_v43 = vsel %vm6855_vm2, %v2182_v34, %v2186_v15  ;;  %v2199_v46 = vshrl.u32 %v5391_v32, 16  ;;  %v2202_v47 = vshll.u32 %v5391_v32, 16  ;;  %v5394_v15 = vld [vmem:[%s6836_s21 + $0x30] sm:$0xf] }
  0x33   : > { %v387_v44 = vor.u32 %v386_v36, %v383_v35  ;;  %5948 = vmatpush3.bf16.msra.mxu1 %v6825_v2  ;;  %v2197_v48 = vsel %vm6855_vm2, %v2192_v39, %v2196_v20  ;;  %v402_v50 = vrot.slane %v400_v42, 5  ;;  %v2208_v51 = vshll.u32 %v6898_v37, 16  ;;  %v287_v42 = vld [vmem:[%s6836_s21 + $0x30] sm:$0xf] }
  0x34   : > { %v397_v49 = vor.u32 %v396_v41, %v392_v40  ;;  %v5436_v53 = vcombine.low %v2187_v43, %v2197_v48  ;;  %v2201_v58 = vrot.slane %v2199_v46, 4  ;;  %v2204_v60 = vrot.slane %v2202_v47, 5  ;;  %5981 = vmatprep.subr.bf16.mxu1 %v6541_v38  ;;  %v288_v48 = vld [vmem:[%s6836_s21 + $0x34] sm:$0xf] }
  0x35   : > { %v388_v55 = vrot.slane %v387_v44, 4  ;;  %v2210_v63 = vrot.slane %v2208_v51, 5  ;;  %v2212_v0 = vshrl.u32 %v6898_v37, 16  ;;  %v2218_v1 = vshll.u32 %v6907_v45, 16 }
  0x36   : > { %v398_v2 = vrot.slane %v397_v49, 4  ;;  %6052 = vmatmul.mubr.msk.bf16.vlgmr.msra.gmra.mrb[0].mxu0 %vm773_vm3, %v5436_v53  ;;  %v2205_v5 = vor.u32 %v2204_v60, %v2201_v58  ;;  %v405_v7 = vshrl.u32 %v285_v52, 16  ;;  %v408_v8 = vshll.u32 %v285_v52, 16  ;;  %v317_v53 = vld [vmem:[%s6836_s21 + $0x38] sm:$0x1] }
  0x37   : > { %v393_v4 = vsel %vm6855_vm2, %v388_v55, %v392_v40  ;;  %6084 = vmatpush3.bf16.msra.mxu0 %v6831_v3  ;;  %v2214_v10 = vrot.slane %v2212_v0, 4  ;;  %v2220_v11 = vrot.slane %v2218_v1, 5  ;;  %v414_v12 = vshll.u32 %v286_v61, 16 }
  0x38   : > { %v403_v9 = vsel %vm6855_vm2, %v398_v2, %v402_v50  ;;  %v2206_v18 = vrot.slane %v2205_v5, 4  ;;  %v407_v19 = vrot.slane %v405_v7, 4  ;;  %v410_v20 = vrot.slane %v408_v8, 5  ;;  %6117 = vmatprep.subr.bf16.mxu0 %v6918_v62 }
  0x39   : > { %v5203_v17 = vcombine.low %v393_v4, %v403_v9  ;;  %v2215_v24 = vor.u32 %v2214_v10, %v2210_v63  ;;  %v416_v25 = vrot.slane %v414_v12, 5  ;;  %v418_v26 = vshrl.u32 %v286_v61, 16  ;;  %v5397_v4 = vld [vmem:[%s6836_s21 + $0x3c] sm:$0xf]  ;;  %v6955_v9 = vld [vmem:[%s6836_s21 + $0x40] sm:$0xf] }
  0x3a   : > { %v424_v3 = vshll.u32 %v316_v6, 16  ;;  %v2211_v27 = vsel %vm6855_vm2, %v2206_v18, %v2210_v63  ;;  %v411_v29 = vor.u32 %v410_v20, %v407_v19  ;;  %v2223_v31 = vshrl.u32 %v5394_v15, 16  ;;  %v6960_v20 = vld [vmem:[%s6836_s21 + $0x44] sm:$0x1] }
  0x3b   : > { %5919 = vmatprep.mubr.msk.bf16.mxu1 %vm773_vm3, %v5203_v17  ;;  %v2226_v32 = vshll.u32 %v5394_v15, 16  ;;  %v2216_v33 = vrot.slane %v2215_v24, 4  ;;  %v420_v34 = vrot.slane %v418_v26, 4  ;;  %v2232_v36 = vshll.u32 %v6931_v22, 16 }
  0x3c   : > { %v426_v35 = vrot.slane %v424_v3, 5  ;;  %v412_v38 = vrot.slane %v411_v29, 4  ;;  %v2225_v39 = vrot.slane %v2223_v31, 4  ;;  %v2236_v41 = vshrl.u32 %v6931_v22, 16  ;;  %v289_v29 = vld [vmem:[%s6836_s21 + $0x3c] sm:$0xf] }
  0x3d   : > { %v2228_v40 = vrot.slane %v2226_v32, 5  ;;  %v2221_v43 = vsel %vm6855_vm2, %v2216_v33, %v2220_v11  ;;  %v421_v44 = vor.u32 %v420_v34, %v416_v25  ;;  %v2234_v46 = vrot.slane %v2232_v36, 5 }
  0x3e   : > { %v2242_v47 = vshll.u32 %v6938_v30, 16  ;;  %v5437_v49 = vcombine.low %v2211_v27, %v2221_v43  ;;  %v417_v50 = vsel %vm6855_vm2, %v412_v38, %v416_v25  ;;  %v2238_v52 = vrot.slane %v2236_v41, 4 }
  0x3f   : > { %v2229_v51 = vor.u32 %v2228_v40, %v2225_v39  ;;  %v422_v55 = vrot.slane %v421_v44, 4  ;;  %v429_v60 = vshrl.u32 %v287_v42, 16  ;;  %v432_v61 = vshll.u32 %v287_v42, 16 }
  0x40   : > { %v2244_v58 = vrot.slane %v2242_v47, 5  ;;  %6055 = vmatprep.mubr.msk.bf16.mxu0 %vm773_vm3, %v5437_v49  ;;  %v2239_v63 = vor.u32 %v2238_v52, %v2234_v46  ;;  %v438_v0 = vshll.u32 %v288_v48, 16  ;;  %v442_v1 = vshrl.u32 %v288_v48, 16  ;;  %v318_v49 = vld [vmem:[%s6836_s21 + $0x44] sm:$0x1] }
  0x41   : > { %v2230_v2 = vrot.slane %v2229_v51, 4  ;;  %v427_v5 = vsel %vm6855_vm2, %v422_v55, %v426_v35  ;;  %v431_v6 = vrot.slane %v429_v60, 4  ;;  %v434_v7 = vrot.slane %v432_v61, 5  ;;  %v290_v35 = vld [vmem:[%s6836_s21 + $0x40] sm:$0xf] }
  0x42   : > { %v448_v8 = vshll.u32 %v317_v53, 16  ;;  %v5204_v10 = vcombine.low %v417_v50, %v427_v5  ;;  %v2240_v12 = vrot.slane %v2239_v63, 4  ;;  %v440_v15 = vrot.slane %v438_v0, 5  ;;  %v5400_v51 = vld [vmem:[%s6836_s21 + $0x48] sm:$0xf] }
  0x43   : > { %v2235_v11 = vsel %vm6855_vm2, %v2230_v2, %v2234_v46  ;;  %v435_v17 = vor.u32 %v434_v7, %v431_v6  ;;  %v444_v18 = vrot.slane %v442_v1, 4  ;;  %v2247_v24 = vshrl.u32 %v5397_v4, 16  ;;  %v6978_v60 = vld [vmem:[%s6836_s21 + $0x4c] sm:$0xf] }
  0x44   : > { %v450_v19 = vrot.slane %v448_v8, 5  ;;  %5920 = vmatmul.mubr.msk.bf16.gmra.mrb[4].mxu1 %vm773_vm3, %v5204_v10  ;;  %v2245_v25 = vsel %vm6855_vm2, %v2240_v12, %v2244_v58  ;;  %v2250_v26 = vshll.u32 %v5397_v4, 16  ;;  %v2256_v3 = vshll.u32 %v6955_v9, 16  ;;  %v6986_v10 = vld [vmem:[%s6836_s21 + $0x50] sm:$0x1] }
  0x45   : > { %v2260_v27 = vshrl.u32 %v6955_v9, 16  ;;  %v5438_v31 = vcombine.low %v2235_v11, %v2245_v25  ;;  %v436_v32 = vrot.slane %v435_v17, 4  ;;  %v445_v33 = vor.u32 %v444_v18, %v440_v15  ;;  %v6993_v25 = vld [vmem:[%s6836_s21 + $0x4c] sm:$0xf] }
  0x46   : > { %v2249_v34 = vrot.slane %v2247_v24, 4  ;;  %v2252_v36 = vrot.slane %v2250_v26, 5  ;;  %v2258_v38 = vrot.slane %v2256_v3, 5  ;;  %v2266_v40 = vshll.u32 %v6960_v20, 16 }
  0x47   : > { %v2262_v39 = vrot.slane %v2260_v27, 4  ;;  %6056 = vmatmul.mubr.msk.bf16.gmra.mrb[4].mxu0 %vm773_vm3, %v5438_v31  ;;  %v441_v41 = vsel %vm6855_vm2, %v436_v32, %v440_v15  ;;  %v446_v42 = vrot.slane %v445_v33, 4  ;;  %v453_v43 = vshrl.u32 %v289_v29, 16  ;;  %v6990_v15 = vld [vmem:[%s6836_s21 + $0x48] sm:$0xf] }
  0x48   : > { %v456_v44 = vshll.u32 %v289_v29, 16  ;;  %v2253_v46 = vor.u32 %v2252_v36, %v2249_v34  ;;  %v2268_v48 = vrot.slane %v2266_v40, 5  ;;  %v462_v50 = vshll.u32 %v290_v35, 16  ;;  %v319_v34 = vld [vmem:[%s6836_s21 + $0x50] sm:$0x1] }
  0x49   : > { %v2263_v47 = vor.u32 %v2262_v39, %v2258_v38  ;;  %v451_v52 = vsel %vm6855_vm2, %v446_v42, %v450_v19  ;;  %v455_v53 = vrot.slane %v453_v43, 4  ;;  %v466_v58 = vshrl.u32 %v290_v35, 16 }
  0x4a   : > { %v458_v55 = vrot.slane %v456_v44, 5  ;;  %v5205_v61 = vcombine.low %v441_v41, %v451_v52  ;;  %v2254_v2 = vrot.slane %v2253_v46, 4  ;;  %v464_v0 = vrot.slane %v462_v50, 5  ;;  %v5403_v41 = vld [vmem:[%s6836_s21 + $0x54] sm:$0xf] }
  0x4b   : > { %v2264_v63 = vrot.slane %v2263_v47, 4  ;;  %v468_v4 = vrot.slane %v466_v58, 4  ;;  %v472_v5 = vshll.u32 %v318_v49, 16  ;;  %v2271_v6 = vshrl.u32 %v5400_v51, 16 }
  0x4c   : > { %v459_v1 = vor.u32 %v458_v55, %v455_v53  ;;  %5923 = vmatprep.mubr.msk.bf16.mxu1 %vm773_vm3, %v5205_v61  ;;  %v2259_v7 = vsel %vm6855_vm2, %v2254_v2, %v2258_v38  ;;  %v2274_v11 = vshll.u32 %v5400_v51, 16  ;;  %v2280_v12 = vshll.u32 %v6978_v60, 16  ;;  %v7009_v51 = vld [vmem:[%s6836_s21 + $0x58] sm:$0xf] }
  0x4d   : > { %v2269_v8 = vsel %vm6855_vm2, %v2264_v63, %v2268_v48  ;;  %v469_v19 = vor.u32 %v468_v4, %v464_v0  ;;  %v474_v24 = vrot.slane %v472_v5, 5  ;;  %v2273_v26 = vrot.slane %v2271_v6, 4 }
  0x4e   : > { %v5439_v17 = vcombine.low %v2259_v7, %v2269_v8  ;;  %v460_v18 = vrot.slane %v459_v1, 4  ;;  %v2276_v3 = vrot.slane %v2274_v11, 5  ;;  %v2282_v27 = vrot.slane %v2280_v12, 5  ;;  %v7019_v8 = vld [vmem:[%s6836_s21 + $0x54] sm:$0xf] }
  0x4f   : > { %v2284_v29 = vshrl.u32 %v6978_v60, 16  ;;  %v470_v32 = vrot.slane %v469_v19, 4  ;;  %v2290_v33 = vshll.u32 %v6986_v10, 16  ;;  %v477_v35 = vshrl.u32 %v6990_v15, 16  ;;  %v7025_v19 = vld [vmem:[%s6836_s21 + $0x58] sm:$0xf] }
  0x50   : > { %6059 = vmatprep.mubr.msk.bf16.mxu0 %vm773_vm3, %v5439_v17  ;;  %v465_v31 = vsel %vm6855_vm2, %v460_v18, %v464_v0  ;;  %v2277_v36 = vor.u32 %v2276_v3, %v2273_v26  ;;  %v480_v39 = vshll.u32 %v6990_v15, 16  ;;  %v486_v40 = vshll.u32 %v6993_v25, 16  ;;  %v7015_v0 = vld [vmem:[%s6836_s21 + $0x5c] sm:$0x1] }
  0x51   : > { %v2286_v38 = vrot.slane %v2284_v29, 4  ;;  %v475_v42 = vsel %vm6855_vm2, %v470_v32, %v474_v24  ;;  %v2292_v43 = vrot.slane %v2290_v33, 5  ;;  %v479_v44 = vrot.slane %v477_v35, 4  ;;  %v320_v33 = vld [vmem:[%s6836_s21 + $0x5c] sm:$0x1] }
  0x52   : > { %v490_v46 = vshrl.u32 %v6993_v25, 16  ;;  %v5206_v47 = vcombine.low %v465_v31, %v475_v42  ;;  %v2278_v48 = vrot.slane %v2277_v36, 4  ;;  %v482_v50 = vrot.slane %v480_v39, 5 }
  0x53   : > { %v2287_v49 = vor.u32 %v2286_v38, %v2282_v27  ;;  %v488_v52 = vrot.slane %v486_v40, 5  ;;  %v496_v55 = vshll.u32 %v319_v34, 16  ;;  %v2295_v58 = vshrl.u32 %v5403_v41, 16  ;;  %v5406_v40 = vld [vmem:[%s6836_s21 + $0x60] sm:$0xf] }
  0x54   : > { %v492_v53 = vrot.slane %v490_v46, 4  ;;  %5924 = vmatmul.mubr.msk.bf16.gmra.mrb[8].mxu1 %vm773_vm3, %v5206_v47  ;;  %v2283_v61 = vsel %vm6855_vm2, %v2278_v48, %v2282_v27  ;;  %v483_v63 = vor.u32 %v482_v50, %v479_v44  ;;  %v2298_v1 = vshll.u32 %v5403_v41, 16  ;;  %v7039_v46 = vld [vmem:[%s6836_s21 + $0x64] sm:$0xf] }
  0x55   : > { %v2288_v2 = vrot.slane %v2287_v49, 4  ;;  %v498_v5 = vrot.slane %v496_v55, 5  ;;  %v2297_v6 = vrot.slane %v2295_v58, 4  ;;  %v2304_v7 = vshll.u32 %v7009_v51, 16  ;;  %v7046_v55 = vld [vmem:[%s6836_s21 + $0x68] sm:$0x1] }
  0x56   : > { %v493_v4 = vor.u32 %v492_v53, %v488_v52  ;;  %v484_v12 = vrot.slane %v483_v63, 4  ;;  %v2300_v17 = vrot.slane %v2298_v1, 5  ;;  %v2308_v18 = vshrl.u32 %v7009_v51, 16 }
  0x57   : > { %v2293_v11 = vsel %vm6855_vm2, %v2288_v2, %v2292_v43  ;;  %v2306_v3 = vrot.slane %v2304_v7, 5  ;;  %v2314_v27 = vshll.u32 %v7015_v0, 16  ;;  %v501_v34 = vshrl.u32 %v7019_v8, 16 }
  0x58   : > { %v5440_v24 = vcombine.low %v2283_v61, %v2293_v11  ;;  %v494_v26 = vrot.slane %v493_v4, 4  ;;  %v489_v29 = vsel %vm6855_vm2, %v484_v12, %v488_v52  ;;  %v2301_v31 = vor.u32 %v2300_v17, %v2297_v6  ;;  %v7056_v17 = vld [vmem:[%s6836_s21 + $0x64] sm:$0xf] }
  0x59   : > { %v2310_v32 = vrot.slane %v2308_v18, 4  ;;  %v2316_v36 = vrot.slane %v2314_v27, 5  ;;  %v504_v38 = vshll.u32 %v7019_v8, 16  ;;  %v510_v39 = vshll.u32 %v7025_v19, 16 }
  0x5a   : > { %6060 = vmatmul.mubr.msk.bf16.gmra.mrb[8].mxu0 %vm773_vm3, %v5440_v24  ;;  %v499_v35 = vsel %vm6855_vm2, %v494_v26, %v498_v5  ;;  %v2302_v42 = vrot.slane %v2301_v31, 4  ;;  %v503_v44 = vrot.slane %v501_v34, 4  ;;  %v514_v49 = vshrl.u32 %v7025_v19, 16  ;;  %v7050_v5 = vld [vmem:[%s6836_s21 + $0x60] sm:$0xf] }
  0x5b   : > { %v5207_v41 = vcombine.low %v489_v29, %v499_v35  ;;  %v2311_v43 = vor.u32 %v2310_v32, %v2306_v3  ;;  %v506_v47 = vrot.slane %v504_v38, 5  ;;  %v512_v48 = vrot.slane %v510_v39, 5  ;;  %v321_v35 = vld [vmem:[%s6836_s21 + $0x68] sm:$0x1] }
  0x5c   : > { %v520_v50 = vshll.u32 %v320_v33, 16  ;;  %v2307_v52 = vsel %vm6855_vm2, %v2302_v42, %v2306_v3  ;;  %v2319_v58 = vshrl.u32 %v5406_v40, 16  ;;  %v2322_v61 = vshll.u32 %v5406_v40, 16 }
  0x5d   : > { %5927 = vmatprep.mubr.msk.bf16.mxu1 %vm773_vm3, %v5207_v41  ;;  %v2312_v53 = vrot.slane %v2311_v43, 4  ;;  %v507_v2 = vor.u32 %v506_v47, %v503_v44  ;;  %v516_v63 = vrot.slane %v514_v49, 4  ;;  %v2328_v4 = vshll.u32 %v7039_v46, 16  ;;  %v5468_v43 = vld [vmem:[%s6836_s21 + $0xc] sm:$0xe] }
  0x5e   : > { %v522_v1 = vrot.slane %v520_v50, 5  ;;  %v2321_v7 = vrot.slane %v2319_v58, 4  ;;  %v2324_v11 = vrot.slane %v2322_v61, 5  ;;  %v2332_v12 = vshrl.u32 %v7039_v46, 16 }
  0x5f   : > { %v2317_v6 = vsel %vm6855_vm2, %v2312_v53, %v2316_v36  ;;  %v508_v24 = vrot.slane %v507_v2, 4  ;;  %v517_v26 = vor.u32 %v516_v63, %v512_v48  ;;  %v2330_v3 = vrot.slane %v2328_v4, 5 }
  0x60   : > { %v5441_v18 = vcombine.low %v2307_v52, %v2317_v6  ;;  %v2325_v27 = vor.u32 %v2324_v11, %v2321_v7  ;;  %v2334_v29 = vrot.slane %v2332_v12, 4  ;;  %v2338_v31 = vshll.u32 %v7046_v55, 16  ;;  %v7084_v7 = vld [vmem:[%s6836_s21 + $0x70] sm:$0xf] }
  0x61   : > { %v525_v32 = vshrl.u32 %v7050_v5, 16  ;;  %v513_v33 = vsel %vm6855_vm2, %v508_v24, %v512_v48  ;;  %v518_v34 = vrot.slane %v517_v26, 4  ;;  %v528_v36 = vshll.u32 %v7050_v5, 16  ;;  %v7071_v48 = vld [vmem:[%s6836_s21 + $0x6c] sm:$0xf] }
  0x62   : > { %6063 = vmatprep.mubr.msk.bf16.mxu0 %vm773_vm3, %v5441_v18  ;;  %v534_v38 = vshll.u32 %v7056_v17, 16  ;;  %v2326_v39 = vrot.slane %v2325_v27, 4  ;;  %v2335_v40 = vor.u32 %v2334_v29, %v2330_v3  ;;  %v2340_v41 = vrot.slane %v2338_v31, 5  ;;  %v322_v31 = vld [vmem:[%s6836_s21 + $0x74] sm:$0x1] }
  0x63   : > { %v527_v42 = vrot.slane %v525_v32, 4  ;;  %v523_v44 = vsel %vm6855_vm2, %v518_v34, %v522_v1  ;;  %v530_v47 = vrot.slane %v528_v36, 5  ;;  %v538_v50 = vshrl.u32 %v7056_v17, 16  ;;  %v5469_v32 = vld [vmem:[%s6836_s21 + $0x18] sm:$0xe] }
  0x64   : > { %v536_v49 = vrot.slane %v534_v38, 5  ;;  %v5208_v52 = vcombine.low %v513_v33, %v523_v44  ;;  %v2331_v53 = vsel %vm6855_vm2, %v2326_v39, %v2330_v3  ;;  %v2336_v58 = vrot.slane %v2335_v40, 4  ;;  %v7103_v38 = vld [vmem:[%s6836_s21 + $0x78] sm:$0xf] }
  0x65   : > { %v544_v61 = vshll.u32 %v321_v35, 16  ;;  %v531_v63 = vor.u32 %v530_v47, %v527_v42  ;;  %v540_v1 = vrot.slane %v538_v50, 4  ;;  %v5484_v4 = vrot.slane %v5468_v43, 9  ;;  %v5470_v47 = vld [vmem:[%s6836_s21 + $0x24] sm:$0xe] }
  0x66   : > { %v2900_v6 = vrot.slane %v2898_v56, 4  ;;  %5928 = vmatmul.mubr.msk.bf16.gmra.mrb[12].mxu1 %vm773_vm3, %v5208_v52  ;;  %v2341_v11 = vsel %vm6855_vm2, %v2336_v58, %v2340_v41  ;;  %v549_v18 = vshrl.u32 %v7071_v48, 16  ;;  %v552_v24 = vshll.u32 %v7071_v48, 16  ;;  %v323_v41 = vld [vmem:[%s6836_s21 + $0x80] sm:$0x1] }
  0x67   : > { %v546_v12 = vrot.slane %v544_v61, 5  ;;  %v5442_v26 = vcombine.low %v2331_v53, %v2341_v11  ;;  %v532_v3 = vrot.slane %v531_v63, 4  ;;  %v541_v27 = vor.u32 %v540_v1, %v536_v49 }
  0x68   : > { %v2899_v29 = vsel %vm7077_vm6, %v5484_v4, %v2898_v56  ;;  %v2902_v33 = vsel %vm7077_vm6, %v2900_v6, %v2901_v57  ;;  %v551_v34 = vrot.slane %v549_v18, 4  ;;  %v554_v35 = vrot.slane %v552_v24, 5  ;;  %v7137_v24 = vld [vmem:[%s6836_s21 + $0x88] sm:$0xf] }
  0x69   : > { %v558_v36 = vshll.u32 %v7084_v7, 16  ;;  %6064 = vmatmul.mubr.msk.bf16.gmra.mrb[12].mxu0 %vm773_vm3, %v5442_v26  ;;  %v537_v13 = vsel %vm6855_vm2, %v532_v3, %v536_v49  ;;  %v542_v56 = vrot.slane %v541_v27, 4  ;;  %v5502_v39 = vcombine.low %v2899_v29, %v2902_v33 }
  0x6a   : > { %v562_v40 = vshrl.u32 %v7084_v7, 16  ;;  %v555_v57 = vor.u32 %v554_v35, %v551_v34  ;;  %v568_v43 = vshll.u32 %v322_v31, 16  ;;  %v5485_v44 = vrot.slane %v5469_v32, 9  ;;  %v324_v35 = vld [vmem:[%s6836_s21 + $0x8c] sm:$0x1] }
  0x6b   : > { %v560_v42 = vrot.slane %v558_v36, 5  ;;  %v547_v50 = vsel %vm6855_vm2, %v542_v56, %v546_v12  ;;  %6085 = vmatprep.mubr.msk.bf16.mxu0 %vm773_vm3, %v5502_v39  ;;  %v2909_v49 = vsel %vm7077_vm6, %v6891_v23, %v2908_v21  ;;  %v573_v53 = vshrl.u32 %v7103_v38, 16  ;;  %v7129_v12 = vld [vmem:[%s6836_s21 + $0x84] sm:$0xf] }
  0x6c   : > { %v564_v52 = vrot.slane %v562_v40, 4  ;;  %v5209_v58 = vcombine.low %v537_v13, %v547_v50  ;;  %v556_v61 = vrot.slane %v555_v57, 4  ;;  %v570_v63 = vrot.slane %v568_v43, 5  ;;  %v5471_v40 = vld [vmem:[%s6836_s21 + $0x30] sm:$0xe] }
  0x6d   : > { %v2906_v1 = vsel %vm7077_vm6, %v5485_v44, %v2905_v16  ;;  %v575_v11 = vrot.slane %v573_v53, 4  ;;  %v576_v59 = vshll.u32 %v7103_v38, 16  ;;  %v582_v23 = vshll.u32 %v7110_v14, 16  ;;  %v7142_v16 = vld [vmem:[%s8685_s1 + $0x38] sm:$0xff]   ;;  %v7161_v50 = vld [vmem:[%s6836_s21 + $0x90] sm:$0xf] }
  0x6e   : > { %v565_v4 = vor.u32 %v564_v52, %v560_v42  ;;  %v5503_v6 = vcombine.low %v2906_v1, %v2909_v49  ;;  %5931 = vmatprep.mubr.msk.bf16.mxu1 %vm773_vm3, %v5209_v58  ;;  %v561_v21 = vsel %vm6855_vm2, %v556_v61, %v560_v42  ;;  %v586_v54 = vshrl.u32 %v7110_v14, 16  ;;  %v7166_v58 = vld [vmem:[%s6836_s21 + $0x94] sm:$0xf] }
  0x6f   : > { %v592_v18 = vshll.u32 %v323_v41, 16  ;;  %v578_v3 = vrot.slane %v576_v59, 5  ;;  %v5486_v27 = vrot.slane %v5470_v47, 9  ;;  %v2912_v29 = vrot.slane %v6898_v37, 5 }
  0x70   : > { %v566_v26 = vrot.slane %v565_v4, 4  ;;  %v584_v31 = vrot.slane %v582_v23, 5  ;;  %v588_v32 = vrot.slane %v586_v54, 4  ;;  %v2915_v34 = vrot.slane %v6907_v45, 5  ;;  %v325_v23 = vld [vmem:[%s6836_s21 + $0x98] sm:$0x1] }
  0x71   : > { %v594_v33 = vrot.slane %v592_v18, 5  ;;  %6086 = vmatmul.mubr.msk.bf16.vlgmr.msra.gmra.mrb[0].mxu0 %vm773_vm3, %v5503_v6  ;;  %v579_v13 = vor.u32 %v578_v3, %v575_v11  ;;  %v2913_v56 = vsel %vm7077_vm6, %v5486_v27, %v2912_v29  ;;  %v2914_v39 = vrot.slane %v2912_v29, 4  ;;  %v5472_v27 = vld [vmem:[%s6836_s21 + $0x3c] sm:$0xe] }
  0x72   : > { %v571_v36 = vsel %vm6855_vm2, %v566_v26, %v570_v63  ;;  %6118 = vmatpush3.bf16.msra.mxu0 %v6918_v62  ;;  %v589_v37 = vor.u32 %v588_v32, %v584_v31  ;;  %v597_v45 = vshrl.u32 %v7129_v12, 16  ;;  %v600_v57 = vshll.u32 %v7129_v12, 16 }
  0x73   : > { %v5210_v41 = vcombine.low %v561_v21, %v571_v36  ;;  %v580_v42 = vrot.slane %v579_v13, 4  ;;  %v2916_v43 = vsel %vm7077_vm6, %v2914_v39, %v2915_v34  ;;  %v606_v44 = vshll.u32 %v7137_v24, 16  ;;  %6151 = vmatprep.subr.bf16.mxu0 %v7142_v16 }
  0x74   : > { %v610_v47 = vshrl.u32 %v7137_v24, 16  ;;  %v590_v62 = vrot.slane %v589_v37, 4  ;;  %v5504_v52 = vcombine.low %v2913_v56, %v2916_v43  ;;  %v599_v49 = vrot.slane %v597_v45, 4 }
  0x75   : > { %5932 = vmatmul.mubr.msk.bf16.gmra.mrb[16].mxu1 %vm773_vm3, %v5210_v41  ;;  %v602_v53 = vrot.slane %v600_v57, 5  ;;  %v585_v61 = vsel %vm6855_vm2, %v580_v42, %v584_v31  ;;  %v608_v63 = vrot.slane %v606_v44, 5  ;;  %v616_v4 = vshll.u32 %v324_v35, 16  ;;  %v7194_v42 = vld [vmem:[%s6836_s21 + $0xa0] sm:$0xf] }
  0x76   : > { %v612_v1 = vrot.slane %v610_v47, 4  ;;  %v595_v6 = vsel %vm6855_vm2, %v590_v62, %v594_v33  ;;  %6089 = vmatprep.mubr.msk.bf16.mxu0 %vm773_vm3, %v5504_v52  ;;  %v5487_v59 = vrot.slane %v5471_v40, 9  ;;  %v2919_v21 = vrot.slane %v6931_v22, 5  ;;  %v7189_v40 = vld [vmem:[%s6836_s21 + $0x9c] sm:$0xf] }
  0x77   : > { %v603_v11 = vor.u32 %v602_v53, %v599_v49  ;;  %v5211_v54 = vcombine.low %v585_v61, %v595_v6  ;;  %v618_v26 = vrot.slane %v616_v4, 5  ;;  %v2922_v3 = vrot.slane %v6938_v30, 5  ;;  %v326_v52 = vld [vmem:[%s6836_s21 + $0xa4] sm:$0x1] }
  0x78   : > { %v613_v18 = vor.u32 %v612_v1, %v608_v63  ;;  %v2920_v31 = vsel %vm7077_vm6, %v5487_v59, %v2919_v21  ;;  %v2921_v32 = vrot.slane %v2919_v21, 4  ;;  %v621_v33 = vshrl.u32 %v7161_v50, 16  ;;  %v5473_v59 = vld [vmem:[%s6836_s21 + $0x48] sm:$0xe] }
  0x79   : > { %v604_v29 = vrot.slane %v603_v11, 4  ;;  %5935 = vmatprep.mubr.msk.bf16.mxu1 %vm773_vm3, %v5211_v54  ;;  %v624_v22 = vshll.u32 %v7161_v50, 16  ;;  %v630_v35 = vshll.u32 %v7166_v58, 16  ;;  %v634_v36 = vshrl.u32 %v7166_v58, 16 }
  0x7a   : > { %v614_v34 = vrot.slane %v613_v18, 4  ;;  %v2923_v13 = vsel %vm7077_vm6, %v2921_v32, %v2922_v3  ;;  %v623_v56 = vrot.slane %v621_v33, 4  ;;  %v640_v39 = vshll.u32 %v325_v23, 16  ;;  %v7213_v33 = vld [vmem:[%s6836_s21 + $0xa8] sm:$0xf] }
  0x7b   : > { %v609_v30 = vsel %vm6855_vm2, %v604_v29, %v608_v63  ;;  %v5505_v37 = vcombine.low %v2920_v31, %v2923_v13  ;;  %v626_v45 = vrot.slane %v624_v22, 5  ;;  %v632_v57 = vrot.slane %v630_v35, 5 }
  0x7c   : > { %v619_v41 = vsel %vm6855_vm2, %v614_v34, %v618_v26  ;;  %v636_v44 = vrot.slane %v634_v36, 4  ;;  %v642_v47 = vrot.slane %v640_v39, 5  ;;  %v5488_v62 = vrot.slane %v5472_v27, 9 }
  0x7d   : > { %v5212_v43 = vcombine.low %v609_v30, %v619_v41  ;;  %6090 = vmatmul.mubr.msk.bf16.gmra.mrb[4].mxu0 %vm773_vm3, %v5505_v37  ;;  %v627_v49 = vor.u32 %v626_v45, %v623_v56  ;;  %v2926_v53 = vrot.slane %v6955_v9, 5  ;;  %v2929_v61 = vrot.slane %v6960_v20, 5  ;;  %v7218_v30 = vld [vmem:[%s6836_s21 + $0xac] sm:$0xf]  ;;  %v327_v37 = vld [vmem:[%s6836_s21 + $0xb0] sm:$0x1] }
  0x7e   : > { %v645_v63 = vshrl.u32 %v7189_v40, 16  ;;  %v637_v1 = vor.u32 %v636_v44, %v632_v57  ;;  %v648_v4 = vshll.u32 %v7189_v40, 16  ;;  %v654_v6 = vshll.u32 %v7194_v42, 16  ;;  %v5474_v45 = vld [vmem:[%s6836_s21 + $0x54] sm:$0xe] }
  0x7f   : > { %5936 = vmatmul.mubr.msk.bf16.gmra.mrb[20].mxu1 %vm773_vm3, %v5212_v43  ;;  %v658_v11 = vshrl.u32 %v7194_v42, 16  ;;  %v628_v21 = vrot.slane %v627_v49, 4  ;;  %v2927_v23 = vsel %vm7077_vm6, %v5488_v62, %v2926_v53  ;;  %v2928_v9 = vrot.slane %v2926_v53, 4  ;;  %v7228_v62 = vld [vmem:[%s6836_s21 + $0xb4] sm:$0xf] }
  0x80   : > { %v647_v20 = vrot.slane %v645_v63, 4  ;;  %v638_v54 = vrot.slane %v637_v1, 4  ;;  %v650_v18 = vrot.slane %v648_v4, 5  ;;  %v656_v26 = vrot.slane %v654_v6, 5  ;;  %v7240_v4 = vld [vmem:[%s6836_s21 + $0xb8] sm:$0xf] }
  0x81   : > { %v660_v3 = vrot.slane %v658_v11, 4  ;;  %v633_v27 = vsel %vm6855_vm2, %v628_v21, %v632_v57  ;;  %v2930_v29 = vsel %vm7077_vm6, %v2928_v9, %v2929_v61  ;;  %v664_v31 = vshll.u32 %v326_v52, 16 }
  0x82   : > { %v5489_v32 = vrot.slane %v5473_v59, 9  ;;  %v643_v34 = vsel %vm6855_vm2, %v638_v54, %v642_v47  ;;  %v5506_v22 = vcombine.low %v2927_v23, %v2930_v29  ;;  %v651_v35 = vor.u32 %v650_v18, %v647_v20  ;;  %v328_v18 = vld [vmem:[%s6836_s21 + $0xbc] sm:$0x1] }
  0x83   : > { %v661_v36 = vor.u32 %v660_v3, %v656_v26  ;;  %v5213_v13 = vcombine.low %v633_v27, %v643_v34  ;;  %v666_v56 = vrot.slane %v664_v31, 5  ;;  %v2933_v39 = vrot.slane %v6978_v60, 5  ;;  %v5475_v31 = vld [vmem:[%s6836_s21 + $0x60] sm:$0xe] }
  0x84   : > { %v2936_v41 = vrot.slane %v6986_v10, 5  ;;  %6093 = vmatprep.mubr.msk.bf16.mxu0 %vm773_vm3, %v5506_v22  ;;  %v652_v57 = vrot.slane %v651_v35, 4  ;;  %v669_v44 = vshrl.u32 %v7213_v33, 16  ;;  %v672_v47 = vshll.u32 %v7213_v33, 16 }
  0x85   : > { %v662_v43 = vrot.slane %v661_v36, 4  ;;  %5939 = vmatprep.mubr.msk.bf16.mxu1 %vm773_vm3, %v5213_v13  ;;  %v2934_v60 = vsel %vm7077_vm6, %v5489_v32, %v2933_v39  ;;  %v2935_v52 = vrot.slane %v2933_v39, 4  ;;  %v678_v10 = vshll.u32 %v7218_v30, 16  ;;  %v5476_v36 = vld [vmem:[%s6836_s21 + $0x6c] sm:$0xe] }
  0x86   : > { %v682_v49 = vshrl.u32 %v7218_v30, 16  ;;  %v657_v53 = vsel %vm6855_vm2, %v652_v57, %v656_v26  ;;  %v671_v63 = vrot.slane %v669_v44, 4  ;;  %v674_v1 = vrot.slane %v672_v47, 5 }
  0x87   : > { %v667_v61 = vsel %vm6855_vm2, %v662_v43, %v666_v56  ;;  %v2937_v11 = vsel %vm7077_vm6, %v2935_v52, %v2936_v41  ;;  %v680_v59 = vrot.slane %v678_v10, 5  ;;  %v688_v20 = vshll.u32 %v327_v37, 16  ;;  %v5411_v52 = vld [vmem:[%s6836_s21 + $0x74] sm:$0x1] }
  0x88   : > { %v5214_v6 = vcombine.low %v657_v53, %v667_v61  ;;  %v684_v21 = vrot.slane %v682_v49, 4  ;;  %v5507_v23 = vcombine.low %v2934_v60, %v2937_v11  ;;  %v675_v9 = vor.u32 %v674_v1, %v671_v63  ;;  %v5410_v60 = vld [vmem:[%s6836_s21 + $0x70] sm:$0xf] }
  0x89   : > { %v5490_v54 = vrot.slane %v5474_v45, 9  ;;  %v2940_v3 = vrot.slane %v7009_v51, 5  ;;  %v2943_v27 = vrot.slane %v7015_v0, 5  ;;  %v693_v29 = vshrl.u32 %v7228_v62, 16 }
  0x8a   : > { %5940 = vmatmul.mubr.msk.bf16.gmra.mrb[24].mxu1 %vm773_vm3, %v5214_v6  ;;  %v685_v26 = vor.u32 %v684_v21, %v680_v59  ;;  %6094 = vmatmul.mubr.msk.bf16.gmra.mrb[8].mxu0 %vm773_vm3, %v5507_v23  ;;  %v676_v32 = vrot.slane %v675_v9, 4  ;;  %v690_v34 = vrot.slane %v688_v20, 5  ;;  %v696_v22 = vshll.u32 %v7228_v62, 16 }
  0x8b   : > { %v702_v35 = vshll.u32 %v7240_v4, 16  ;;  %v2941_v51 = vsel %vm7077_vm6, %v5490_v54, %v2940_v3  ;;  %v2942_v56 = vrot.slane %v2940_v3, 4  ;;  %v695_v0 = vrot.slane %v693_v29, 4  ;;  %v5477_v54 = vld [vmem:[%s6836_s21 + $0x78] sm:$0xe] }
  0x8c   : > { %v686_v13 = vrot.slane %v685_v26, 4  ;;  %v681_v39 = vsel %vm6855_vm2, %v676_v32, %v680_v59  ;;  %v698_v41 = vrot.slane %v696_v22, 5  ;;  %v706_v45 = vshrl.u32 %v7240_v4, 16  ;;  %v6592_v29 = vld [vmem:[%s6836_s21] sm:$0xf] }
  0x8d   : > { %v704_v37 = vrot.slane %v702_v35, 5  ;;  %v2944_v43 = vsel %vm7077_vm6, %v2942_v56, %v2943_v27  ;;  %v712_v44 = vshll.u32 %v328_v18, 16  ;;  %v5491_v47 = vrot.slane %v5475_v31, 9  ;;  %v7280_v31 = vld [vmem:[%s6836_s21 + $0x4] sm:$0xf] }
  0x8e   : > { %v691_v57 = vsel %vm6855_vm2, %v686_v13, %v690_v34  ;;  %v5508_v49 = vcombine.low %v2941_v51, %v2944_v43  ;;  %v699_v53 = vor.u32 %v698_v41, %v695_v0  ;;  %v708_v61 = vrot.slane %v706_v45, 4  ;;  %v7284_v34 = vld [vmem:[%s6836_s21 + $0x7c] sm:$0xf]  ;;  %v7287_v22 = vld [vmem:[%s6836_s21 + $0x80] sm:$0x1] }
  0x8f   : > { %v5215_v10 = vcombine.low %v681_v39, %v691_v57  ;;  %v714_v63 = vrot.slane %v712_v44, 5  ;;  %v2947_v1 = vrot.slane %v7039_v46, 5  ;;  %v2950_v6 = vrot.slane %v7046_v55, 5  ;;  %v5478_v35 = vld [vmem:[%s6836_s21 + $0x84] sm:$0xe] }
  0x90   : > { %v5492_v11 = vrot.slane %v5476_v36, 9  ;;  %6097 = vmatprep.mubr.msk.bf16.mxu0 %vm773_vm3, %v5508_v49  ;;  %v700_v59 = vrot.slane %v699_v53, 4  ;;  %v709_v21 = vor.u32 %v708_v61, %v704_v37  ;;  %v2954_v23 = vrot.slane %v5410_v60, 5  ;;  %v5416_v0 = vld [vmem:[%s6836_s21 + $0x88] sm:$0xf] }
  0x91   : > { %5943 = vmatprep.mubr.msk.bf16.mxu1 %vm773_vm3, %v5215_v10  ;;  %v2957_v9 = vrot.slane %v5411_v52, 5  ;;  %v2948_v20 = vsel %vm7077_vm6, %v5491_v47, %v2947_v1  ;;  %v2949_v46 = vrot.slane %v2947_v1, 4  ;;  %v5234_v32 = vcombine.low %v6592_v29, %v7280_v31  ;;  %v5417_v39 = vld [vmem:[%s6836_s21 + $0x8c] sm:$0x1]  ;;  %v5419_v45 = vld [vmem:[%s6836_s21 + $0x94] sm:$0xf] }
  0x92   : > { %v705_v55 = vsel %vm6855_vm2, %v700_v59, %v704_v37  ;;  %v710_v18 = vrot.slane %v709_v21, 4  ;;  %v2955_v26 = vsel %vm7077_vm6, %v5492_v11, %v2954_v23  ;;  %v2956_v3 = vrot.slane %v2954_v23, 4  ;;  %v5420_v52 = vld [vmem:[%s6836_s21 + $0x98] sm:$0x1]  ;;  %v5479_v10 = vld [vmem:[%s6836_s21 + $0x90] sm:$0xe] }
  0x93   : > { %v2951_v27 = vsel %vm7077_vm6, %v2949_v46, %v2950_v6  ;;  %v5493_v56 = vrot.slane %v5477_v54, 9  ;;  %v2961_v57 = vrot.slane %v7284_v34, 5  ;;  %v2964_v43 = vrot.slane %v7287_v22, 5  ;;  %v5423_v11 = vld [vmem:[%s6836_s21 + $0xa4] sm:$0x1] }
  0x94   : > { %v715_v36 = vsel %vm6855_vm2, %v710_v18, %v714_v63  ;;  %v5509_v13 = vcombine.low %v2948_v20, %v2951_v27  ;;  %v2958_v51 = vsel %vm7077_vm6, %v2956_v3, %v2957_v9  ;;  %v5494_v44 = vrot.slane %v5478_v35, 9  ;;  %v5422_v63 = vld [vmem:[%s6836_s21 + $0xa0] sm:$0xf]  ;;  %v5480_v59 = vld [vmem:[%s6836_s21 + $0x9c] sm:$0xe] }
  0x95   : > { %v5216_v41 = vcombine.low %v705_v55, %v715_v36  ;;  %v5510_v37 = vcombine.low %v2955_v26, %v2958_v51  ;;  %v2968_v47 = vrot.slane %v5416_v0, 5  ;;  %v2971_v60 = vrot.slane %v5417_v39, 5  ;;  %v6594_v21 = vld [vmem:[%s6836_s21 + $0xc] sm:$0xf]  ;;  %v7314_v23 = vld [vmem:[%s6836_s21 + $0x10] sm:$0xf] }
  0x96   : > { %6098 = vmatmul.mubr.msk.bf16.gmra.mrb[12].mxu0 %vm773_vm3, %v5509_v13  ;;  %v2962_v49 = vsel %vm7077_vm6, %v5493_v56, %v2961_v57  ;;  %v2963_v53 = vrot.slane %v2961_v57, 4  ;;  %v2975_v61 = vrot.slane %v5419_v45, 5  ;;  %v5235_v9 = vcombine.low %v6594_v21, %v7314_v23  ;;  %v6596_v27 = vld [vmem:[%s6836_s21 + $0x18] sm:$0xf]  ;;  %v7323_v29 = vld [vmem:[%s6836_s21 + $0x1c] sm:$0xf] }
  0x97   : > { %5944 = vmatmul.mubr.msk.bf16.gmra.mrb[28].mxu1 %vm773_vm3, %v5216_v41  ;;  %6101 = vmatprep.mubr.msk.bf16.mxu0 %vm773_vm3, %v5510_v37  ;;  %v2969_v1 = vsel %vm7077_vm6, %v5494_v44, %v2968_v47  ;;  %v2970_v6 = vrot.slane %v2968_v47, 4  ;;  %v5495_v46 = vrot.slane %v5479_v10, 9  ;;  %v2978_v54 = vrot.slane %v5420_v52, 5  ;;  %v5425_v51 = vld [vmem:[%s6836_s21 + $0xac] sm:$0xf]  ;;  %v7331_v39 = vld [vmem:[%s8685_s1 + $0x18] sm:$0xff]  }
  0x98   : > { %5949 = vmatprep.mubr.msk.bf16.mxu1 %vm773_vm3, %v5234_v32  ;;  %v2965_v20 = vsel %vm7077_vm6, %v2963_v53, %v2964_v43  ;;  %v2977_v26 = vrot.slane %v2975_v61, 4  ;;  %v2982_v3 = vrot.slane %v5422_v63, 5  ;;  %v5236_v32 = vcombine.low %v6596_v27, %v7323_v29  ;;  %v5428_v0 = vld [vmem:[%s6836_s21 + $0xb8] sm:$0xf]  ;;  %v6598_v57 = vld [vmem:[%s8685_s1 + $0x10] sm:$0xff]  }
  0x99   : > { %v5511_v55 = vcombine.low %v2962_v49, %v2965_v20  ;;  %v2972_v18 = vsel %vm7077_vm6, %v2970_v6, %v2971_v60  ;;  %v5496_v36 = vrot.slane %v5480_v59, 9  ;;  %v2985_v13 = vrot.slane %v5423_v11, 5  ;;  %v5426_v47 = vld [vmem:[%s6836_s21 + $0xb0] sm:$0x1]  ;;  %v5481_v60 = vld [vmem:[%s6836_s21 + $0xa8] sm:$0xe] }
  0x9a   : > { %v5512_v35 = vcombine.low %v2969_v1, %v2972_v18  ;;  %v2984_v56 = vrot.slane %v2982_v3, 4  ;;  %v2976_v41 = vsel %vm7077_vm6, %v5495_v46, %v2975_v61  ;;  %v2979_v37 = vsel %vm7077_vm6, %v2977_v26, %v2978_v54  ;;  %v5429_v10 = vld [vmem:[%s6836_s21 + $0xbc] sm:$0x1]  ;;  %v5482_v49 = vld [vmem:[%s6836_s21 + $0xb4] sm:$0xe] }
  0x9b   : > { %v2989_v45 = vrot.slane %v5425_v51, 5  ;;  %v2983_v43 = vsel %vm7077_vm6, %v5496_v36, %v2982_v3  ;;  %v2996_v52 = vrot.slane %v5428_v0, 5  ;;  %v6599_v53 = vld [vmem:[%s6836_s21 + $0x24] sm:$0xf]  ;;  %v7355_v61 = vld [vmem:[%s6836_s21 + $0x28] sm:$0xf]  ;;  %v5513_v1 = vcombine.low %v2976_v41, %v2979_v37 }
  0x9c   : > { %v2986_v44 = vsel %vm7077_vm6, %v2984_v56, %v2985_v13  ;;  %v5237_v63 = vcombine.low %v6599_v53, %v7355_v61  ;;  %v5431_v6 = vld [vmem:[%s6836_s21 + $0xc4] sm:$0xf]  ;;  %v5497_v59 = vrot.slane %v5481_v60, 9  ;;  %v6601_v20 = vld [vmem:[%s6836_s21 + $0x30] sm:$0xf]  ;;  %v2999_v26 = vrot.slane %v5429_v10, 5 }
  0x9d   : > { %v5514_v11 = vcombine.low %v2983_v43, %v2986_v44  ;;  %v2991_v21 = vrot.slane %v2989_v45, 4  ;;  %v7361_v46 = vld [vmem:[%s6836_s21 + $0x34] sm:$0xf]  ;;  %v2998_v18 = vrot.slane %v2996_v52, 4  ;;  %v5432_v13 = vld [vmem:[%s6836_s21 + $0xc8] sm:$0x1] }
  0x9e   : > { %6102 = vmatmul.mubr.msk.bf16.gmra.mrb[16].mxu0 %vm773_vm3, %v5511_v55  ;;  %v5238_v54 = vcombine.low %v6601_v20, %v7361_v46  ;;  %v5498_v55 = vrot.slane %v5482_v49, 9  ;;  %v2990_v3 = vsel %vm7077_vm6, %v5497_v59, %v2989_v45  ;;  %v5483_v51 = vld [vmem:[%s6836_s21 + $0xc0] sm:$0xe]  ;;  %v6603_v56 = vld [vmem:[%s6836_s21 + $0x3c] sm:$0xf]  ;;  %v3006_v44 = vrot.slane %v5432_v13, 5 }
  0x9f   : > { %5950 = vmatmul.mubr.msk.bf16.vlgmr.msra.gmra.mrb[0].mxu1 %vm773_vm3, %v5235_v9  ;;  %6105 = vmatprep.mubr.msk.bf16.mxu0 %vm773_vm3, %v5512_v35  ;;  %v2992_v9 = vrot.slane %v5426_v47, 5  ;;  %v3000_v36 = vsel %vm7077_vm6, %v2998_v18, %v2999_v26  ;;  %v7380_v0 = vld [vmem:[%s6836_s21 + $0x40] sm:$0xf]  ;;  %v5240_v47 = vcombine.low %v6990_v15, %v6993_v25  ;;  %v2376_v10 = vshll.u32 %v7284_v34, 16  ;;  %v6550_v53 = vld [vmem:[%s6836_s21 + $0x18] sm:$0xff]  }
  0xa0   : > { %5982 = vmatpush3.bf16.msra.mxu1 %v6598_v57  ;;  %5953 = vmatprep.mubr.msk.bf16.mxu1 %vm773_vm3, %v5236_v32  ;;  %v3003_v32 = vrot.slane %v5431_v6, 5  ;;  %v2997_v35 = vsel %vm7077_vm6, %v5498_v55, %v2996_v52  ;;  %v5239_v41 = vcombine.low %v6603_v56, %v7380_v0  ;;  %v5499_v57 = vrot.slane %v5483_v51, 9 }
  0xa1   : > { %6015 = vmatprep.subr.bf16.mxu1 %v7331_v39  ;;  %v2993_v27 = vsel %vm7077_vm6, %v2991_v21, %v2992_v9  ;;  %v5516_v45 = vcombine.low %v2997_v35, %v3000_v36  ;;  %v2380_v15 = vshrl.u32 %v7284_v34, 16  ;;  %v5241_v49 = vcombine.low %v7019_v8, %v7025_v19  ;;  %v1278_v8 = vld [vmem:[%s6836_s21] sm:$0xe]  ;;  %v1279_v19 = vld [vmem:[%s6836_s21 + $0xc] sm:$0xe] }
  0xa2   : > { %v5515_v37 = vcombine.low %v2990_v3, %v2993_v27  ;;  %v3005_v43 = vrot.slane %v3003_v32, 4  ;;  %v3004_v60 = vsel %vm7077_vm6, %v5499_v57, %v3003_v32  ;;  %v1338_v21 = vrot.slane %v7314_v23, 5  ;;  %v1280_v34 = vld [vmem:[%s6836_s21 + $0x18] sm:$0xe]  ;;  %v6553_v27 = vld [vmem:[%s6836_s21 + $0x24] sm:$0xff]   ;;  %v6555_v32 = vld [vmem:[%s6836_s21 + $0x30] sm:$0xff]  }
  0xa3   : > { %v2382_v6 = vrot.slane %v2380_v15, 4  ;;  %v2386_v9 = vshll.u32 %v7287_v22, 16  ;;  %v1331_v23 = vrot.slane %v7280_v31, 5  ;;  %v1345_v20 = vrot.slane %v7323_v29, 5  ;;  %v1282_v36 = vld [vmem:[%s6836_s21 + $0x30] sm:$0xe] }
  0xa4   : > { %v3007_v52 = vsel %vm7077_vm6, %v3005_v43, %v3006_v44  ;;  %v5243_v18 = vcombine.low %v7071_v48, %v7084_v7  ;;  %v1352_v26 = vrot.slane %v7355_v61, 5  ;;  %v1359_v3 = vrot.slane %v7361_v46, 5  ;;  %v6607_v48 = vld [vmem:[%s6836_s21 + $0x20] sm:$0x1]  ;;  %v6608_v57 = vld [vmem:[%s6836_s21 + $0x2c] sm:$0x1] }
  0xa5   : > { %v5517_v25 = vcombine.low %v3004_v60, %v3007_v52  ;;  %v5244_v22 = vcombine.low %v7103_v38, %v7110_v14  ;;  %v5245_v31 = vcombine.low %v7129_v12, %v7137_v24  ;;  %v5267_v29 = vrot.slane %v1278_v8, 9  ;;  %v7432_v46 = vld [vmem:[%s8685_s1 + $0x40] sm:$0xff]  }
  0xa6   : > { %6106 = vmatmul.mubr.msk.bf16.gmra.mrb[20].mxu0 %vm773_vm3, %v5513_v1  ;;  %v7400_v1 = vrot.slane %v2376_v10, 5  ;;  %v5268_v35 = vrot.slane %v1279_v19, 9  ;;  %v1340_v13 = vrot.slane %v1338_v21, 4  ;;  %v5269_v51 = vrot.slane %v1280_v34, 9  ;;  %v6609_v10 = vld [vmem:[%s6836_s21 + $0x38] sm:$0x1] }
  0xa7   : > { %5954 = vmatmul.mubr.msk.bf16.gmra.mrb[4].mxu1 %vm773_vm3, %v5237_v63  ;;  %6109 = vmatprep.mubr.msk.bf16.mxu0 %vm773_vm3, %v5514_v11  ;;  %v5242_v63 = vcombine.low %v7050_v5, %v7056_v17  ;;  %v6605_v11 = vld [vmem:[%s6836_s21 + $0x8] sm:$0x1]  ;;  %v6606_v5 = vld [vmem:[%s6836_s21 + $0x14] sm:$0x1]  ;;  %v1348_v7 = vrot.slane %v6607_v48, 5  ;;  %v5246_v38 = vcombine.low %v7161_v50, %v7166_v58  ;;  %v5247_v14 = vcombine.low %v7189_v40, %v7194_v42 }
  0xa8   : > { %5957 = vmatprep.mubr.msk.bf16.mxu1 %vm773_vm3, %v5238_v54  ;;  %8707 = vst [vmem:[#allocation5_spill] sm:$0xff] %v7400_v1  ;;  %v1334_v59 = vrot.slane %v6605_v11, 5  ;;  %v1341_v17 = vrot.slane %v6606_v5, 5  ;;  %v1281_v54 = vld [vmem:[%s6836_s21 + $0x24] sm:$0xe]  ;;  %v2383_v55 = vor.u32 %v2382_v6, %v7400_v1  ;;  %v1333_v56 = vrot.slane %v1331_v23, 4 }
  0xa9   : > { %v5270_v61 = vrot.slane %v1281_v54, 9  ;;  %v1355_v43 = vrot.slane %v6608_v57, 5  ;;  %v5271_v44 = vrot.slane %v1282_v36, 9  ;;  %v5248_v60 = vcombine.low %v7213_v33, %v7218_v30  ;;  %v1284_v6 = vld [vmem:[%s6836_s21 + $0x48] sm:$0xe]  ;;  %v6561_v58 = vld [vmem:[%s6836_s21 + $0x54] sm:$0xff]  }
  0xaa   : > { %v7445_v52 = vsel %vm7077_vm6, %v5267_v29, %v1331_v23  ;;  %v1362_v15 = vrot.slane %v6609_v10, 5  ;;  %v7466_v11 = vrot.slane %v2383_v55, 4  ;;  %v5602_v34 = vld [vmem:[%s6836_s21 + $0x18] sm:$0xf]  ;;  %v6559_v5 = vld [vmem:[%s6836_s21 + $0x48] sm:$0xff]  }
  0xab   : > { %v7481_v19 = vsel %vm7077_vm6, %v5270_v61, %v1352_v26  ;;  %v6610_v23 = vld [vmem:[%s6836_s21 + $0x44] sm:$0x1]  ;;  %v1285_v55 = vld [vmem:[%s6836_s21 + $0x54] sm:$0xe]  ;;  %v3721_v48 = vshll.u32 %v5602_v34, 16 }
  0xac   : > { %8709 = vst [vmem:[#allocation7_spill] sm:$0xff] %v7466_v11  ;;  %v5274_v10 = vrot.slane %v1285_v55, 9  ;;  %v5608_v55 = vld [vmem:[%s6836_s21 + $0x30] sm:$0xf]  ;;  %v5609_v50 = vld [vmem:[%s6836_s21 + $0x34] sm:$0xf] }
  0xad   : > { %v3723_v24 = vrot.slane %v3721_v48, 5 }
  0xae   : > { %6110 = vmatmul.mubr.msk.bf16.gmra.mrb[24].mxu0 %vm773_vm3, %v5515_v37  ;;  %v1283_v37 = vld [vmem:[%s6836_s21 + $0x3c] sm:$0xe] }
  0xaf   : > { %5958 = vmatmul.mubr.msk.bf16.gmra.mrb[8].mxu1 %vm773_vm3, %v5239_v41  ;;  %6113 = vmatprep.mubr.msk.bf16.mxu0 %vm773_vm3, %v5516_v45  ;;  %v1347_v41 = vrot.slane %v1345_v20, 4  ;;  %v1354_v45 = vrot.slane %v1352_v26, 4 }
  0xb0   : > { %5961 = vmatprep.mubr.msk.bf16.mxu1 %vm773_vm3, %v5240_v47  ;;  %v1361_v47 = vrot.slane %v1359_v3, 4 }
  0xb1   : > { %v7477_v8 = vsel %vm7077_vm6, %v1347_v41, %v1348_v7  ;;  %v7496_v26 = vsel %vm7077_vm6, %v1354_v45, %v1355_v43  ;;  %v6612_v45 = vld [vmem:[%s6836_s21 + $0x50] sm:$0x1]  ;;  %v3775_v41 = vshll.u32 %v5609_v50, 16 }
  0xb2   : > { %v1376_v57 = vrot.slane %v6612_v45, 5  ;;  %v8717_v11 = vcombine.low %v7481_v19, %v7496_v26 }
  0xb6   : > { %6114 = vmatmul.mubr.msk.bf16.gmra.mrb[28].mxu0 %vm773_vm3, %v5517_v25  ;;  %v1366_v25 = vrot.slane %v7380_v0, 5  ;;  %v7463_v0 = vsel %vm7077_vm6, %v5269_v51, %v1345_v20  ;;  %v1369_v20 = vrot.slane %v6610_v23, 5  ;;  %v3718_v51 = vshrl.u32 %v5602_v34, 16  ;;  %v7540_v34 = vld [vmem:[%s6836_s21 + $0x5c] sm:$0x1] }
  0xb7   : > { %5962 = vmatmul.mubr.msk.bf16.gmra.mrb[12].mxu1 %vm773_vm3, %v5241_v49  ;;  %6119 = vmatprep.mubr.msk.bf16.mxu0 %vm773_vm3, %v6550_v53  ;;  %v7449_v49 = vrot.slane %v2386_v9, 5  ;;  %v7455_v53 = vsel %vm7077_vm6, %v5268_v35, %v1338_v21  ;;  %v7473_v21 = vsel %vm7077_vm6, %v1333_v56, %v1334_v59  ;;  %v5272_v9 = vrot.slane %v1283_v37, 9  ;;  %v6611_v59 = vld [vmem:[%s6836_s21 + $0x4c] sm:$0xf] }
  0xb8   : > { %5965 = vmatprep.mubr.msk.bf16.mxu1 %vm773_vm3, %v5242_v63  ;;  %v7459_v63 = vsel %vm7077_vm6, %v1340_v13, %v1341_v17  ;;  %v7487_v17 = vsel %vm7077_vm6, %v5271_v44, %v1359_v3  ;;  %v1373_v54 = vrot.slane %v6611_v59, 5  ;;  %v1368_v3 = vrot.slane %v1366_v25, 4  ;;  %v7511_v13 = vld [vmem:[%s6836_s21 + $0x60] sm:$0xe] }
  0xb9   : > { %8708 = vst [vmem:[#allocation6_spill] sm:$0xff] %v7449_v49  ;;  %v7521_v43 = vsel %vm7077_vm6, %v5272_v9, %v1366_v25  ;;  %v6613_v25 = vld [vmem:[%s6836_s21 + $0x58] sm:$0xf]  ;;  %v1383_v9 = vrot.slane %v7540_v34, 5  ;;  %v5275_v23 = vrot.slane %v7511_v13, 9  ;;  %v3720_v12 = vrot.slane %v3718_v51, 4 }
  0xba   : > { %v1375_v37 = vrot.slane %v1373_v54, 4  ;;  %v7525_v44 = vsel %vm7077_vm6, %v1368_v3, %v1369_v20  ;;  %v6615_v20 = vld [vmem:[%s6836_s21 + $0x64] sm:$0xf]  ;;  %v6616_v34 = vld [vmem:[%s6836_s21 + $0x70] sm:$0xf]  ;;  %v3779_v56 = vshrl.u32 %v5609_v50, 16 }
  0xbb   : > { %v1387_v59 = vrot.slane %v6615_v20, 5  ;;  %v1394_v20 = vrot.slane %v6616_v34, 5  ;;  %v5607_v34 = vld [vmem:[%s6836_s21 + $0x2c] sm:$0x1] }
  0xbc   : > { %v7557_v3 = vsel %vm7077_vm6, %v1375_v37, %v1376_v57  ;;  %v3766_v37 = vshrl.u32 %v5608_v55, 16  ;;  %v3769_v57 = vshll.u32 %v5608_v55, 16 }
  0xbd   : > { %v1389_v36 = vrot.slane %v1387_v59, 4 }
  0xbe   : > { %6120 = vmatmul.mubr.msk.bf16.vlgmr.msra.gmra.mrb[0].mxu0 %vm773_vm3, %v6553_v27  ;;  %v7500_v27 = vsel %vm7077_vm6, %v1361_v47, %v1362_v15  ;;  %v5604_v15 = vld [vmem:[%s6836_s21 + $0x20] sm:$0x1]  ;;  %v3771_v50 = vrot.slane %v3769_v57, 5  ;;  %v6567_v57 = vld [vmem:[%s6836_s21 + $0x78] sm:$0xff]  }
  0xbf   : > { %5966 = vmatmul.mubr.msk.bf16.gmra.mrb[16].mxu1 %vm773_vm3, %v5243_v18  ;;  %6152 = vmatpush3.bf16.msra.mxu0 %v7142_v16  ;;  %v6557_v16 = vld [vmem:[%s6836_s21 + $0x3c] sm:$0xff]   ;;  %v3737_v48 = vshll.u32 %v5604_v15, 16 }
  0xc0   : > { %5969 = vmatprep.mubr.msk.bf16.mxu1 %vm773_vm3, %v5244_v22  ;;  %6123 = vmatprep.mubr.msk.bf16.mxu0 %vm773_vm3, %v6555_v32  ;;  %v5603_v18 = vld [vmem:[%s6836_s21 + $0x1c] sm:$0xf]  ;;  %v5273_v22 = vrot.slane %v1284_v6, 9  ;;  %v5605_v6 = vld [vmem:[%s6836_s21 + $0x24] sm:$0xf] }
  0xc1   : > { %6185 = vmatprep.subr.bf16.mxu0 %v7432_v46  ;;  %v3727_v7 = vshll.u32 %v5603_v18, 16  ;;  %v3731_v61 = vshrl.u32 %v5603_v18, 16  ;;  %v3745_v13 = vshll.u32 %v5605_v6, 16  ;;  %v3724_v18 = vor.u32 %v3723_v24, %v3720_v12 }
  0xc2   : > { %v7529_v47 = vsel %vm7077_vm6, %v5273_v22, %v1373_v54  ;;  %v5606_v54 = vld [vmem:[%s6836_s21 + $0x28] sm:$0xf]  ;;  %v3742_v22 = vshrl.u32 %v5605_v6, 16  ;;  %v1396_v24 = vrot.slane %v1394_v20, 4 }
  0xc3   : > { %v3747_v29 = vrot.slane %v3745_v13, 5  ;;  %v3768_v13 = vrot.slane %v3766_v37, 4  ;;  %v3725_v40 = vrot.slane %v3724_v18, 4 }
  0xc4   : > { %v3744_v15 = vrot.slane %v3742_v22, 4  ;;  %v5610_v22 = vld [vmem:[%s6836_s21 + $0x38] sm:$0x1] }
  0xc5   : > { %v3785_v37 = vshll.u32 %v5610_v22, 16 }
  0xc6   : > { %6124 = vmatmul.mubr.msk.bf16.gmra.mrb[4].mxu0 %vm773_vm3, %v6557_v16  ;;  %v1380_v16 = vrot.slane %v6613_v25, 5  ;;  %v1287_v25 = vld [vmem:[%s6836_s21 + $0x6c] sm:$0xe] }
  0xc7   : > { %5970 = vmatmul.mubr.msk.bf16.gmra.mrb[20].mxu1 %vm773_vm3, %v5245_v31  ;;  %6127 = vmatprep.mubr.msk.bf16.mxu0 %vm773_vm3, %v6559_v5  ;;  %v7550_v31 = vrot.slane %v3727_v7, 5  ;;  %v3733_v5 = vrot.slane %v3731_v61, 4  ;;  %v3751_v7 = vshll.u32 %v5606_v54, 16  ;;  %v3755_v61 = vshrl.u32 %v5606_v54, 16 }
  0xc8   : > { %5973 = vmatprep.mubr.msk.bf16.mxu1 %vm773_vm3, %v5246_v38  ;;  %v6563_v38 = vld [vmem:[%s6836_s21 + $0x60] sm:$0xff]   ;;  %v7564_v51 = vsel %vm7077_vm6, %v5274_v10, %v1380_v16  ;;  %v1382_v45 = vrot.slane %v1380_v16, 4  ;;  %v6617_v10 = vld [vmem:[%s6836_s21 + $0x68] sm:$0x1]  ;;  %v7571_v16 = vrot.slane %v3737_v48, 5  ;;  %v5276_v54 = vrot.slane %v1287_v25, 9 }
  0xc9   : > { %v3734_v6 = vor.u32 %v3733_v5, %v7550_v31  ;;  %v1390_v35 = vrot.slane %v6617_v10, 5  ;;  %v7574_v32 = vrot.slane %v3751_v7, 5  ;;  %v3757_v12 = vrot.slane %v3755_v61, 4  ;;  %v6618_v5 = vld [vmem:[%s6836_s21 + $0x74] sm:$0x1]  ;;  %v6565_v25 = vld [vmem:[%s6836_s21 + $0x6c] sm:$0xff]  }
  0xca   : > { %v1397_v55 = vrot.slane %v6618_v5, 5  ;;  %v7593_v48 = vsel %vm7077_vm6, %v5275_v23, %v1387_v59  ;;  %v3748_v7 = vor.u32 %v3747_v29, %v3744_v15  ;;  %v3761_v61 = vshll.u32 %v5607_v34, 16  ;;  %v6620_v10 = vld [vmem:[%s6836_s21 + $0x88] sm:$0xf] }
  0xcb   : > { %v3735_v42 = vrot.slane %v3734_v6, 4  ;;  %v7598_v33 = vsel %vm7077_vm6, %v1382_v45, %v1383_v9  ;;  %v7606_v23 = vsel %vm7077_vm6, %v1389_v36, %v1390_v35  ;;  %v7610_v29 = vsel %vm7077_vm6, %v5276_v54, %v1394_v20  ;;  %v1289_v45 = vld [vmem:[%s6836_s21 + $0x84] sm:$0xe]  ;;  %v5611_v20 = vld [vmem:[%s6836_s21 + $0x3c] sm:$0xf] }
  0xcc   : > { %v7614_v9 = vsel %vm7077_vm6, %v1396_v24, %v1397_v55  ;;  %v3772_v59 = vor.u32 %v3771_v50, %v3768_v13  ;;  %v3730_v6 = vsel %vm6855_vm2, %v3725_v40, %v7550_v31  ;;  %v1408_v15 = vrot.slane %v6620_v10, 5  ;;  %v6621_v24 = vld [vmem:[%s6836_s21 + $0x80] sm:$0x1] }
  0xcd   : > { %v3740_v35 = vsel %vm6855_vm2, %v3735_v42, %v7571_v16  ;;  %v3749_v54 = vrot.slane %v3748_v7, 4  ;;  %v3763_v34 = vrot.slane %v3761_v61, 5  ;;  %v1404_v5 = vrot.slane %v6621_v24, 5  ;;  %v7628_v55 = vld [vmem:[%s6836_s21 + $0x40] sm:$0xf] }
  0xce   : > { %6128 = vmatmul.mubr.msk.bf16.gmra.mrb[8].mxu0 %vm773_vm3, %v6561_v58  ;;  %v3781_v58 = vrot.slane %v3779_v56, 4  ;;  %v1288_v56 = vld [vmem:[%s6836_s21 + $0x78] sm:$0xe]  ;;  %8710 = vst [vmem:[#allocation8_spill] sm:$0xff] %v7628_v55  ;;  %v3787_v13 = vrot.slane %v3785_v37, 5  ;;  %v5278_v16 = vrot.slane %v1289_v45, 9  ;;  %v8711_v50 = vcombine.low %v7228_v62, %v7240_v4 }
  0xcf   : > { %5974 = vmatmul.mubr.msk.bf16.gmra.mrb[24].mxu1 %vm773_vm3, %v5247_v14  ;;  %6131 = vmatprep.mubr.msk.bf16.mxu0 %vm773_vm3, %v6563_v38  ;;  %v7587_v14 = vrot.slane %v3775_v41, 5  ;;  %v6619_v41 = vld [vmem:[%s6836_s21 + $0x7c] sm:$0xf]  ;;  %v3773_v40 = vrot.slane %v3772_v59, 4  ;;  %v6622_v42 = vld [vmem:[%s6836_s21 + $0x8c] sm:$0x1]  ;;  %v3754_v45 = vsel %vm6855_vm2, %v3749_v54, %v7574_v32 }
  0xd0   : > { %5977 = vmatprep.mubr.msk.bf16.mxu1 %vm773_vm3, %v5248_v60  ;;  %v3758_v60 = vor.u32 %v3757_v12, %v7574_v32  ;;  %v1401_v18 = vrot.slane %v6619_v41, 5  ;;  %v5277_v12 = vrot.slane %v1288_v56, 9  ;;  %v3790_v7 = vshrl.u32 %v5611_v20, 16  ;;  %v6568_v41 = vld [vmem:[%s6836_s21 + $0x84] sm:$0xff]   ;;  %v6569_v59 = vld [vmem:[%s6836_s21 + $0x90] sm:$0xff]  }
  0xd1   : > { %v3782_v36 = vor.u32 %v3781_v58, %v7587_v14  ;;  %v1411_v58 = vrot.slane %v6622_v42, 5  ;;  %v3793_v61 = vshll.u32 %v5611_v20, 16  ;;  %v1410_v56 = vrot.slane %v1408_v15, 4  ;;  %v7668_v20 = vld [vmem:[%s6836_s21 + $0x4c] sm:$0xf] }
  0xd2   : > { %v3759_v31 = vrot.slane %v3758_v60, 4  ;;  %v1403_v22 = vrot.slane %v1401_v18, 4  ;;  %v3799_v62 = vshll.u32 %v7628_v55, 16  ;;  %v3803_v4 = vshrl.u32 %v7628_v55, 16  ;;  %v7746_v37 = vld [vmem:[%s6836_s21 + $0x5c] sm:$0x1] }
  0xd3   : > { %v3783_v60 = vrot.slane %v3782_v36, 4  ;;  %v7660_v10 = vsel %vm7077_vm6, %v5277_v12, %v1401_v18  ;;  %v3778_v24 = vsel %vm6855_vm2, %v3773_v40, %v7587_v14  ;;  %v7675_v32 = vsel %vm7077_vm6, %v5278_v16, %v1408_v15  ;;  %v7679_v18 = vld [vmem:[%s6836_s21 + $0x58] sm:$0xf]  ;;  %v7693_v40 = vld [vmem:[%s6836_s21 + $0x90] sm:$0xe] }
  0xd4   : > { %v3764_v36 = vsel %vm6855_vm2, %v3759_v31, %v3763_v34  ;;  %v3792_v54 = vrot.slane %v3790_v7, 4  ;;  %v3795_v34 = vrot.slane %v3793_v61, 5  ;;  %v5617_v31 = vld [vmem:[%s6836_s21 + $0x54] sm:$0xf]  ;;  %v3805_v14 = vrot.slane %v3803_v4, 4 }
  0xd5   : > { %v3788_v12 = vsel %vm6855_vm2, %v3783_v60, %v3787_v13  ;;  %v3823_v42 = vshll.u32 %v7668_v20, 16  ;;  %v3827_v7 = vshrl.u32 %v7668_v20, 16  ;;  %v3838_v13 = vshrl.u32 %v5617_v31, 16  ;;  %v1291_v38 = vld [vmem:[%s6836_s21 + $0x9c] sm:$0xe] }
  0xd6   : > { %6132 = vmatmul.mubr.msk.bf16.gmra.mrb[12].mxu0 %vm773_vm3, %v6565_v25  ;;  %v8712_v25 = vcombine.low %v7445_v52, %v7473_v21  ;;  %v7648_v52 = vcombine.low %v3730_v6, %v3740_v35  ;;  %v7664_v6 = vsel %vm7077_vm6, %v1403_v22, %v1404_v5  ;;  %v5614_v35 = vld [vmem:[%s6836_s21 + $0x48] sm:$0xf]  ;;  %v7685_v5 = vsel %vm7077_vm6, %v1410_v56, %v1411_v58  ;;  %v7688_v22 = vld [vmem:[%s6836_s21 + $0x44] sm:$0x1] }
  0xd7   : > { %5978 = vmatmul.mubr.msk.bf16.gmra.mrb[28].mxu1 %vm773_vm3, %v8711_v50  ;;  %6135 = vmatprep.mubr.msk.bf16.mxu0 %vm773_vm3, %v6567_v57  ;;  %8713 = vst [vmem:[#allocation9_spill] sm:$0xff] %v7688_v22  ;;  %v7690_v50 = vrot.slane %v3799_v62, 5  ;;  %v3814_v15 = vshrl.u32 %v5614_v35, 16  ;;  %v3817_v16 = vshll.u32 %v5614_v35, 16  ;;  %v3841_v61 = vshll.u32 %v5617_v31, 16 }
  0xd8   : > { %5983 = vmatprep.mubr.msk.bf16.mxu1 %vm773_vm3, %v8712_v25  ;;  %v3847_v58 = vshll.u32 %v7679_v18, 16  ;;  %v3851_v25 = vshrl.u32 %v7679_v18, 16  ;;  %v8714_v60 = vcombine.low %v7455_v53, %v7459_v63  ;;  %v7705_v56 = vcombine.low %v3754_v45, %v3764_v36  ;;  %v7722_v35 = vld [vmem:[%s6836_s21 + $0x50] sm:$0x1]  ;;  %v6625_v62 = vld [vmem:[%s6836_s21 + $0x98] sm:$0x1] }
  0xd9   : > { %v7709_v4 = vcombine.low %v3778_v24, %v3788_v12  ;;  %v8715_v53 = vcombine.low %v7463_v0, %v7477_v8  ;;  %v3806_v45 = vor.u32 %v3805_v14, %v7690_v50  ;;  %v5620_v24 = vld [vmem:[%s6836_s21 + $0x60] sm:$0xf]  ;;  %v3816_v31 = vrot.slane %v3814_v15, 4  ;;  %v7728_v8 = vld [vmem:[%s6836_s21 + $0x64] sm:$0xf]  ;;  %v6571_v14 = vld [vmem:[%s6836_s21 + $0xa8] sm:$0xff]  }
  0xda   : > { %v7725_v12 = vrot.slane %v3823_v42, 5  ;;  %v3829_v0 = vrot.slane %v3827_v7, 4  ;;  %v3843_v15 = vrot.slane %v3841_v61, 5  ;;  %v6624_v7 = vld [vmem:[%s6836_s21 + $0x94] sm:$0xf]  ;;  %v1418_v21 = vrot.slane %v6625_v62, 5 }
  0xdb   : > { %v1415_v63 = vrot.slane %v6624_v7, 5  ;;  %v3833_v57 = vshll.u32 %v7722_v35, 16  ;;  %v3862_v36 = vshrl.u32 %v5620_v24, 16  ;;  %v3875_v61 = vshrl.u32 %v7728_v8, 16  ;;  %v6626_v7 = vld [vmem:[%s6836_s21 + $0xa0] sm:$0xf] }
  0xdc   : > { %v1422_v55 = vrot.slane %v6626_v7, 5  ;;  %v3807_v62 = vrot.slane %v3806_v45, 4  ;;  %v1429_v45 = vrot.slane %v7218_v30, 5  ;;  %v7773_v7 = vld [vmem:[%s6836_s21 + $0x68] sm:$0x1]  ;;  %v6572_v30 = vld [vmem:[%s6836_s21 + $0xb4] sm:$0xff]  }
  0xdd   : > { %v3864_v19 = vrot.slane %v3862_v36, 4  ;;  %8719 = vst [vmem:[#allocation11_spill] sm:$0xff] %v7773_v7  ;;  %v6573_v36 = vld [vmem:[%s6836_s21 + $0xc0] sm:$0xff]  }
  0xde   : > { %6136 = vmatmul.mubr.msk.bf16.gmra.mrb[16].mxu0 %vm773_vm3, %v6568_v41  ;;  %v3809_v41 = vshll.u32 %v7688_v22, 16  ;;  %v3865_v22 = vshll.u32 %v5620_v24, 16  ;;  %v3857_v24 = vshll.u32 %v7746_v37, 16 }
  0xdf   : > { %5984 = vmatmul.mubr.msk.bf16.vlgmr.msra.gmra.mrb[0].mxu1 %vm773_vm3, %v8714_v60  ;;  %6139 = vmatprep.mubr.msk.bf16.mxu0 %vm773_vm3, %v6569_v59  ;;  %v3796_v59 = vor.u32 %v3795_v34, %v3792_v54  ;;  %v7733_v54 = vld [vmem:[%s8685_s1 + $0x20] sm:$0xff]   ;;  %v3840_v60 = vrot.slane %v3838_v13, 4  ;;  %v3871_v13 = vshll.u32 %v7728_v8, 16 }
  0xe0   : > { %6016 = vmatpush3.bf16.msra.mxu1 %v7331_v39  ;;  %5987 = vmatprep.mubr.msk.bf16.mxu1 %vm773_vm3, %v8715_v53  ;;  %v3819_v39 = vrot.slane %v3817_v16, 5  ;;  %8716 = vst [vmem:[#allocation10_spill] sm:$0xff] %v7733_v54  ;;  %v6570_v34 = vld [vmem:[%s6836_s21 + $0x9c] sm:$0xff]   ;;  %v7738_v53 = vrot.slane %v3847_v58, 5  ;;  %v3853_v16 = vrot.slane %v3851_v25, 4  ;;  %v7740_v42 = vrot.slane %v3809_v41, 5 }
  0xe1   : > { %6219 = vmatprep.subr.bf16.mxu1 %v7733_v54  ;;  %v7751_v58 = vrot.slane %v3796_v59, 4  ;;  %v3830_v41 = vor.u32 %v3829_v0, %v7725_v12  ;;  %v3844_v54 = vor.u32 %v3843_v15, %v3840_v60  ;;  %v1417_v59 = vrot.slane %v1415_v63, 4  ;;  %v1292_v0 = vld [vmem:[%s6836_s21 + $0xa8] sm:$0xe] }
  0xe2   : > { %v3820_v25 = vor.u32 %v3819_v39, %v3816_v31  ;;  %v3854_v1 = vor.u32 %v3853_v16, %v7738_v53  ;;  %v3835_v31 = vrot.slane %v3833_v57, 5  ;;  %v5280_v39 = vrot.slane %v1291_v38, 9  ;;  %v6627_v57 = vld [vmem:[%s6836_s21 + $0xa4] sm:$0x1] }
  0xe3   : > { %v3867_v26 = vrot.slane %v3865_v22, 5  ;;  %v7769_v60 = vrot.slane %v3871_v13, 5  ;;  %v3831_v15 = vrot.slane %v3830_v41, 4  ;;  %v1424_v16 = vrot.slane %v1422_v55, 4  ;;  %v6628_v41 = vld [vmem:[%s6836_s21 + $0xb0] sm:$0x1] }
  0xe4   : > { %v1425_v38 = vrot.slane %v6627_v57, 5  ;;  %v5281_v49 = vrot.slane %v1292_v0, 9  ;;  %v3802_v22 = vsel %vm6855_vm2, %v7751_v58, %v7690_v50  ;;  %v8720_v13 = vrot.slane %v7693_v40, 9  ;;  %v1293_v50 = vld [vmem:[%s6836_s21 + $0xb4] sm:$0xe] }
  0xe5   : > { %v1432_v57 = vrot.slane %v6628_v41, 5  ;;  %v3881_v0 = vshll.u32 %v7773_v7, 16  ;;  %v5623_v58 = vld [vmem:[%s6836_s21 + $0x6c] sm:$0xf]  ;;  %v7797_v40 = vsel %vm7077_vm6, %v1417_v59, %v1418_v21  ;;  %v8722_v59 = vcombine.low %v7521_v43, %v7525_v44 }
  0xe6   : > { %6140 = vmatmul.mubr.msk.bf16.gmra.mrb[20].mxu0 %vm773_vm3, %v6570_v34  ;;  %v8718_v34 = vcombine.low %v7487_v17, %v7500_v27  ;;  %v3845_v17 = vrot.slane %v3844_v54, 4  ;;  %v3855_v27 = vrot.slane %v3854_v1, 4  ;;  %v3812_v1 = vsel %vm6855_vm2, %v3807_v62, %v7740_v42 }
  0xe7   : > { %5988 = vmatmul.mubr.msk.bf16.gmra.mrb[4].mxu1 %vm773_vm3, %v8717_v11  ;;  %6143 = vmatprep.mubr.msk.bf16.mxu0 %vm773_vm3, %v6571_v14  ;;  %v3877_v11 = vrot.slane %v3875_v61, 4  ;;  %v3821_v14 = vrot.slane %v3820_v25, 4  ;;  %v7785_v61 = vsel %vm7077_vm6, %v8720_v13, %v1415_v63  ;;  %v1431_v25 = vrot.slane %v1429_v45, 4 }
  0xe8   : > { %5991 = vmatprep.mubr.msk.bf16.mxu1 %vm773_vm3, %v8718_v34  ;;  %v3859_v34 = vrot.slane %v3857_v24, 5  ;;  %v3868_v54 = vor.u32 %v3867_v26, %v3864_v19  ;;  %v7804_v42 = vsel %vm7077_vm6, %v5280_v39, %v1422_v55  ;;  %v7808_v62 = vsel %vm7077_vm6, %v1424_v16, %v1425_v38  ;;  %v6629_v39 = vld [vmem:[%s6836_s21 + $0xb8] sm:$0xf] }
  0xe9   : > { %v3878_v24 = vor.u32 %v3877_v11, %v7769_v60  ;;  %v3826_v63 = vsel %vm6855_vm2, %v3821_v14, %v7725_v12  ;;  %v3836_v19 = vsel %vm6855_vm2, %v3831_v15, %v3835_v31  ;;  %v3850_v21 = vsel %vm6855_vm2, %v3845_v17, %v7738_v53  ;;  %v7857_v17 = vld [vmem:[%s6836_s21 + $0x7c] sm:$0xf] }
  0xea   : > { %v3860_v12 = vsel %vm6855_vm2, %v3855_v27, %v3859_v34  ;;  %v7820_v55 = vsel %vm7077_vm6, %v5281_v49, %v1429_v45  ;;  %v7829_v31 = vsel %vm7077_vm6, %v1431_v25, %v1432_v57  ;;  %v5282_v53 = vrot.slane %v1293_v50, 9  ;;  %v7833_v49 = vld [vmem:[%s6836_s21 + $0x70] sm:$0xf]  ;;  %8726 = vst [vmem:[#allocation15_spill] sm:$0xff] %v7857_v17  ;;  %v5629_v27 = vld [vmem:[%s6836_s21 + $0x84] sm:$0xf] }
  0xeb   : > { %8721 = vst [vmem:[#allocation12_spill] sm:$0xff] %v7820_v55  ;;  %8723 = vst [vmem:[#allocation13_spill] sm:$0xff] %v7829_v31  ;;  %v1436_v26 = vrot.slane %v6629_v39, 5  ;;  %v3886_v45 = vshrl.u32 %v5623_v58, 16  ;;  %v8725_v43 = vcombine.low %v7529_v47, %v7557_v3  ;;  %v7839_v44 = vcombine.low %v3802_v22, %v3812_v1  ;;  %v5626_v3 = vld [vmem:[%s6836_s21 + $0x78] sm:$0xf] }
  0xec   : > { %8724 = vst [vmem:[#allocation14_spill] sm:$0xff] %v7833_v49  ;;  %v7841_v11 = vrot.slane %v3868_v54, 4  ;;  %v7843_v14 = vrot.slane %v3878_v24, 4  ;;  %v7845_v15 = vrot.slane %v3881_v0, 5  ;;  %v7849_v38 = vcombine.low %v3826_v63, %v3836_v19  ;;  %v6574_v34 = vld [vmem:[%s6836_s21 + $0xcc] sm:$0xff]  }
  0xed   : > { %v7853_v47 = vcombine.low %v3850_v21, %v3860_v12  ;;  %v7864_v22 = vld [vmem:[%s6836_s21 + $0xbc] sm:$0x1]  ;;  %v3889_v25 = vshll.u32 %v5623_v58, 16  ;;  %v3895_v41 = vshll.u32 %v7833_v49, 16  ;;  %v7869_v57 = vld [vmem:[%s6836_s21 + $0x88] sm:$0xf]  ;;  %v7873_v1 = vsel %vm7077_vm6, %v5282_v53, %v1436_v26 }
  0xee   : > { %6144 = vmatmul.mubr.msk.bf16.gmra.mrb[24].mxu0 %vm773_vm3, %v6572_v30  ;;  %8727 = vst [vmem:[#allocation16_spill] sm:$0xff] %v7869_v57  ;;  %v7875_v54 = vrot.slane %v1436_v26, 4  ;;  %v7877_v24 = vrot.slane %v3886_v45, 4  ;;  %v3899_v0 = vshrl.u32 %v7833_v49, 16  ;;  %v5632_v50 = vld [vmem:[%s6836_s21 + $0x90] sm:$0xf]  ;;  %v8730_v58 = vcombine.low %v7564_v51, %v7598_v33 }
  0xef   : > { %5992 = vmatmul.mubr.msk.bf16.gmra.mrb[8].mxu1 %vm773_vm3, %v8722_v59  ;;  %6147 = vmatprep.mubr.msk.bf16.mxu0 %vm773_vm3, %v6573_v36  ;;  %v3910_v19 = vshrl.u32 %v5626_v3, 16  ;;  %v3913_v21 = vshll.u32 %v5626_v3, 16  ;;  %v7890_v12 = vld [vmem:[%s6836_s21 + $0x94] sm:$0xf]  ;;  %v3919_v53 = vshll.u32 %v7857_v17, 16  ;;  %v3923_v39 = vshrl.u32 %v7857_v17, 16 }
  0xf0   : > { %5995 = vmatprep.mubr.msk.bf16.mxu1 %vm773_vm3, %v8725_v43  ;;  %8728 = vst [vmem:[#allocation17_spill] sm:$0xff] %v7890_v12  ;;  %v7893_v59 = vld [vmem:[%s6836_s21 + $0x74] sm:$0x1]  ;;  %v3934_v26 = vshrl.u32 %v5629_v27, 16  ;;  %v3937_v45 = vshll.u32 %v5629_v27, 16  ;;  %v3943_v43 = vshll.u32 %v7869_v57, 16 }
  0xf1   : > { %8729 = vst [vmem:[#allocation18_spill] sm:$0xff] %v7893_v59  ;;  %v3947_v36 = vshrl.u32 %v7869_v57, 16  ;;  %v3958_v30 = vshrl.u32 %v5632_v50, 16  ;;  %v3961_v3 = vshll.u32 %v5632_v50, 16  ;;  %v3891_v63 = vrot.slane %v3889_v25, 5 }
  0xf2   : > { %v7906_v27 = vrot.slane %v3895_v41, 5  ;;  %v3967_v16 = vshll.u32 %v7890_v12, 16  ;;  %v3971_v13 = vshrl.u32 %v7890_v12, 16  ;;  %v8731_v50 = vcombine.low %v7593_v48, %v7606_v23  ;;  %v5635_v41 = vld [vmem:[%s6836_s21 + $0x9c] sm:$0xf] }
  0xf3   : > { %v3901_v51 = vrot.slane %v3899_v0, 4  ;;  %v3905_v33 = vshll.u32 %v7893_v59, 16  ;;  %v3915_v25 = vrot.slane %v3913_v21, 5  ;;  %v3925_v57 = vrot.slane %v3923_v39, 4  ;;  %v7922_v17 = vld [vmem:[%s6836_s21 + $0x8c] sm:$0x1] }
  0xf4   : > { %v3936_v49 = vrot.slane %v3934_v26, 4  ;;  %v3939_v12 = vrot.slane %v3937_v45, 5  ;;  %v7924_v31 = vrot.slane %v3943_v43, 5  ;;  %v3949_v48 = vrot.slane %v3947_v36, 4  ;;  %v7930_v0 = vld [vmem:[%s6836_s21 + $0x98] sm:$0x1] }
  0xf5   : > { %v3960_v23 = vrot.slane %v3958_v30, 4  ;;  %v3963_v55 = vrot.slane %v3961_v3, 5  ;;  %v7932_v59 = vrot.slane %v3967_v16, 5  ;;  %v3982_v21 = vshrl.u32 %v5635_v41, 16 }
  0xf6   : > { %6148 = vmatmul.mubr.msk.bf16.gmra.mrb[28].mxu0 %vm773_vm3, %v6574_v34  ;;  %v7909_v34 = vld [vmem:[%s6836_s21 + $0x80] sm:$0x1]  ;;  %v3892_v39 = vor.u32 %v3891_v63, %v7877_v24  ;;  %v3902_v7 = vor.u32 %v3901_v51, %v7906_v27  ;;  %v3940_v30 = vor.u32 %v3939_v12, %v3936_v49  ;;  %v3950_v16 = vor.u32 %v3949_v48, %v7924_v31 }
  0xf7   : > { %5996 = vmatmul.mubr.msk.bf16.gmra.mrb[12].mxu1 %vm773_vm3, %v8730_v58  ;;  %6153 = vmatprep.mubr.msk.bf16.mxu0 %vm773_vm3, %v7648_v52  ;;  %v3912_v52 = vrot.slane %v3910_v19, 4  ;;  %v7919_v58 = vrot.slane %v3919_v53, 5  ;;  %v3973_v19 = vrot.slane %v3971_v13, 4  ;;  %v3985_v53 = vshll.u32 %v5635_v41, 16 }
  0xf8   : > { %5999 = vmatprep.mubr.msk.bf16.mxu1 %vm773_vm3, %v8731_v50  ;;  %v7927_v50 = vld [vmem:[%s6836_s21 + $0xa0] sm:$0xf]  ;;  %v3929_v45 = vshll.u32 %v7909_v34, 16  ;;  %v3953_v13 = vshll.u32 %v7922_v17, 16  ;;  %v3964_v24 = vor.u32 %v3963_v55, %v3960_v23  ;;  %v3977_v63 = vshll.u32 %v7930_v0, 16 }
  0xf9   : > { %v3916_v26 = vor.u32 %v3915_v25, %v3912_v52  ;;  %v3926_v36 = vor.u32 %v3925_v57, %v7919_v58  ;;  %v3991_v43 = vshll.u32 %v7927_v50, 16  ;;  %v3995_v3 = vshrl.u32 %v7927_v50, 16 }
  0xfa   : > { %v8732_v51 = vcombine.low %v7610_v29, %v7614_v9  ;;  %v3907_v49 = vrot.slane %v3905_v33, 5  ;;  %v3974_v57 = vor.u32 %v3973_v19, %v7932_v59  ;;  %v3984_v12 = vrot.slane %v3982_v21, 4 }
  0xfb   : > { %v8733_v52 = vcombine.low %v7660_v10, %v7664_v6  ;;  %v3893_v55 = vrot.slane %v3892_v39, 4  ;;  %v3903_v29 = vrot.slane %v3902_v7, 4  ;;  %v3917_v9 = vrot.slane %v3916_v26, 4 }
  0xfc   : > { %v3931_v25 = vrot.slane %v3929_v45, 5  ;;  %v3927_v33 = vrot.slane %v3926_v36, 4  ;;  %v3941_v41 = vrot.slane %v3940_v30, 4  ;;  %v7958_v48 = vrot.slane %v3991_v43, 5 }
  0xfd   : > { %v3997_v23 = vrot.slane %v3995_v3, 4  ;;  %v3951_v19 = vrot.slane %v3950_v16, 4  ;;  %v3955_v21 = vrot.slane %v3953_v13, 5  ;;  %v3965_v10 = vrot.slane %v3964_v24, 4 }
  0xfe   : > { %6154 = vmatmul.mubr.msk.bf16.vlgmr.msra.gmra.mrb[0].mxu0 %vm773_vm3, %v7705_v56  ;;  %v3987_v56 = vrot.slane %v3985_v53, 5  ;;  %v3979_v6 = vrot.slane %v3977_v63, 5  ;;  %v7961_v53 = vld [vmem:[%s6836_s21 + $0xa4] sm:$0x1]  ;;  %v8734_v26 = vrot.slane %v7864_v22, 5  ;;  %v3898_v36 = vsel %vm6855_vm2, %v3893_v55, %v7906_v27 }
  0xff   : > { %6000 = vmatmul.mubr.msk.bf16.gmra.mrb[16].mxu1 %vm773_vm3, %v8732_v51  ;;  %6186 = vmatpush3.bf16.msra.mxu0 %v7432_v46  ;;  %v5638_v46 = vld [vmem:[%s6836_s21 + $0xa8] sm:$0xf]  ;;  %v3975_v51 = vrot.slane %v3974_v57, 4  ;;  %v3908_v30 = vsel %vm6855_vm2, %v3903_v29, %v3907_v49  ;;  %v3922_v43 = vsel %vm6855_vm2, %v3917_v9, %v7919_v58  ;;  %v3932_v22 = vsel %vm6855_vm2, %v3927_v33, %v3931_v25 }
 0x100   : > { %6003 = vmatprep.mubr.msk.bf16.mxu1 %vm773_vm3, %v8733_v52  ;;  %6157 = vmatprep.mubr.msk.bf16.mxu0 %vm773_vm3, %v7709_v4  ;;  %v3988_v52 = vor.u32 %v3987_v56, %v3984_v12  ;;  %v7964_v4 = vld [vmem:[%s6836_s21 + $0xac] sm:$0xf]  ;;  %v4006_v7 = vshrl.u32 %v5638_v46, 16  ;;  %v4009_v39 = vshll.u32 %v5638_v46, 16  ;;  %v7971_v45 = vsel %vm7077_vm6, %v7875_v54, %v8734_v26 }
 0x101   : > { %v3946_v54 = vsel %vm6855_vm2, %v3941_v41, %v7924_v31  ;;  %v3998_v3 = vor.u32 %v3997_v23, %v7958_v48  ;;  %v4001_v16 = vshll.u32 %v7961_v53, 16  ;;  %v3956_v27 = vsel %vm6855_vm2, %v3951_v19, %v3955_v21  ;;  %v5689_v31 = vld [vmem:[%s6836_s21 + $0x48] sm:$0xe]  ;;  %v5692_v26 = vld [vmem:[%s6836_s21 + $0x6c] sm:$0xe] }
 0x102   : > { %v3970_v58 = vsel %vm6855_vm2, %v3965_v10, %v7932_v59  ;;  %v4015_v13 = vshll.u32 %v7964_v4, 16  ;;  %v4019_v24 = vshrl.u32 %v7964_v4, 16  ;;  %v8735_v63 = vcombine.low %v7675_v32, %v7685_v5  ;;  %v8007_v59 = vld [vmem:[%s6836_s21 + $0xb0] sm:$0x1] }
 0x103   : > { %v3989_v49 = vrot.slane %v3988_v52, 4  ;;  %v4008_v57 = vrot.slane %v4006_v7, 4  ;;  %v4011_v12 = vrot.slane %v4009_v39, 5  ;;  %v8736_v56 = vcombine.low %v7785_v61, %v7797_v40  ;;  %v5641_v40 = vld [vmem:[%s6836_s21 + $0xb4] sm:$0xf] }
 0x104   : > { %v8737_v32 = vsel %vm6855_vm2, %v7843_v14, %v7845_v15  ;;  %v8738_v5 = vsel %vm6855_vm2, %v7841_v11, %v7769_v60  ;;  %v5300_v55 = vcombine.low %v7873_v1, %v7971_v45  ;;  %v8025_v29 = vcombine.low %v3898_v36, %v3908_v30  ;;  %v5690_v15 = vld [vmem:[%s6836_s21 + $0x54] sm:$0xe] }
 0x105   : > { %v8027_v61 = vcombine.low %v3922_v43, %v3932_v22  ;;  %v8030_v9 = vcombine.low %v3946_v54, %v3956_v27  ;;  %v3999_v25 = vrot.slane %v3998_v3, 4  ;;  %v4003_v46 = vrot.slane %v4001_v16, 5  ;;  %v8740_v16 = vld [vmem:[#allocation11_spill] sm:$0xff] }
 0x106   : > { %6158 = vmatmul.mubr.msk.bf16.gmra.mrb[4].mxu0 %vm773_vm3, %v7839_v44  ;;  %v3980_v44 = vsel %vm6855_vm2, %v3975_v51, %v3979_v6  ;;  %v5705_v14 = vrot.slane %v5689_v31, 9  ;;  %v8035_v60 = vrot.slane %v4015_v13, 5  ;;  %v4021_v11 = vrot.slane %v4019_v24, 4  ;;  %v5691_v6 = vld [vmem:[%s6836_s21 + $0x60] sm:$0xe]  ;;  %v8741_v13 = vld [vmem:[#allocation12_spill] sm:$0xff] }
 0x107   : > { %6004 = vmatmul.mubr.msk.bf16.gmra.mrb[20].mxu1 %vm773_vm3, %v8735_v63  ;;  %6161 = vmatprep.mubr.msk.bf16.mxu0 %vm773_vm3, %v7849_v38  ;;  %v5658_v38 = vcombine.low %v8738_v5, %v8737_v32  ;;  %v8033_v33 = vcombine.low %v3970_v58, %v3980_v44  ;;  %v4025_v41 = vshll.u32 %v8007_v59, 16  ;;  %v3994_v23 = vsel %vm6855_vm2, %v3989_v49, %v7958_v48  ;;  %v8742_v24 = vld [vmem:[#allocation13_spill] sm:$0xff]  ;;  %v8744_v63 = vld [vmem:[#allocation14_spill] sm:$0xff] }
 0x108   : > { %6007 = vmatprep.mubr.msk.bf16.mxu1 %vm773_vm3, %v8736_v56  ;;  %v4012_v19 = vor.u32 %v4011_v12, %v4008_v57  ;;  %v4493_v21 = vrot.slane %v7668_v20, 5  ;;  %v4496_v10 = vrot.slane %v7722_v35, 5  ;;  %v4030_v51 = vshrl.u32 %v5641_v40, 16  ;;  %v8057_v35 = vld [vmem:[%s6836_s21 + $0xb8] sm:$0xf] }
 0x109   : > { %v5706_v52 = vrot.slane %v5690_v15, 9  ;;  %v4500_v7 = vrot.slane %v7679_v18, 5  ;;  %v4503_v39 = vrot.slane %v7746_v37, 5  ;;  %v4004_v36 = vsel %vm6855_vm2, %v3999_v25, %v4003_v46  ;;  %v8745_v49 = vld [vmem:[#allocation18_spill] sm:$0xff]  ;;  %v5644_v12 = vld [vmem:[%s6836_s21 + $0xc0] sm:$0xf] }
 0x10a   : > { %v4033_v30 = vshll.u32 %v5641_v40, 16  ;;  %v8051_v48 = vsel %vm7077_vm6, %v5705_v14, %v4493_v21  ;;  %v4495_v43 = vrot.slane %v4493_v21, 4  ;;  %v4022_v20 = vor.u32 %v4021_v11, %v8035_v60  ;;  %v5693_v14 = vld [vmem:[%s6836_s21 + $0x78] sm:$0xe] }
 0x10b   : > { %v8061_v37 = vsel %vm7077_vm6, %v5706_v52, %v4500_v7  ;;  %v4502_v18 = vrot.slane %v4500_v7, 4  ;;  %v5707_v22 = vrot.slane %v5691_v6, 9  ;;  %v8739_v54 = vcombine.low %v7804_v42, %v7808_v62  ;;  %v6576_v6 = vld [vmem:[%s6836_s21 + $0xc] sm:$0xff]  }
 0x10c   : > { %v4507_v3 = vrot.slane %v7728_v8, 5  ;;  %v4510_v27 = vrot.slane %v8740_v16, 5  ;;  %v5708_v58 = vrot.slane %v5692_v26, 9  ;;  %v8743_v31 = vcombine.low %v8741_v13, %v8742_v24  ;;  %v8747_v13 = vld [vmem:[#allocation6_spill] sm:$0xff]  ;;  %v8748_v24 = vld [vmem:[#allocation7_spill] sm:$0xff] }
 0x10d   : > { %v8082_v62 = vsel %vm7077_vm6, %v4502_v18, %v4503_v39  ;;  %v4514_v44 = vrot.slane %v8744_v63, 5  ;;  %v4517_v8 = vrot.slane %v8745_v49, 5  ;;  %v4039_v57 = vshll.u32 %v8057_v35, 16  ;;  %v8119_v39 = vld [vmem:[%s6836_s21 + $0xc4] sm:$0xf]  ;;  %v8749_v49 = vld [vmem:[#allocation16_spill] sm:$0xff] }
 0x10e   : > { %6162 = vmatmul.mubr.msk.bf16.gmra.mrb[8].mxu0 %vm773_vm3, %v7853_v47  ;;  %v8070_v47 = vsel %vm7077_vm6, %v4495_v43, %v4496_v10  ;;  %v5724_v56 = vcombine.low %v8061_v37, %v8082_v62  ;;  %v8092_v32 = vsel %vm7077_vm6, %v5707_v22, %v4507_v3  ;;  %v4509_v5 = vrot.slane %v4507_v3, 4  ;;  %v5412_v10 = vld [vmem:[%s6836_s21 + $0x78] sm:$0xf]  ;;  %v8746_v22 = vld [vmem:[#allocation15_spill] sm:$0xff] }
 0x10f   : > { %6008 = vmatmul.mubr.msk.bf16.gmra.mrb[24].mxu1 %vm773_vm3, %v8739_v54  ;;  %6165 = vmatprep.mubr.msk.bf16.mxu0 %vm773_vm3, %v5658_v38  ;;  %v5723_v42 = vcombine.low %v8051_v48, %v8070_v47  ;;  %v8094_v38 = vrot.slane %v4025_v41, 5  ;;  %v4043_v40 = vshrl.u32 %v8057_v35, 16  ;;  %v8099_v25 = vsel %vm7077_vm6, %v5708_v58, %v4514_v44  ;;  %v6641_v62 = vld [vmem:[%s6836_s21 + $0xa0] sm:$0xf] }
 0x110   : > { %6011 = vmatprep.mubr.msk.bf16.mxu1 %vm773_vm3, %v8743_v31  ;;  %v4516_v46 = vrot.slane %v4514_v44, 4  ;;  %v8102_v15 = vcombine.low %v3994_v23, %v4004_v36  ;;  %v8104_v11 = vrot.slane %v4012_v19, 4  ;;  %v8106_v21 = vrot.slane %v4030_v51, 4 }
 0x111   : > { %v8110_v41 = vsel %vm7077_vm6, %v4509_v5, %v4510_v27  ;;  %v8114_v52 = vrot.slane %v4022_v20, 4  ;;  %v8116_v7 = vrot.slane %v4033_v30, 5  ;;  %v8127_v51 = vrot.slane %v4039_v57, 5  ;;  %v5694_v20 = vld [vmem:[%s6836_s21 + $0x84] sm:$0xe] }
 0x112   : > { %v5725_v23 = vcombine.low %v8092_v32, %v8110_v41  ;;  %v8125_v19 = vsel %vm7077_vm6, %v4516_v46, %v4517_v8  ;;  %v4054_v26 = vshrl.u32 %v5644_v12, 16  ;;  %v5709_v43 = vrot.slane %v5693_v14, 9  ;;  %v8135_v30 = vld [vmem:[%s6836_s21 + $0xbc] sm:$0x1]  ;;  %v5647_v5 = vld [vmem:[%s6836_s21 + $0xcc] sm:$0xf] }
 0x113   : > { %v5726_v36 = vcombine.low %v8099_v25, %v8125_v19  ;;  %v4057_v18 = vshll.u32 %v5644_v12, 16  ;;  %v4521_v54 = vrot.slane %v8746_v22, 5  ;;  %v4524_v3 = vrot.slane %v7909_v34, 5  ;;  %v6577_v14 = vld [vmem:[%s6836_s21 + $0x18] sm:$0xff]   ;;  %v5695_v22 = vld [vmem:[%s6836_s21 + $0x90] sm:$0xe] }
 0x114   : > { %v2367_v16 = vshrl.u32 %v5412_v10, 16  ;;  %v4063_v27 = vshll.u32 %v8119_v39, 16  ;;  %v2370_v58 = vshll.u32 %v5412_v10, 16  ;;  %v2389_v34 = vsel %vm6855_vm2, %v8748_v24, %v8747_v13  ;;  %v8750_v24 = vld [vmem:[#allocation17_spill] sm:$0xff]  ;;  %v6645_v19 = vld [vmem:[%s6836_s21 + $0xac] sm:$0xf] }
 0x115   : > { %v8154_v1 = vsel %vm7077_vm6, %v5709_v43, %v4521_v54  ;;  %v4523_v45 = vrot.slane %v4521_v54, 4  ;;  %v4045_v31 = vrot.slane %v4043_v40, 4  ;;  %v4049_v63 = vshll.u32 %v8135_v30, 16 }
 0x116   : > { %6166 = vmatmul.mubr.msk.bf16.gmra.mrb[12].mxu0 %vm773_vm3, %v8025_v29  ;;  %v4067_v29 = vshrl.u32 %v8119_v39, 16  ;;  %v2372_v44 = vrot.slane %v2370_v58, 5  ;;  %v4528_v8 = vrot.slane %v8749_v49, 5  ;;  %v4018_v57 = vsel %vm6855_vm2, %v8104_v11, %v8035_v60  ;;  %v6578_v60 = vld [vmem:[%s6836_s21 + $0x24] sm:$0xff]  }
 0x117   : > { %6012 = vmatmul.mubr.msk.bf16.gmra.mrb[28].mxu1 %vm773_vm3, %v5300_v55  ;;  %6169 = vmatprep.mubr.msk.bf16.mxu0 %vm773_vm3, %v8027_v61  ;;  %v2369_v55 = vrot.slane %v2367_v16, 4  ;;  %v5710_v61 = vrot.slane %v5694_v20, 9  ;;  %v4036_v12 = vor.u32 %v8116_v7, %v8106_v21  ;;  %v8167_v46 = vsel %vm7077_vm6, %v4523_v45, %v4524_v3  ;;  %v8178_v7 = vld [vmem:[%s6836_s21 + $0xd0] sm:$0xf] }
 0x118   : > { %6017 = vmatprep.mubr.msk.bf16.mxu1 %vm773_vm3, %v6576_v6  ;;  %v4531_v40 = vrot.slane %v7922_v17, 5  ;;  %v4056_v10 = vrot.slane %v4054_v26, 4  ;;  %v4059_v6 = vrot.slane %v4057_v18, 5  ;;  %v5727_v43 = vcombine.low %v8154_v1, %v8167_v46  ;;  %v8190_v18 = vld [vmem:[%s6836_s21 + $0xc8] sm:$0x1] }
 0x119   : > { %v2373_v20 = vor.u32 %v2372_v44, %v2369_v55  ;;  %v8175_v11 = vrot.slane %v4063_v27, 5  ;;  %v4069_v21 = vrot.slane %v4067_v29, 4  ;;  %v8182_v54 = vsel %vm7077_vm6, %v5710_v61, %v4528_v8  ;;  %v8751_v55 = vld [vmem:[#allocation5_spill] sm:$0xff] }
 0x11a   : > { %v4530_v3 = vrot.slane %v4528_v8, 4  ;;  %v4028_v17 = vsel %vm6855_vm2, %v8114_v52, %v8094_v38  ;;  %v4046_v26 = vor.u32 %v4045_v31, %v8127_v51  ;;  %v4078_v16 = vshrl.u32 %v5647_v5, 16  ;;  %v8752_v31 = vld [vmem:[#allocation10_spill] sm:$0xff] }
 0x11b   : > { %v2374_v27 = vrot.slane %v2373_v20, 4  ;;  %v4081_v29 = vshll.u32 %v5647_v5, 16  ;;  %v5711_v13 = vrot.slane %v5695_v22, 9  ;;  %v4535_v45 = vrot.slane %v8750_v24, 5 }
 0x11c   : > { %v8196_v58 = vsel %vm7077_vm6, %v4530_v3, %v4531_v40  ;;  %v4087_v38 = vshll.u32 %v8178_v7, 16  ;;  %v4091_v52 = vshrl.u32 %v8178_v7, 16  ;;  %v4060_v44 = vor.u32 %v4059_v6, %v4056_v10  ;;  %v5696_v10 = vld [vmem:[%s6836_s21 + $0x9c] sm:$0xe]  ;;  %v6579_v6 = vld [vmem:[%s6836_s21 + $0x30] sm:$0xff]  }
 0x11d   : > { %v5728_v61 = vcombine.low %v8182_v54, %v8196_v58  ;;  %v4073_v49 = vshll.u32 %v8190_v18, 16  ;;  %v4051_v5 = vrot.slane %v4049_v63, 5  ;;  %v8217_v40 = vsel %vm7077_vm6, %v5711_v13, %v4535_v45  ;;  %v6580_v13 = vld [vmem:[%s6836_s21 + $0x3c] sm:$0xff]  }
 0x11e   : > { %6170 = vmatmul.mubr.msk.bf16.gmra.mrb[16].mxu0 %vm773_vm3, %v8030_v9  ;;  %v2379_v9 = vsel %vm6855_vm2, %v2374_v27, %v8751_v55  ;;  %v4538_v20 = vrot.slane %v7930_v0, 5  ;;  %v5664_v22 = vcombine.low %v4018_v57, %v4028_v17  ;;  %v4037_v3 = vrot.slane %v4036_v12, 4 }
 0x11f   : > { %6018 = vmatmul.mubr.msk.bf16.vlgmr.msra.gmra.mrb[0].mxu1 %vm773_vm3, %v6577_v14  ;;  %6173 = vmatprep.mubr.msk.bf16.mxu0 %vm773_vm3, %v8033_v33  ;;  %v4070_v33 = vor.u32 %v4069_v21, %v8175_v11  ;;  %v8213_v8 = vcombine.low %v2379_v9, %v2389_v34  ;;  %v4537_v14 = vrot.slane %v4535_v45, 4  ;;  %v4047_v27 = vrot.slane %v4046_v26, 4  ;;  %v8223_v21 = vld [vmem:[%s6836_s21 + $0xd4] sm:$0x1]  ;;  %v5685_v9 = vld [vmem:[%s6836_s21 + $0x18] sm:$0xe] }
 0x120   : > { %6220 = vmatpush3.bf16.msra.mxu1 %v8752_v31  ;;  %6021 = vmatprep.mubr.msk.bf16.mxu1 %vm773_vm3, %v6578_v60  ;;  %v4080_v60 = vrot.slane %v4078_v16, 4  ;;  %v4083_v24 = vrot.slane %v4081_v29, 5  ;;  %v8225_v34 = vrot.slane %v4087_v38, 5  ;;  %v4093_v55 = vrot.slane %v4091_v52, 4 }
 0x121   : > { %v8229_v63 = vsel %vm7077_vm6, %v4537_v14, %v4538_v20  ;;  %v4061_v45 = vrot.slane %v4060_v44, 4  ;;  %v4071_v0 = vrot.slane %v4070_v33, 4  ;;  %v4075_v57 = vrot.slane %v4073_v49, 5  ;;  %v6631_v33 = vld [vmem:[%s6836_s21 + $0x1c] sm:$0xf] }
 0x122   : > { %v5729_v12 = vcombine.low %v8217_v40, %v8229_v63  ;;  %v5712_v17 = vrot.slane %v5696_v10, 9  ;;  %v4542_v26 = vrot.slane %v7927_v50, 5  ;;  %v4042_v16 = vsel %vm6855_vm2, %v4037_v3, %v8127_v51  ;;  %v5697_v14 = vld [vmem:[%s6836_s21 + $0xa8] sm:$0xe] }
 0x123   : > { %v4052_v29 = vsel %vm6855_vm2, %v4047_v27, %v4051_v5  ;;  %v4097_v38 = vshll.u32 %v8223_v21, 16  ;;  %v4545_v52 = vrot.slane %v7961_v53, 5  ;;  %v4084_v50 = vor.u32 %v4083_v24, %v4080_v60  ;;  %v6581_v60 = vld [vmem:[%s6836_s21 + $0x48] sm:$0xff]   ;;  %v6632_v24 = vld [vmem:[%s6836_s21 + $0x20] sm:$0x1] }
 0x124   : > { %v8250_v51 = vsel %vm7077_vm6, %v5712_v17, %v4542_v26  ;;  %v4544_v31 = vrot.slane %v4542_v26, 4  ;;  %v4066_v53 = vsel %vm6855_vm2, %v4061_v45, %v8175_v11  ;;  %v4076_v44 = vsel %vm6855_vm2, %v4071_v0, %v4075_v57  ;;  %v5698_v26 = vld [vmem:[%s6836_s21 + $0xb4] sm:$0xe] }
 0x125   : > { %v4465_v49 = vrot.slane %v6631_v33, 5  ;;  %v5665_v20 = vcombine.low %v4042_v16, %v4052_v29  ;;  %v5701_v3 = vrot.slane %v5685_v9, 9  ;;  %v5666_v11 = vcombine.low %v4066_v53, %v4076_v44  ;;  %v5687_v33 = vld [vmem:[%s6836_s21 + $0x30] sm:$0xe] }
 0x126   : > { %6174 = vmatmul.mubr.msk.bf16.gmra.mrb[20].mxu0 %vm773_vm3, %v8102_v15  ;;  %v4094_v15 = vor.u32 %v4093_v55, %v8225_v34  ;;  %v8261_v5 = vsel %vm7077_vm6, %v4544_v31, %v4545_v52  ;;  %v4085_v10 = vrot.slane %v4084_v50, 4  ;;  %v4468_v55 = vrot.slane %v6632_v24, 5  ;;  %v5686_v52 = vld [vmem:[%s6836_s21 + $0x24] sm:$0xe]  ;;  %v6633_v50 = vld [vmem:[%s6836_s21 + $0x28] sm:$0xf] }
 0x127   : > { %6022 = vmatmul.mubr.msk.bf16.gmra.mrb[4].mxu1 %vm773_vm3, %v6579_v6  ;;  %6177 = vmatprep.mubr.msk.bf16.mxu0 %vm773_vm3, %v5664_v22  ;;  %v4099_v22 = vrot.slane %v4097_v38, 5  ;;  %v5730_v27 = vcombine.low %v8250_v51, %v8261_v5  ;;  %v4467_v45 = vrot.slane %v4465_v49, 4  ;;  %v5713_v0 = vrot.slane %v5697_v14, 9  ;;  %v6634_v31 = vld [vmem:[%s6836_s21 + $0x34] sm:$0xf] }
 0x128   : > { %6025 = vmatprep.mubr.msk.bf16.mxu1 %vm773_vm3, %v6580_v13  ;;  %v4095_v6 = vrot.slane %v4094_v15, 4  ;;  %v6582_v13 = vld [vmem:[%s6836_s21 + $0x54] sm:$0xff]   ;;  %v4549_v57 = vrot.slane %v7964_v4, 5  ;;  %v4552_v17 = vrot.slane %v8007_v59, 5  ;;  %v4090_v4 = vsel %vm6855_vm2, %v4085_v10, %v8225_v34  ;;  %v6583_v10 = vld [vmem:[%s6836_s21 + $0x60] sm:$0xff]  }
 0x129   : > { %v4466_v38 = vsel %vm7077_vm6, %v5701_v3, %v4465_v49  ;;  %v4472_v15 = vrot.slane %v6633_v50, 5  ;;  %v4469_v9 = vsel %vm7077_vm6, %v4467_v45, %v4468_v55  ;;  %v4479_v53 = vrot.slane %v6634_v31, 5  ;;  %v6635_v3 = vld [vmem:[%s6836_s21 + $0x2c] sm:$0x1]  ;;  %v6650_v51 = vld [vmem:[%s6836_s21 + $0xc8] sm:$0x1] }
 0x12a   : > { %v8275_v16 = vsel %vm7077_vm6, %v5713_v0, %v4549_v57  ;;  %v4551_v29 = vrot.slane %v4549_v57, 4  ;;  %v4100_v59 = vsel %vm6855_vm2, %v4095_v6, %v4099_v22  ;;  %v5714_v44 = vrot.slane %v5698_v26, 9  ;;  %v6584_v45 = vld [vmem:[%s6836_s21 + $0x6c] sm:$0xff]   ;;  %v5699_v26 = vld [vmem:[%s6836_s21 + $0xc0] sm:$0xe] }
 0x12b   : > { %v4556_v14 = vrot.slane %v8057_v35, 5  ;;  %v5702_v22 = vrot.slane %v5686_v52, 9  ;;  %v5719_v6 = vcombine.low %v4466_v38, %v4469_v9  ;;  %v4474_v24 = vrot.slane %v4472_v15, 4  ;;  %v6636_v35 = vld [vmem:[%s6836_s21 + $0x38] sm:$0x1]  ;;  %v8753_v38 = vld [vmem:[#allocation8_spill] sm:$0xff] }
 0x12c   : > { %v8294_v34 = vsel %vm7077_vm6, %v4551_v29, %v4552_v17  ;;  %v5703_v0 = vrot.slane %v5687_v33, 9  ;;  %v4481_v57 = vrot.slane %v4479_v53, 4  ;;  %v4482_v17 = vrot.slane %v6636_v35, 5 }
 0x12d   : > { %v5731_v49 = vcombine.low %v8275_v16, %v8294_v34  ;;  %v8305_v55 = vsel %vm7077_vm6, %v5714_v44, %v4556_v14  ;;  %v4486_v52 = vrot.slane %v8753_v38, 5  ;;  %v5715_v50 = vrot.slane %v5699_v26, 9  ;;  %v5688_v44 = vld [vmem:[%s6836_s21 + $0x3c] sm:$0xe]  ;;  %v6637_v38 = vld [vmem:[%s6836_s21 + $0x70] sm:$0xf] }
 0x12e   : > { %6178 = vmatmul.mubr.msk.bf16.gmra.mrb[24].mxu0 %vm773_vm3, %v5665_v20  ;;  %v5667_v20 = vcombine.low %v4090_v4, %v4100_v59  ;;  %v4473_v4 = vsel %vm7077_vm6, %v5702_v22, %v4472_v15  ;;  %v4480_v9 = vsel %vm7077_vm6, %v5703_v0, %v4479_v53  ;;  %v4483_v31 = vsel %vm7077_vm6, %v4481_v57, %v4482_v17  ;;  %v5409_v22 = vld [vmem:[%s6836_s21 + $0x6c] sm:$0xf] }
 0x12f   : > { %6026 = vmatmul.mubr.msk.bf16.gmra.mrb[8].mxu1 %vm773_vm3, %v6581_v60  ;;  %6181 = vmatprep.mubr.msk.bf16.mxu0 %vm773_vm3, %v5666_v11  ;;  %v4475_v60 = vrot.slane %v6635_v3, 5  ;;  %v4559_v11 = vrot.slane %v8135_v30, 5  ;;  %v4563_v33 = vrot.slane %v8119_v39, 5  ;;  %v4566_v15 = vrot.slane %v8190_v18, 5 }
 0x130   : > { %6029 = vmatprep.mubr.msk.bf16.mxu1 %vm773_vm3, %v6582_v13  ;;  %v4558_v13 = vrot.slane %v4556_v14, 4  ;;  %v5700_v14 = vld [vmem:[%s6836_s21 + $0xcc] sm:$0xe]  ;;  %v4488_v53 = vrot.slane %v4486_v52, 4  ;;  %v2343_v0 = vshrl.u32 %v5409_v22, 16  ;;  %v2346_v57 = vshll.u32 %v5409_v22, 16 }
 0x131   : > { %v4476_v59 = vsel %vm7077_vm6, %v4474_v24, %v4475_v60  ;;  %v8336_v3 = vsel %vm7077_vm6, %v5715_v50, %v4563_v33  ;;  %v4565_v60 = vrot.slane %v4563_v33, 4  ;;  %v8754_v24 = vld [vmem:[#allocation9_spill] sm:$0xff]  ;;  %v5716_v18 = vrot.slane %v5700_v14, 9 }
 0x132   : > { %v8312_v29 = vsel %vm7077_vm6, %v4558_v13, %v4559_v11  ;;  %v6585_v11 = vld [vmem:[%s6836_s21 + $0x78] sm:$0xff]   ;;  %v4489_v13 = vrot.slane %v8754_v24, 5  ;;  %v4570_v17 = vrot.slane %v8178_v7, 5  ;;  %v4573_v26 = vrot.slane %v8223_v21, 5 }
 0x133   : > { %v5732_v30 = vcombine.low %v8305_v55, %v8312_v29  ;;  %v8343_v39 = vsel %vm7077_vm6, %v4565_v60, %v4566_v15  ;;  %v2352_v50 = vshll.u32 %v6637_v38, 16  ;;  %v6587_v15 = vld [vmem:[%s6836_s21 + $0x90] sm:$0xff]   ;;  %v6588_v60 = vld [vmem:[%s6836_s21 + $0x9c] sm:$0xff]   ;;  %v2530_v5 = vshll.u32 %v6650_v51, 16 }
 0x134   : > { %v5733_v35 = vcombine.low %v8336_v3, %v8343_v39  ;;  %v8360_v7 = vsel %vm7077_vm6, %v5716_v18, %v4570_v17  ;;  %v4572_v21 = vrot.slane %v4570_v17, 4  ;;  %v5418_v17 = vld [vmem:[%s6836_s21 + $0x90] sm:$0xf] }
 0x135   : > { %v2354_v14 = vrot.slane %v2352_v50, 5 }
 0x136   : > { %6182 = vmatmul.mubr.msk.bf16.gmra.mrb[28].mxu0 %vm773_vm3, %v5667_v20  ;;  %v5720_v20 = vcombine.low %v4473_v4, %v4476_v59  ;;  %v4490_v59 = vsel %vm7077_vm6, %v4488_v53, %v4489_v13 }
 0x137   : > { %6030 = vmatmul.mubr.msk.bf16.gmra.mrb[12].mxu1 %vm773_vm3, %v6583_v10  ;;  %6187 = vmatprep.mubr.msk.bf16.mxu0 %vm773_vm3, %v5719_v6  ;;  %v5721_v10 = vcombine.low %v4480_v9, %v4483_v31  ;;  %v5704_v6 = vrot.slane %v5688_v44, 9  ;;  %v2356_v9 = vshrl.u32 %v6637_v38, 16  ;;  %v2345_v31 = vrot.slane %v2343_v0, 4  ;;  %v6590_v38 = vld [vmem:[%s6836_s21 + $0xb4] sm:$0xff]  }
 0x138   : > { %6033 = vmatprep.mubr.msk.bf16.mxu1 %vm773_vm3, %v6584_v45  ;;  %v6586_v45 = vld [vmem:[%s6836_s21 + $0x84] sm:$0xff]   ;;  %v2348_v44 = vrot.slane %v2346_v57, 5 }
 0x139   : > { %v4487_v4 = vsel %vm7077_vm6, %v5704_v6, %v4486_v52  ;;  %v8364_v52 = vsel %vm7077_vm6, %v4572_v21, %v4573_v26  ;;  %v6638_v6 = vld [vmem:[%s6836_s21 + $0x74] sm:$0x1]  ;;  %v6589_v26 = vld [vmem:[%s6836_s21 + $0xa8] sm:$0xff]   ;;  %v2415_v21 = vshrl.u32 %v5418_v17, 16 }
 0x13a   : > { %v5722_v33 = vcombine.low %v4487_v4, %v4490_v59  ;;  %v5734_v22 = vcombine.low %v8360_v7, %v8364_v52  ;;  %v2362_v53 = vshll.u32 %v6638_v6, 16  ;;  %v5421_v59 = vld [vmem:[%s6836_s21 + $0x9c] sm:$0xf]  ;;  %v6642_v6 = vld [vmem:[%s6836_s21 + $0x8c] sm:$0x1] }
 0x13c   : > { %v2364_v48 = vrot.slane %v2362_v53, 5  ;;  %v2410_v53 = vshll.u32 %v6642_v6, 16 }
 0x13e   : > { %6188 = vmatmul.mubr.msk.bf16.vlgmr.msra.gmra.mrb[0].mxu0 %vm773_vm3, %v5720_v20  ;;  %v2358_v20 = vrot.slane %v2356_v9, 4 }
 0x13f   : > { %6034 = vmatmul.mubr.msk.bf16.gmra.mrb[16].mxu1 %vm773_vm3, %v6585_v11  ;;  %6191 = vmatprep.mubr.msk.bf16.mxu0 %vm773_vm3, %v5721_v10  ;;  %v5415_v11 = vld [vmem:[%s6836_s21 + $0x84] sm:$0xf]  ;;  %v2349_v10 = vor.u32 %v2348_v44, %v2345_v31  ;;  %v2418_v31 = vshll.u32 %v5418_v17, 16 }
 0x140   : > { %6037 = vmatprep.mubr.msk.bf16.mxu1 %vm773_vm3, %v6586_v45  ;;  %v2359_v2 = vor.u32 %v2358_v20, %v2354_v14  ;;  %v2391_v24 = vshrl.u32 %v5415_v11, 16  ;;  %v2394_v13 = vshll.u32 %v5415_v11, 16  ;;  %v6639_v45 = vld [vmem:[%s6836_s21 + $0x88] sm:$0xf]  ;;  %v2442_v11 = vshll.u32 %v5421_v59, 16 }
 0x141   : > { %v2400_v18 = vshll.u32 %v6639_v45, 16  ;;  %v2404_v0 = vshrl.u32 %v6639_v45, 16  ;;  %v2350_v57 = vrot.slane %v2349_v10, 4  ;;  %v2448_v10 = vshll.u32 %v6641_v62, 16 }
 0x142   : > { %v2360_v4 = vrot.slane %v2359_v2, 4  ;;  %v2393_v47 = vrot.slane %v2391_v24, 4  ;;  %v2417_v24 = vrot.slane %v2415_v21, 4  ;;  %v2420_v32 = vrot.slane %v2418_v31, 5  ;;  %v6644_v31 = vld [vmem:[%s6836_s21 + $0xa4] sm:$0x1] }
 0x143   : > { %v8384_v50 = vrot.slane %v2400_v18, 5  ;;  %v2406_v9 = vrot.slane %v2404_v0, 4  ;;  %v2355_v44 = vsel %vm6855_vm2, %v2350_v57, %v2354_v14  ;;  %v2444_v45 = vrot.slane %v2442_v11, 5  ;;  %v6591_v18 = vld [vmem:[%s6836_s21 + $0xc0] sm:$0xff]  }
 0x144   : > { %v2365_v14 = vsel %vm6855_vm2, %v2360_v4, %v2364_v48  ;;  %v8407_v17 = vrot.slane %v2448_v10, 5  ;;  %v5424_v4 = vld [vmem:[%s6836_s21 + $0xa8] sm:$0xf] }
 0x145   : > { %v2407_v2 = vor.u32 %v2406_v9, %v8384_v50  ;;  %v5443_v0 = vcombine.low %v2355_v44, %v2365_v14  ;;  %v2458_v44 = vshll.u32 %v6644_v31, 16  ;;  %v2466_v25 = vshll.u32 %v5424_v4, 16 }
 0x146   : > { %6192 = vmatmul.mubr.msk.bf16.gmra.mrb[4].mxu0 %vm773_vm3, %v5722_v33  ;;  %v6640_v33 = vld [vmem:[%s6836_s21 + $0x94] sm:$0xf] }
 0x147   : > { %6038 = vmatmul.mubr.msk.bf16.gmra.mrb[20].mxu1 %vm773_vm3, %v6587_v15  ;;  %6195 = vmatprep.mubr.msk.bf16.mxu0 %vm773_vm3, %v5723_v42  ;;  %v2396_v42 = vrot.slane %v2394_v13, 5  ;;  %v2424_v15 = vshll.u32 %v6640_v33, 16  ;;  %v2428_v20 = vshrl.u32 %v6640_v33, 16  ;;  %v2408_v48 = vrot.slane %v2407_v2, 4 }
 0x148   : > { %6041 = vmatprep.mubr.msk.bf16.mxu1 %vm773_vm3, %v6588_v60  ;;  %v2439_v60 = vshrl.u32 %v5421_v59, 16  ;;  %v6643_v59 = vld [vmem:[%s6836_s21 + $0x98] sm:$0x1]  ;;  %v2463_v33 = vshrl.u32 %v5424_v4, 16  ;;  %v5430_v4 = vld [vmem:[%s6836_s21 + $0xc0] sm:$0xf] }
 0x149   : > { %v2397_v37 = vor.u32 %v2396_v42, %v2393_v47  ;;  %v8404_v41 = vrot.slane %v2424_v15, 5  ;;  %v2412_v47 = vrot.slane %v2410_v53, 5  ;;  %v2421_v42 = vor.u32 %v2420_v32, %v2417_v24  ;;  %v5427_v15 = vld [vmem:[%s6836_s21 + $0xb4] sm:$0xf] }
 0x14a   : > { %v2441_v13 = vrot.slane %v2439_v60, 4  ;;  %v2476_v60 = vshrl.u32 %v6645_v19, 16  ;;  %v2487_v1 = vshrl.u32 %v5427_v15, 16  ;;  %v2490_v46 = vshll.u32 %v5427_v15, 16 }
 0x14b   : > { %v2398_v57 = vrot.slane %v2397_v37, 4  ;;  %v2413_v14 = vsel %vm6855_vm2, %v2408_v48, %v2412_v47  ;;  %v2422_v37 = vrot.slane %v2421_v42, 4  ;;  %v2460_v53 = vrot.slane %v2458_v44, 5 }
 0x14c   : > { %v2445_v21 = vor.u32 %v2444_v45, %v2441_v13  ;;  %v2465_v24 = vrot.slane %v2463_v33, 4  ;;  %v2478_v45 = vrot.slane %v2476_v60, 4  ;;  %v6649_v33 = vld [vmem:[%s6836_s21 + $0xbc] sm:$0x1] }
 0x14d   : > { %v2403_v11 = vsel %vm6855_vm2, %v2398_v57, %v8384_v50  ;;  %v2427_v48 = vsel %vm6855_vm2, %v2422_v37, %v8404_v41  ;;  %v2506_v40 = vshll.u32 %v6649_v33, 16 }
 0x14e   : > { %6196 = vmatmul.mubr.msk.bf16.gmra.mrb[8].mxu0 %vm773_vm3, %v5724_v56  ;;  %v2452_v56 = vshrl.u32 %v6641_v62, 16  ;;  %v2446_v6 = vrot.slane %v2445_v21, 4  ;;  %v5445_v50 = vcombine.low %v2403_v11, %v2413_v14 }
 0x14f   : > { %6042 = vmatmul.mubr.msk.bf16.gmra.mrb[24].mxu1 %vm773_vm3, %v6589_v26  ;;  %6199 = vmatprep.mubr.msk.bf16.mxu0 %vm773_vm3, %v5725_v23  ;;  %v2430_v23 = vrot.slane %v2428_v20, 4 }
 0x150   : > { %6045 = vmatprep.mubr.msk.bf16.mxu1 %vm773_vm3, %v6590_v38  ;;  %v2454_v26 = vrot.slane %v2452_v56, 4  ;;  %v2434_v38 = vshll.u32 %v6643_v59, 16  ;;  %v2451_v42 = vsel %vm6855_vm2, %v2446_v6, %v8407_v17  ;;  %v2532_v6 = vrot.slane %v2530_v5, 5 }
 0x151   : > { %v2431_v9 = vor.u32 %v2430_v23, %v8404_v41  ;;  %v2468_v23 = vrot.slane %v2466_v25, 5  ;;  %v6647_v41 = vld [vmem:[%s6836_s21 + $0xb0] sm:$0x1] }
 0x152   : > { %v2455_v20 = vor.u32 %v2454_v26, %v8407_v17  ;;  %v2436_v62 = vrot.slane %v2434_v38, 5  ;;  %v2482_v59 = vshll.u32 %v6647_v41, 16  ;;  %v2511_v38 = vshrl.u32 %v5430_v4, 16 }
 0x153   : > { %v2432_v2 = vrot.slane %v2431_v9, 4  ;;  %v2469_v58 = vor.u32 %v2468_v23, %v2465_v24  ;;  %v2514_v17 = vshll.u32 %v5430_v4, 16  ;;  %v6648_v9 = vld [vmem:[%s6836_s21 + $0xc4] sm:$0xf] }
 0x154   : > { %v2456_v32 = vrot.slane %v2455_v20, 4  ;;  %v2520_v21 = vshll.u32 %v6648_v9, 16  ;;  %v2524_v31 = vshrl.u32 %v6648_v9, 16  ;;  %v2484_v25 = vrot.slane %v2482_v59, 5 }
 0x155   : > { %v2437_v47 = vsel %vm6855_vm2, %v2432_v2, %v2436_v62  ;;  %v2470_v15 = vrot.slane %v2469_v58, 4  ;;  %v2508_v62 = vrot.slane %v2506_v40, 5 }
 0x156   : > { %6200 = vmatmul.mubr.msk.bf16.gmra.mrb[12].mxu0 %vm773_vm3, %v5726_v36  ;;  %v2472_v36 = vshll.u32 %v6645_v19, 16  ;;  %v2461_v54 = vsel %vm6855_vm2, %v2456_v32, %v2460_v53  ;;  %v5446_v63 = vcombine.low %v2427_v48, %v2437_v47  ;;  %v2513_v19 = vrot.slane %v2511_v38, 4  ;;  %v8518_v47 = vld [vmem:[%s8687_s3] ss:$0 sm:$0xff] }
 0x157   : > { %6046 = vmatmul.mubr.msk.bf16.gmra.mrb[28].mxu1 %vm773_vm3, %v6591_v18  ;;  %6203 = vmatprep.mubr.msk.bf16.mxu0 %vm773_vm3, %v5727_v43  ;;  %v6646_v43 = vld [vmem:[%s6836_s21 + $0xb8] sm:$0xf]  ;;  %v2489_v18 = vrot.slane %v2487_v1, 4  ;;  %v2522_v60 = vrot.slane %v2520_v21, 5  ;;  %v2526_v11 = vrot.slane %v2524_v31, 4 }
 0x158   : > { %6067 = vmatprep.mubr.msk.bf16.mxu1 %vm773_vm3, %v5443_v0  ;;  %v2496_v10 = vshll.u32 %v6646_v43, 16  ;;  %v2500_v56 = vshrl.u32 %v6646_v43, 16  ;;  %v2474_v13 = vrot.slane %v2472_v36, 5  ;;  %v2492_v0 = vrot.slane %v2490_v46, 5 }
 0x159   : > { %v2516_v36 = vrot.slane %v2514_v17, 5 }
 0x15a   : > { %v2498_v57 = vrot.slane %v2496_v10, 5  ;;  %v2502_v26 = vrot.slane %v2500_v56, 4  ;;  %v2475_v1 = vsel %vm6855_vm2, %v2470_v15, %v2474_v13  ;;  %v2527_v10 = vor.u32 %v2526_v11, %v2522_v60 }
 0x15b   : > { %v2517_v43 = vor.u32 %v2516_v36, %v2513_v19 }
 0x15c   : > { %v2503_v44 = vor.u32 %v2502_v26, %v2498_v57  ;;  %v2528_v2 = vrot.slane %v2527_v10, 4  ;;  %v8512_v26 = vld [vmem:[%s8686_s2] ss:$0 sm:$0xff] }
 0x15d   : > { %v2518_v56 = vrot.slane %v2517_v43, 4 }
 0x15e   : > { %6204 = vmatmul.mubr.msk.bf16.gmra.mrb[16].mxu0 %vm773_vm3, %v5728_v61  ;;  %v2479_v61 = vor.u32 %v2478_v45, %v2474_v13  ;;  %v2504_v37 = vrot.slane %v2503_v44, 4  ;;  %v2533_v24 = vsel %vm6855_vm2, %v2528_v2, %v2532_v6 }
 0x15f   : > { %6068 = vmatmul.mubr.msk.bf16.vlgmr.msra.gmra.mrb[16].mxu1 %vm773_vm3, %v8213_v8  ;;  %6207 = vmatprep.mubr.msk.bf16.mxu0 %vm773_vm3, %v5729_v12  ;;  %v2493_v8 = vor.u32 %v2492_v0, %v2489_v18  ;;  %v5447_v12 = vcombine.low %v2451_v42, %v2461_v54  ;;  %v2523_v53 = vsel %vm6855_vm2, %v2518_v56, %v2522_v60 }
 0x160   : > { %6071 = vmatprep.mubr.msk.bf16.mxu1 %vm773_vm3, %v5445_v50  ;;  %v2480_v20 = vrot.slane %v2479_v61, 4  ;;  %v2509_v16 = vsel %vm6855_vm2, %v2504_v37, %v2508_v62  ;;  %v5450_v32 = vcombine.low %v2523_v53, %v2533_v24 }
 0x161   : > { %v2494_v14 = vrot.slane %v2493_v8, 4 }
 0x162   : > { %v2485_v46 = vsel %vm6855_vm2, %v2480_v20, %v2484_v25 }
 0x163   : > { %v5448_v34 = vcombine.low %v2475_v1, %v2485_v46 }
 0x166   : > { %6208 = vmatmul.mubr.msk.bf16.gmra.mrb[20].mxu0 %vm773_vm3, %v5730_v27  ;;  %v2499_v27 = vsel %vm6855_vm2, %v2494_v14, %v2498_v57 }
 0x167   : > { %6072 = vmatmul.mubr.msk.bf16.gmra.mrb[20].mxu1 %vm773_vm3, %v5446_v63  ;;  %6211 = vmatprep.mubr.msk.bf16.mxu0 %vm773_vm3, %v5731_v49  ;;  %v5449_v49 = vcombine.low %v2499_v27, %v2509_v16 }
 0x168   : > { %6075 = vmatprep.mubr.msk.bf16.mxu1 %vm773_vm3, %v5447_v12 }
 0x16e   : > { %6212 = vmatmul.mubr.msk.bf16.gmra.mrb[24].mxu0 %vm773_vm3, %v5732_v30 }
 0x16f   : > { %6076 = vmatmul.mubr.msk.bf16.gmra.mrb[24].mxu1 %vm773_vm3, %v5448_v34  ;;  %6215 = vmatprep.mubr.msk.bf16.mxu0 %vm773_vm3, %v5733_v35 }
 0x170   : > { %6079 = vmatprep.mubr.msk.bf16.mxu1 %vm773_vm3, %v5449_v49 }
 0x176   : > { %6216 = vmatmul.mubr.msk.bf16.gmra.mrb[28].mxu0 %vm773_vm3, %v5734_v22 }
 0x177   : > { %6080 = vmatmul.mubr.msk.bf16.gmra.mrb[28].mxu1 %vm773_vm3, %v5450_v32 }
 0x1f2   : > { %v6019_v55 = vpop.f32.mrb[0].mxu1 }
 0x1f3   : > { %v1943_v29 = vpop.f32.mrb[1].mxu1 }
 0x1f4   : > { %v6020_v30 = vpop.f32.mrb[2].mxu1 }
 0x1f5   : > { %v1946_v3 = vpop.f32.mrb[3].mxu1 }
 0x1fa   : > { %v6023_v39 = vpop.f32.mrb[4].mxu1 }
 0x1fb   : > { %v1959_v35 = vpop.f32.mrb[5].mxu1 }
 0x1fc   : > { %v6024_v23 = vpop.f32.mrb[6].mxu1 }
 0x1fd   : > { %v1962_v13 = vpop.f32.mrb[7].mxu1 }
 0x202   : > { %v6027_v45 = vpop.f32.mrb[8].mxu1 }
 0x203   : > { %v8495_v28 = vpop.f32.mrb[9].mxu1 }
 0x204   : > { %v8497_v50 = vpop.f32.mrb[10].mxu1 }
 0x205   : > { %v8499_v18 = vpop.f32.mrb[11].mxu1 }
 0x20a   : > { %v8501_v7 = vpop.f32.mrb[12].mxu1 }
 0x20b   : > { %v8503_v52 = vpop.f32.mrb[13].mxu1 }
 0x20c   : > { %v8505_v22 = vpop.f32.mrb[14].mxu1 }
 0x20d   : > { %v8507_v0 = vpop.f32.mrb[15].mxu1 }
 0x211   : > { %v6189_v57 = vpop.f32.mrb[0].mxu0 }
 0x212   : > { %v6221_v4 = vadd.f32 %v6189_v57, %v6019_v55  ;;  %v4714_v48 = vpop.f32.mrb[1].mxu0 }
 0x213   : > { %v6222_v42 = vadd.f32 %v4714_v48, %v1943_v29  ;;  %v6190_v54 = vpop.f32.mrb[2].mxu0 }
 0x214   : > { %v4882_v58 = vmul.f32 %v6221_v4, %v8512_v26  ;;  %v6223_v61 = vadd.f32 %v6190_v54, %v6020_v30  ;;  %v4717_v41 = vpop.f32.mrb[3].mxu0 }
 0x215   : > { %v4880_v59 = vmul.f32 %v6222_v42, %v8512_v26  ;;  %v6224_v38 = vadd.f32 %v4717_v41, %v1946_v3 }
 0x216   : > { %v4921_v17 = vadd.f32 %v8518_v47, %v4882_v58  ;;  %v4883_v9 = vmul.f32 %v6223_v61, %v8512_v26 }
 0x217   : > { %v4919_v21 = vadd.f32 %v8518_v47, %v4880_v59  ;;  %v4881_v31 = vmul.f32 %v6224_v38, %v8512_v26 }
 0x218   : > { %v4953_v8 = vmax.f32 %v4921_v17, 0.0  ;;  %v4922_v44 = vadd.f32 %v8518_v47, %v4883_v9 }
 0x219   : > { %v4951_v33 = vmax.f32 %v4919_v21, 0.0  ;;  %v4920_v40 = vadd.f32 %v8518_v47, %v4881_v31  ;;  %v6193_v63 = vpop.f32.mrb[4].mxu0 }
 0x21a   : > { %v4985_v12 = vmin.f32 %v4953_v8, 6.0  ;;  %v4954_v15 = vmax.f32 %v4922_v44, 0.0  ;;  %v6225_v20 = vadd.f32 %v6193_v63, %v6023_v39  ;;  %v4730_v25 = vpop.f32.mrb[5].mxu0 }
 0x21b   : > { %v4983_v19 = vmin.f32 %v4951_v33, 6.0  ;;  %v4952_v36 = vmax.f32 %v4920_v40, 0.0  ;;  %v6226_v60 = vadd.f32 %v4730_v25, %v1959_v35  ;;  %v6194_v11 = vpop.f32.mrb[6].mxu0 }
 0x21c   : > { %5017 = vst [vmem:[%s8530_s30 + $0x10] sm:$0xff] %v4985_v12  ;;  %v4986_v14 = vmin.f32 %v4954_v15, 6.0  ;;  %v4886_v37 = vmul.f32 %v6225_v20, %v8512_v26  ;;  %v6227_v62 = vadd.f32 %v6194_v11, %v6024_v23  ;;  %v4733_v1 = vpop.f32.mrb[7].mxu0 }
 0x21d   : > { %5015 = vst [vmem:[%s8530_s30] sm:$0xff] %v4983_v19  ;;  %v4984_v46 = vmin.f32 %v4952_v36, 6.0  ;;  %v4884_v43 = vmul.f32 %v6226_v60, %v8512_v26  ;;  %v6228_v10 = vadd.f32 %v4733_v1, %v1962_v13 }
 0x21e   : > { %5018 = vst [vmem:[%s8530_s30 + $0x18] sm:$0xff] %v4986_v14  ;;  %v4925_v51 = vadd.f32 %v8518_v47, %v4886_v37  ;;  %v4887_v5 = vmul.f32 %v6227_v62, %v8512_v26 }
 0x21f   : > { %5016 = vst [vmem:[%s8530_s30 + $0x8] sm:$0xff] %v4984_v46  ;;  %v4923_v27 = vadd.f32 %v8518_v47, %v4884_v43  ;;  %v4885_v16 = vmul.f32 %v6228_v10, %v8512_v26 }
 0x220   : > { %v4957_v34 = vmax.f32 %v4925_v51, 0.0  ;;  %v4926_v49 = vadd.f32 %v8518_v47, %v4887_v5 }
 0x221   : > { %v4955_v56 = vmax.f32 %v4923_v27, 0.0  ;;  %v4924_v2 = vadd.f32 %v8518_v47, %v4885_v16  ;;  %v6197_v6 = vpop.f32.mrb[8].mxu0 }
 0x222   : > { %v4989_v53 = vmin.f32 %v4957_v34, 6.0  ;;  %v4958_v24 = vmax.f32 %v4926_v49, 0.0  ;;  %v6229_v32 = vadd.f32 %v6197_v6, %v6027_v45  ;;  %v4746_v55 = vpop.f32.mrb[9].mxu0 }
 0x223   : > { %v4987_v29 = vmin.f32 %v4955_v56, 6.0  ;;  %v4956_v30 = vmax.f32 %v4924_v2, 0.0  ;;  %v6230_v3 = vadd.f32 %v4746_v55, %v8495_v28  ;;  %v6198_v39 = vpop.f32.mrb[10].mxu0 }
 0x224   : > { %5021 = vst [vmem:[%s8530_s30 + $0x30] sm:$0xff] %v4989_v53  ;;  %v4990_v35 = vmin.f32 %v4958_v24, 6.0  ;;  %v4890_v23 = vmul.f32 %v6229_v32, %v8512_v26  ;;  %v6231_v13 = vadd.f32 %v6198_v39, %v8497_v50  ;;  %v4749_v57 = vpop.f32.mrb[11].mxu0 }
 0x225   : > { %5019 = vst [vmem:[%s8530_s30 + $0x20] sm:$0xff] %v4987_v29  ;;  %v4988_v4 = vmin.f32 %v4956_v30, 6.0  ;;  %v4888_v48 = vmul.f32 %v6230_v3, %v8512_v26  ;;  %v6232_v45 = vadd.f32 %v4749_v57, %v8499_v18 }
 0x226   : > { %5022 = vst [vmem:[%s8530_s30 + $0x38] sm:$0xff] %v4990_v35  ;;  %v4929_v42 = vadd.f32 %v8518_v47, %v4890_v23  ;;  %v4891_v54 = vmul.f32 %v6231_v13, %v8512_v26 }
 0x227   : > { %5020 = vst [vmem:[%s8530_s30 + $0x28] sm:$0xff] %v4988_v4  ;;  %v4927_v28 = vadd.f32 %v8518_v47, %v4888_v48  ;;  %v4889_v58 = vmul.f32 %v6232_v45, %v8512_v26 }
 0x228   : > { %v4961_v61 = vmax.f32 %v4929_v42, 0.0  ;;  %v4930_v50 = vadd.f32 %v8518_v47, %v4891_v54 }
 0x229   : > { %v4959_v41 = vmax.f32 %v4927_v28, 0.0  ;;  %v4928_v59 = vadd.f32 %v8518_v47, %v4889_v58  ;;  %v6201_v38 = vpop.f32.mrb[12].mxu0 }
 0x22a   : > { %v4993_v18 = vmin.f32 %v4961_v61, 6.0  ;;  %v4962_v17 = vmax.f32 %v4930_v50, 0.0  ;;  %v6233_v9 = vadd.f32 %v6201_v38, %v8501_v7  ;;  %v4762_v21 = vpop.f32.mrb[13].mxu0 }
 0x22b   : > { %v4991_v31 = vmin.f32 %v4959_v41, 6.0  ;;  %v4960_v8 = vmax.f32 %v4928_v59, 0.0  ;;  %v6234_v44 = vadd.f32 %v4762_v21, %v8503_v52  ;;  %v6202_v33 = vpop.f32.mrb[14].mxu0 }
 0x22c   : > { %5025 = vst [vmem:[%s8530_s30 + $0x50] sm:$0xff] %v4993_v18  ;;  %v4994_v40 = vmin.f32 %v4962_v17, 6.0  ;;  %v4894_v63 = vmul.f32 %v6233_v9, %v8512_v26  ;;  %v6235_v12 = vadd.f32 %v6202_v33, %v8505_v22  ;;  %v4765_v15 = vpop.f32.mrb[15].mxu0 }
 0x22d   : > { %5023 = vst [vmem:[%s8530_s30 + $0x40] sm:$0xff] %v4991_v31  ;;  %v4992_v20 = vmin.f32 %v4960_v8, 6.0  ;;  %v4892_v25 = vmul.f32 %v6234_v44, %v8512_v26  ;;  %v6236_v7 = vadd.f32 %v4765_v15, %v8507_v0 }
 0x22e   : > { %5026 = vst [vmem:[%s8530_s30 + $0x58] sm:$0xff] %v4994_v40  ;;  %v4933_v19 = vadd.f32 %v8518_v47, %v4894_v63  ;;  %v4895_v36 = vmul.f32 %v6235_v12, %v8512_v26 }
 0x22f   : > { %5024 = vst [vmem:[%s8530_s30 + $0x48] sm:$0xff] %v4992_v20  ;;  %v4931_v52 = vadd.f32 %v8518_v47, %v4892_v25  ;;  %v4893_v60 = vmul.f32 %v6236_v7, %v8512_v26 }
 0x230   : > { %v4965_v11 = vmax.f32 %v4933_v19, 0.0  ;;  %v4934_v22 = vadd.f32 %v8518_v47, %v4895_v36 }
 0x231   : > { %v4963_v14 = vmax.f32 %v4931_v52, 0.0  ;;  %v4932_v37 = vadd.f32 %v8518_v47, %v4893_v60  ;;  %v6205_v62 = vpop.f32.mrb[16].mxu0 }
 0x232   : > { %v4997_v0 = vmin.f32 %v4965_v11, 6.0  ;;  %v4966_v1 = vmax.f32 %v4934_v22, 0.0  ;;  %v6069_v46 = vpop.f32.mrb[16].mxu1  ;;  %v4778_v43 = vpop.f32.mrb[17].mxu0 }
 0x233   : > { %v4995_v10 = vmin.f32 %v4963_v14, 6.0  ;;  %v4964_v51 = vmax.f32 %v4932_v37, 0.0  ;;  %v6237_v5 = vadd.f32 %v6205_v62, %v6069_v46  ;;  %v2737_v27 = vpop.f32.mrb[17].mxu1  ;;  %v6206_v16 = vpop.f32.mrb[18].mxu0 }
 0x234   : > { %5029 = vst [vmem:[%s8530_s30 + $0x70] sm:$0xff] %v4997_v0  ;;  %v4998_v34 = vmin.f32 %v4966_v1, 6.0  ;;  %v6238_v49 = vadd.f32 %v4778_v43, %v2737_v27  ;;  %v6070_v56 = vpop.f32.mrb[18].mxu1  ;;  %v4781_v2 = vpop.f32.mrb[19].mxu0 }
 0x235   : > { %5027 = vst [vmem:[%s8530_s30 + $0x60] sm:$0xff] %v4995_v10  ;;  %v4996_v6 = vmin.f32 %v4964_v51, 6.0  ;;  %v4898_v53 = vmul.f32 %v6237_v5, %v8512_v26  ;;  %v6239_v24 = vadd.f32 %v6206_v16, %v6070_v56  ;;  %v2740_v32 = vpop.f32.mrb[19].mxu1 }
 0x236   : > { %5030 = vst [vmem:[%s8530_s30 + $0x78] sm:$0xff] %v4998_v34  ;;  %v4896_v55 = vmul.f32 %v6238_v49, %v8512_v26  ;;  %v6240_v29 = vadd.f32 %v4781_v2, %v2740_v32 }
 0x237   : > { %5028 = vst [vmem:[%s8530_s30 + $0x68] sm:$0xff] %v4996_v6  ;;  %v4937_v30 = vadd.f32 %v8518_v47, %v4898_v53  ;;  %v4899_v3 = vmul.f32 %v6239_v24, %v8512_v26 }
 0x238   : > { %v4935_v39 = vadd.f32 %v8518_v47, %v4896_v55  ;;  %v4897_v35 = vmul.f32 %v6240_v29, %v8512_v26 }
 0x239   : > { %v4969_v23 = vmax.f32 %v4937_v30, 0.0  ;;  %v4938_v13 = vadd.f32 %v8518_v47, %v4899_v3  ;;  %v6209_v57 = vpop.f32.mrb[20].mxu0 }
 0x23a   : > { %v4967_v4 = vmax.f32 %v4935_v39, 0.0  ;;  %v4936_v48 = vadd.f32 %v8518_v47, %v4897_v35  ;;  %v6073_v45 = vpop.f32.mrb[20].mxu1  ;;  %v4794_v42 = vpop.f32.mrb[21].mxu0 }
 0x23b   : > { %v5001_v54 = vmin.f32 %v4969_v23, 6.0  ;;  %v4970_v28 = vmax.f32 %v4938_v13, 0.0  ;;  %v6241_v58 = vadd.f32 %v6209_v57, %v6073_v45  ;;  %v2753_v61 = vpop.f32.mrb[21].mxu1  ;;  %v6210_v50 = vpop.f32.mrb[22].mxu0 }
 0x23c   : > { %v4999_v41 = vmin.f32 %v4967_v4, 6.0  ;;  %v4968_v59 = vmax.f32 %v4936_v48, 0.0  ;;  %v6242_v38 = vadd.f32 %v4794_v42, %v2753_v61  ;;  %v6074_v18 = vpop.f32.mrb[22].mxu1  ;;  %v4797_v17 = vpop.f32.mrb[23].mxu0 }
 0x23d   : > { %5033 = vst [vmem:[%s8530_s30 + $0x90] sm:$0xff] %v5001_v54  ;;  %v5002_v9 = vmin.f32 %v4970_v28, 6.0  ;;  %v4902_v21 = vmul.f32 %v6241_v58, %v8512_v26  ;;  %v6243_v31 = vadd.f32 %v6210_v50, %v6074_v18  ;;  %v2756_v8 = vpop.f32.mrb[23].mxu1 }
 0x23e   : > { %5031 = vst [vmem:[%s8530_s30 + $0x80] sm:$0xff] %v4999_v41  ;;  %v5000_v44 = vmin.f32 %v4968_v59, 6.0  ;;  %v4900_v33 = vmul.f32 %v6242_v38, %v8512_v26  ;;  %v6244_v40 = vadd.f32 %v4797_v17, %v2756_v8 }
 0x23f   : > { %5034 = vst [vmem:[%s8530_s30 + $0x98] sm:$0xff] %v5002_v9  ;;  %v4941_v63 = vadd.f32 %v8518_v47, %v4902_v21  ;;  %v4903_v12 = vmul.f32 %v6243_v31, %v8512_v26 }
 0x240   : > { %5032 = vst [vmem:[%s8530_s30 + $0x88] sm:$0xff] %v5000_v44  ;;  %v4939_v15 = vadd.f32 %v8518_v47, %v4900_v33  ;;  %v4901_v20 = vmul.f32 %v6244_v40, %v8512_v26 }
 0x241   : > { %v4973_v25 = vmax.f32 %v4941_v63, 0.0  ;;  %v4942_v7 = vadd.f32 %v8518_v47, %v4903_v12  ;;  %v6213_v19 = vpop.f32.mrb[24].mxu0 }
 0x242   : > { %v4971_v36 = vmax.f32 %v4939_v15, 0.0  ;;  %v4940_v52 = vadd.f32 %v8518_v47, %v4901_v20  ;;  %v6077_v60 = vpop.f32.mrb[24].mxu1  ;;  %v4810_v11 = vpop.f32.mrb[25].mxu0 }
 0x243   : > { %v5005_v22 = vmin.f32 %v4973_v25, 6.0  ;;  %v4974_v14 = vmax.f32 %v4942_v7, 0.0  ;;  %v6245_v37 = vadd.f32 %v6213_v19, %v6077_v60  ;;  %v2769_v62 = vpop.f32.mrb[25].mxu1  ;;  %v6214_v0 = vpop.f32.mrb[26].mxu0 }
 0x244   : > { %v5003_v1 = vmin.f32 %v4971_v36, 6.0  ;;  %v4972_v46 = vmax.f32 %v4940_v52, 0.0  ;;  %v6246_v43 = vadd.f32 %v4810_v11, %v2769_v62  ;;  %v6078_v10 = vpop.f32.mrb[26].mxu1  ;;  %v4813_v51 = vpop.f32.mrb[27].mxu0 }
 0x245   : > { %5037 = vst [vmem:[%s8530_s30 + $0xb0] sm:$0xff] %v5005_v22  ;;  %v5006_v5 = vmin.f32 %v4974_v14, 6.0  ;;  %v4906_v27 = vmul.f32 %v6245_v37, %v8512_v26  ;;  %v6247_v16 = vadd.f32 %v6214_v0, %v6078_v10  ;;  %v2772_v34 = vpop.f32.mrb[27].mxu1 }
 0x246   : > { %5035 = vst [vmem:[%s8530_s30 + $0xa0] sm:$0xff] %v5003_v1  ;;  %v5004_v49 = vmin.f32 %v4972_v46, 6.0  ;;  %v4904_v56 = vmul.f32 %v6246_v43, %v8512_v26  ;;  %v6248_v2 = vadd.f32 %v4813_v51, %v2772_v34 }
 0x247   : > { %5038 = vst [vmem:[%s8530_s30 + $0xb8] sm:$0xff] %v5006_v5  ;;  %v4945_v6 = vadd.f32 %v8518_v47, %v4906_v27  ;;  %v4907_v53 = vmul.f32 %v6247_v16, %v8512_v26 }
 0x248   : > { %5036 = vst [vmem:[%s8530_s30 + $0xa8] sm:$0xff] %v5004_v49  ;;  %v4943_v24 = vadd.f32 %v8518_v47, %v4904_v56  ;;  %v4905_v32 = vmul.f32 %v6248_v2, %v8512_v26 }
 0x249   : > { %v4977_v55 = vmax.f32 %v4945_v6, 0.0  ;;  %v4946_v29 = vadd.f32 %v8518_v47, %v4907_v53  ;;  %v6217_v30 = vpop.f32.mrb[28].mxu0 }
 0x24a   : > { %v4975_v3 = vmax.f32 %v4943_v24, 0.0  ;;  %v4944_v39 = vadd.f32 %v8518_v47, %v4905_v32  ;;  %v6081_v35 = vpop.f32.mrb[28].mxu1  ;;  %v4826_v23 = vpop.f32.mrb[29].mxu0 }
 0x24b   : > { %v5009_v13 = vmin.f32 %v4977_v55, 6.0  ;;  %v4978_v57 = vmax.f32 %v4946_v29, 0.0  ;;  %v6249_v4 = vadd.f32 %v6217_v30, %v6081_v35  ;;  %v2785_v48 = vpop.f32.mrb[29].mxu1  ;;  %v6218_v45 = vpop.f32.mrb[30].mxu0 }
 0x24c   : > { %v5007_v42 = vmin.f32 %v4975_v3, 6.0  ;;  %v4976_v54 = vmax.f32 %v4944_v39, 0.0  ;;  %v6250_v28 = vadd.f32 %v4826_v23, %v2785_v48  ;;  %v6082_v58 = vpop.f32.mrb[30].mxu1  ;;  %v4829_v61 = vpop.f32.mrb[31].mxu0 }
 0x24d   : > { %5041 = vst [vmem:[%s8530_s30 + $0xd0] sm:$0xff] %v5009_v13  ;;  %v5010_v50 = vmin.f32 %v4978_v57, 6.0  ;;  %v4910_v41 = vmul.f32 %v6249_v4, %v8512_v26  ;;  %v6251_v59 = vadd.f32 %v6218_v45, %v6082_v58  ;;  %v2788_v38 = vpop.f32.mrb[31].mxu1 }
 0x24e   : > { %5039 = vst [vmem:[%s8530_s30 + $0xc0] sm:$0xff] %v5007_v42  ;;  %v5008_v18 = vmin.f32 %v4976_v54, 6.0  ;;  %v4908_v17 = vmul.f32 %v6250_v28, %v8512_v26  ;;  %v6252_v9 = vadd.f32 %v4829_v61, %v2788_v38 }
 0x24f   : > { %5042 = vst [vmem:[%s8530_s30 + $0xd8] sm:$0xff] %v5010_v50  ;;  %v4949_v21 = vadd.f32 %v8518_v47, %v4910_v41  ;;  %v4911_v31 = vmul.f32 %v6251_v59, %v8512_v26 }
 0x250   : > { %5040 = vst [vmem:[%s8530_s30 + $0xc8] sm:$0xff] %v5008_v18  ;;  %v4947_v8 = vadd.f32 %v8518_v47, %v4908_v17  ;;  %v4909_v44 = vmul.f32 %v6252_v9, %v8512_v26 }
 0x251   : > { %v4981_v33 = vmax.f32 %v4949_v21, 0.0  ;;  %v4950_v40 = vadd.f32 %v8518_v47, %v4911_v31 }
 0x252   : > { %v4979_v63 = vmax.f32 %v4947_v8, 0.0  ;;  %v4948_v12 = vadd.f32 %v8518_v47, %v4909_v44 }
 0x253   : > { %v5013_v15 = vmin.f32 %v4981_v33, 6.0  ;;  %v4982_v20 = vmax.f32 %v4950_v40, 0.0 }
 0x254   : > { %v5011_v25 = vmin.f32 %v4979_v63, 6.0  ;;  %v4980_v7 = vmax.f32 %v4948_v12, 0.0 }
 0x255   : > { %5045 = vst [vmem:[%s8530_s30 + $0xf0] sm:$0xff] %v5013_v15  ;;  %v5014_v19 = vmin.f32 %v4982_v20, 6.0 }
 0x256   : > { %5043 = vst [vmem:[%s8530_s30 + $0xe0] sm:$0xff] %v5011_v25  ;;  %v5012_v26 = vmin.f32 %v4980_v7, 6.0 }
 0x257   : > { %5046 = vst [vmem:[%s8530_s30 + $0xf8] sm:$0xff] %v5014_v19 }
 0x258   : > { %5044 = vst [vmem:[%s8530_s30 + $0xe8] sm:$0xff] %v5012_v26 }
 0x259   : > { %6664 = shalt.err (!%p6661_p5)
}
 0x25a   : > { %s6665_s14 = scalar_lea.hbm %s8629_s9, 4096  ;;  %s6669_s24 = scalar_lea.hbm %s8688_s4, 8192 }
 0x25b   : > { %p6666_p6 = scmp.ne.s32.totalorder %s8629_s9, %s6665_s14  ;;  %p6670_p10 = scmp.lt.u32.totalorder %s8629_s9, %s8688_s4 }
 0x25c   : > { %p6671_p11 = scmp.lt.u32.totalorder %s6669_s24, %s6665_s14  ;;  %p6673_p13 = scmp.lt.u32.totalorder %s6665_s14, %s8629_s9 }
 0x25d   : > { %p6667_p7 = pnand %p6666_p6, %p6799_p4 }
 0x25e   : > { %p6672_p12 = por %p6671_p11, %p6670_p10 }
 0x25f   : > { %p6668_p9 = pneg %p6667_p7 }
 0x260   : > { %p6674_p0 = por %p6673_p13, %p6672_p12 }
 0x262   : > { %p6675_p1 = pnand %p6674_p0, %p6668_p9 }
 0x264   : > { %6678 = shalt.err (!%p6675_p1)
}
 0x265   : > { %s6732_s30 = smov 128   ;;  %s6733_s5 = smov 8  }
 0x266   : > { %6478 = dma.vmem_to_hbm [thread:$0]  (%p6799_p4), %s8631_s6, 4096, %s8629_s9, %s8638_s18, %s6732_s30, %s6732_s30, %s6733_s5  }
 0x267 PF: > { %p6484_p2 = scmp.ge.s32.totalorder %s6729_s20, 2  ;;  %s5079_s7 = sand.u32 1, %s6709_s15  }
 0x268   : > { %s5080_s8 = scalar_lea.sflag [#allocation3], %s5079_s7 }
 0x269   : > { %p6481_p3 = pnand %p6484_p2, %p6806_p8 }
 0x26b   : > { %6704 = dma.done.wait (!%p6481_p3), %s5080_s8, 4096  }
 0x26c   : > { %6706 = vsyncadd (!%p6481_p3), %s5080_s8, 4294963200  ;;  %s17_s20 = sadd.s32 1, %s6729_s20   ;;  %s8755_s15 = smov %s6713_s16 }
 0x26d   : > { %p14_p5 = scmp.ge.s32.totalorder %s17_s20, 4   ;;  %s8756_s16 = smov %s6717_s17 }
 0x26e   : > { %s8757_s17 = smov %s6812_s28  ;;  %s8758_s18 = smov %s6725_s19 }
 0x26f   : > { %s8759_s19 = smov %s8761_s23  ;;  %16 = sbr.rel (!%p14_p5) target bundleno = 4 (0x4), region = 90 }
 0x276   :  { %5085 = vsyncpa [#allocation3], 1 }
 0x277   :  { %5087 = vsyncpa [#allocation3 + $0x1], 1 }

</bundles_post_ra>
